<compile_context>
chip_gen: v6e
topology: v6e:2x2x1
jax: 0.10.0
libtpu: 0.0.40
codegen_flags: <defaults>
</compile_context>

<pallas_src>
from functools import partial

import jax
import jax.numpy as jnp
from jax.experimental import pallas as pl
from jax.experimental.pallas import tpu as pltpu


NEG_SLOPE = 0.01                    # PyTorch nn.LeakyReLU default.
VMEM_LIMIT = 32 * 1024 * 1024       # Safe scoped-VMEM budget on v5e/v6e/v7x.
K_SPLIT = 2048                      # Only split the K reduction above this.


def _round_up(x, m):
    return (x + m - 1) // m * m


def _apply_act(x, act):
    if act == "lrelu":
        return jnp.where(x > 0.0, x, NEG_SLOPE * x)
    if act == "sigmoid":
        # Exact sigmoid: keeps reconstructions (which feed MSE/SSIM/PSNR)
        # closer to the f32 reference; exp runs on the EUP slot anyway.
        return 1.0 / (1.0 + jnp.exp(-x))
    return x


# -----------------------------------------------------------------------------
# Pallas kernel 1: tiled matmul + bias + activation
# -----------------------------------------------------------------------------
def _mm_bias_act_single_kernel(x_ref, w_ref, b_ref, o_ref, *, act):
    """Single K-block: bf16 MXU matmul with f32 accumulation in registers,
    fused bias + activation, lane-dense stores. No scratch, no pl.when."""
    acc = jnp.dot(x_ref[...], w_ref[...], preferred_element_type=jnp.float32)
    o_ref[...] = _apply_act(acc + b_ref[...], act).astype(o_ref.dtype)


def _mm_bias_act_multi_kernel(x_ref, w_ref, b_ref, o_ref, acc_ref, *, act):
    """K-split fallback (K > K_SPLIT): f32 accumulation across the K grid axis
    in VMEM scratch with pl.when init/finalize. Unused at this model's sizes."""
    k = pl.program_id(2)

    @pl.when(k == 0)
    def _init():
        acc_ref[...] = jnp.zeros_like(acc_ref)

    acc_ref[...] += jnp.dot(x_ref[...], w_ref[...],
                            preferred_element_type=jnp.float32)

    @pl.when(k == pl.num_programs(2) - 1)
    def _finalize():
        o_ref[...] = _apply_act(acc_ref[...] + b_ref[...],
                                act).astype(o_ref.dtype)


def mm_bias_act(x, w, b, n_true, act="none", out_dtype=jnp.bfloat16):
    """x: (M, K); w: (K, Npad) bf16 pre-padded/pre-cast (Npad % 128 == 0);
    b: (1, Npad) f32.  Returns (M, n_true) in out_dtype."""
    M, K = x.shape
    Kw, Npad = w.shape
    assert K == Kw and Npad % 128 == 0

    TN = 256 if Npad % 256 == 0 else 128            # fill the 256-wide MXU
    Mpad = _round_up(M, 16)                         # bf16-friendly sublane pad
    TM = min(256, Mpad)
    Mpad = _round_up(M, TM)
    grid_m, grid_n = Mpad // TM, Npad // TN
    # v7x has 2 TensorCores: keep at least one "parallel" extent >= 2.
    if grid_m == 1 and grid_n == 1 and TM % 32 == 0:
        TM //= 2
        grid_m = 2

    xp = x.astype(jnp.bfloat16)
    if Mpad != M:
        xp = jnp.pad(xp, ((0, Mpad - M), (0, 0)))

    if K <= K_SPLIT:
        out = pl.pallas_call(
            partial(_mm_bias_act_single_kernel, act=act),
            out_shape=jax.ShapeDtypeStruct((Mpad, Npad), out_dtype),
            grid_spec=pltpu.PrefetchScalarGridSpec(
                num_scalar_prefetch=0,
                grid=(grid_m, grid_n),
                in_specs=[
                    pl.BlockSpec((TM, K), lambda i, j: (i, 0)),
                    pl.BlockSpec((K, TN), lambda i, j: (0, j)),
                    pl.BlockSpec((1, TN), lambda i, j: (0, j)),
                ],
                out_specs=pl.BlockSpec((TM, TN), lambda i, j: (i, j)),
            ),
            compiler_params=pltpu.CompilerParams(
                dimension_semantics=("parallel", "parallel"),
                vmem_limit_bytes=VMEM_LIMIT),
        )(xp, w, b)
    else:
        k_steps = -(-K // K_SPLIT)
        TK = _round_up(-(-K // k_steps), 128)
        Kpad = TK * k_steps
        xp = jnp.pad(xp, ((0, 0), (0, Kpad - K)))
        wp = jnp.pad(w, ((0, Kpad - K), (0, 0)))
        out = pl.pallas_call(
            partial(_mm_bias_act_multi_kernel, act=act),
            out_shape=jax.ShapeDtypeStruct((Mpad, Npad), out_dtype),
            grid_spec=pltpu.PrefetchScalarGridSpec(
                num_scalar_prefetch=0,
                grid=(grid_m, grid_n, k_steps),
                in_specs=[
                    pl.BlockSpec((TM, TK), lambda i, j, k: (i, k)),
                    pl.BlockSpec((TK, TN), lambda i, j, k: (k, j)),
                    pl.BlockSpec((1, TN), lambda i, j, k: (0, j)),
                ],
                out_specs=pl.BlockSpec((TM, TN), lambda i, j, k: (i, j)),
                scratch_shapes=[pltpu.VMEM((TM, TN), jnp.float32)],
            ),
            compiler_params=pltpu.CompilerParams(
                dimension_semantics=("parallel", "parallel", "arbitrary"),
                vmem_limit_bytes=VMEM_LIMIT),
        )(xp, wp, b)
    return out[:M, :n_true]


# -----------------------------------------------------------------------------
# Pallas kernel 2: fused reconstruction metrics (3 pairs x MSE/SSIM/PSNR)
# -----------------------------------------------------------------------------
def _loss3_kernel(x_ref, xo_ref, xh_ref, xha_ref, o_ref, acc_ref, *,
                  n_feat, batch, rows_per_img):
    """Reads chunks of X, X_orig, X_hat, X_hat_anatomy (each image's features
    spread over 8 sublane rows), forms the diff pair in-kernel, accumulates
    per-row moments in VMEM scratch and finalizes [mse, ssim, psnr] for
    (X, X_hat), (X_orig, X_hat_anatomy), (diffs) into a flat (9,) SMEM out."""
    step = pl.program_id(0)

    @pl.when(step == 0)
    def _init():
        acc_ref[...] = jnp.zeros_like(acc_ref)

    x = x_ref[...]
    xo = xo_ref[...]
    xh = xh_ref[...]
    xha = xha_ref[...]

    pairs = ((x, xh), (xo, xha), (x - xo, xh - xha))
    for p, (a, b) in enumerate(pairs):
        acc_ref[5 * p + 0] += a
        acc_ref[5 * p + 1] += b
        acc_ref[5 * p + 2] += a * a
        acc_ref[5 * p + 3] += b * b
        acc_ref[5 * p + 4] += a * b

    @pl.when(step == pl.num_programs(0) - 1)
    def _finalize():
        n = jnp.float32(n_feat)
        c1 = jnp.float32(0.01 ** 2)
        c2 = jnp.float32(0.03 ** 2)
        for p in range(3):
            pa = acc_ref[5 * p + 0]
            pb = acc_ref[5 * p + 1]
            paa = acc_ref[5 * p + 2]
            pbb = acc_ref[5 * p + 3]
            pab = acc_ref[5 * p + 4]
            sse = jnp.float32(0.0)
            ssim_sum = jnp.float32(0.0)
            for bi in range(batch):
                lo = bi * rows_per_img
                hi = lo + rows_per_img
                s1a = jnp.sum(pa[lo:hi, :])
                s1b = jnp.sum(pb[lo:hi, :])
                s2a = jnp.sum(paa[lo:hi, :])
                s2b = jnp.sum(pbb[lo:hi, :])
                sab = jnp.sum(pab[lo:hi, :])
                sse = sse + (s2a - 2.0 * sab + s2b)
                # TODO(synk): exact Loss.calculate_reconstruction_loss source
                # not provided; windowed-gaussian SSIM approximated by global
                # per-image statistics (data_range assumed 1.0).
                mu_a = s1a / n
                mu_b = s1b / n
                va = s2a / n - mu_a * mu_a
                vb = s2b / n - mu_b * mu_b
                cov = sab / n - mu_a * mu_b
                ssim = ((2.0 * mu_a * mu_b + c1) * (2.0 * cov + c2)) / (
                    (mu_a * mu_a + mu_b * mu_b + c1) * (va + vb + c2))
                ssim_sum = ssim_sum + ssim
            mse = sse / (n * jnp.float32(batch))
            psnr = 10.0 * jnp.log10(1.0 / jnp.maximum(mse, 1e-12))
            o_ref[3 * p + 0] = mse
            o_ref[3 * p + 1] = ssim_sum / jnp.float32(batch)
            o_ref[3 * p + 2] = psnr


def recon_losses(x, xo, xh, xha):
    """All inputs (B, N) f32 with the same flattening.  Returns (9,) f32."""
    B, N = x.shape
    R = 8                                     # sublane rows per image
    Npad = _round_up(N, R * 128)
    cols = Npad // R
    if cols % 512 == 0:
        Nt = 512
    elif cols % 256 == 0:
        Nt = 256
    else:
        Nt = 128

    def _prep(a):
        a = a.astype(jnp.float32)
        if Npad != N:
            a = jnp.pad(a, ((0, 0), (0, Npad - N)))
        return a.reshape(B * R, cols)

    return pl.pallas_call(
        partial(_loss3_kernel, n_feat=float(N), batch=B, rows_per_img=R),
        out_shape=jax.ShapeDtypeStruct((9,), jnp.float32),
        grid_spec=pltpu.PrefetchScalarGridSpec(
            num_scalar_prefetch=0,
            grid=(cols // Nt,),
            in_specs=[pl.BlockSpec((B * R, Nt), lambda i: (0, i))] * 4,
            out_specs=pl.BlockSpec(memory_space=pltpu.MemorySpace.SMEM),
            scratch_shapes=[pltpu.VMEM((15, B * R, Nt), jnp.float32)],
        ),
        compiler_params=pltpu.CompilerParams(
            dimension_semantics=("arbitrary",),
            vmem_limit_bytes=VMEM_LIMIT),
    )(_prep(x), _prep(xo), _prep(xh), _prep(xha))


# -----------------------------------------------------------------------------
# Plain-JAX glue (fused under jit): im2col, upsample, parameter init / fusion
# -----------------------------------------------------------------------------
def im2col_nhwc(x, stride, pad):
    """(B, H, W, C) -> ((B*Ho*Wo, C*9), Ho, Wo); channel-major column order so
    channel-grouped fused weights stay block-diagonal."""
    # TODO(synk): move patch extraction into the Pallas conv kernel (DMA the
    # NHWC halo tile and form the 9 taps as ref slices) to avoid the 9x im2col
    # expansion through HBM at production sizes.
    x = jnp.pad(x, ((0, 0), (pad, pad), (pad, pad), (0, 0)))
    B, Hp, Wp, C = x.shape
    Ho = (Hp - 3) // stride + 1
    Wo = (Wp - 3) // stride + 1
    taps = []
    for i in range(3):
        for j in range(3):
            taps.append(x[:, i:i + stride * Ho:stride,
                          j:j + stride * Wo:stride, :])
    p = jnp.stack(taps, axis=-1)                        # (B, Ho, Wo, C, 9)
    return p.reshape(B * Ho * Wo, C * 9), Ho, Wo


def conv2d_nhwc(x, layer, n_out, stride, act, out_dtype=jnp.bfloat16):
    B = x.shape[0]
    cols, Ho, Wo = im2col_nhwc(x, stride=stride, pad=1)
    y = mm_bias_act(cols, layer["w"], layer["b"], n_out, act, out_dtype)
    return y.reshape(B, Ho, Wo, n_out)


def upsample2_nhwc(x):
    # TODO(synk): fold the 2x nearest-neighbour upsample into the conv's tap
    # indexing instead of materializing the 4x activation.
    return jnp.repeat(jnp.repeat(x, 2, axis=1), 2, axis=2)


def _init_linear(key, fan_in, fan_out):
    kw, kb = jax.random.split(key)
    w = jax.random.normal(kw, (fan_in, fan_out), jnp.float32) / jnp.sqrt(float(fan_in))
    b = jax.random.normal(kb, (fan_out,), jnp.float32) * 0.01
    return w, b


def init_encoder(key, img_size, in_channel, latent_dim):
    ks = jax.random.split(key, 4)
    f = img_size // 8
    return {
        "c1": _init_linear(ks[0], in_channel * 9, 16),
        "c2": _init_linear(ks[1], 16 * 9, 32),
        "c3": _init_linear(ks[2], 32 * 9, 64),
        "fc": _init_linear(ks[3], f * f * 64, latent_dim),   # K ordered (h,w,c)
    }


def init_decoder(key, img_size, in_channel, latent_in):
    ks = jax.random.split(key, 4)
    f = img_size // 8
    return {
        "fc": _init_linear(ks[0], latent_in, f * f * 64),    # N ordered (h,w,c)
        "c1": _init_linear(ks[1], 64 * 9, 32),
        "c2": _init_linear(ks[2], 32 * 9, 16),
        "c3": _init_linear(ks[3], 16 * 9, in_channel),
    }


def init_unoranic(key, img_size, in_channel, latent_dim, dropout=0.0):
    # dropout treated as eval-mode identity.
    k1, k2, k3, k4 = jax.random.split(key, 4)
    return {
        "enc_a": init_encoder(k1, img_size, in_channel, latent_dim),
        "enc_c": init_encoder(k2, img_size, in_channel, latent_dim),
        "dec_a": init_decoder(k3, img_size, in_channel, latent_dim),
        "dec":   init_decoder(k4, img_size, in_channel, 2 * latent_dim),
    }


# --- weight fusion: run both encoders (and both decoders) as ONE network -----
def _pack_layer(w, b):
    """Pre-pad N to a 128 multiple and pre-cast to the kernel layout ONCE."""
    K, N = w.shape
    Npad = _round_up(N, 128)
    return {
        "w": jnp.pad(w, ((0, 0), (0, Npad - N))).astype(jnp.bfloat16),
        "b": jnp.pad(b, (0, Npad - N)).astype(jnp.float32).reshape(1, Npad),
    }


def _concat_n(la, lb):
    """Both sub-layers read the SAME input -> just concat along N."""
    (wa, ba), (wb, bb) = la, lb
    return _pack_layer(jnp.concatenate([wa, wb], axis=1),
                       jnp.concatenate([ba, bb]))


def _block_diag(la, lb):
    """Sub-layers read disjoint channel groups (channel-major im2col K)."""
    (wa, ba), (wb, bb) = la, lb
    Ka, Na = wa.shape
    Kb, Nb = wb.shape
    w = jnp.zeros((Ka + Kb, Na + Nb), jnp.float32)
    w = w.at[:Ka, :Na].set(wa).at[Ka:, Na:].set(wb)
    return _pack_layer(w, jnp.concatenate([ba, bb]))


def _fuse_enc_fc(la, lc, f, ca, cc):
    """Flatten order is (h, w, c): interleave per spatial position."""
    (wa, ba), (wc, bc) = la, lc
    na, nc = wa.shape[1], wc.shape[1]
    wa3 = wa.reshape(f * f, ca, na)
    wc3 = wc.reshape(f * f, cc, nc)
    w = jnp.zeros((f * f, ca + cc, na + nc), jnp.float32)
    w = w.at[:, :ca, :na].set(wa3).at[:, ca:, na:].set(wc3)
    return _pack_layer(w.reshape(f * f * (ca + cc), na + nc),
                       jnp.concatenate([ba, bc]))


def _fuse_dec_fc(la, ld, f, latent):
    """dec_a consumes Z[:, :latent]; dec consumes all of Z; output channels
    [0:64]=dec_a features, [64:128]=dec features per spatial position."""
    (wa, ba), (wd, bd) = la, ld
    wa3 = wa.reshape(latent, f * f, 64)
    wd3 = wd.reshape(2 * latent, f * f, 64)
    w = jnp.zeros((2 * latent, f * f, 128), jnp.float32)
    w = w.at[:latent, :, :64].set(wa3)
    w = w.at[:, :, 64:].set(wd3)
    b = jnp.concatenate([ba.reshape(f * f, 64), bd.reshape(f * f, 64)],
                        axis=1).reshape(f * f * 128)
    return _pack_layer(w.reshape(2 * latent, f * f * 128), b)


def prepare_params(params, img_size, in_channel, latent_dim):
    f = img_size // 8
    ea, ec = params["enc_a"], params["enc_c"]
    da, d = params["dec_a"], params["dec"]
    enc = {
        "c1": _concat_n(ea["c1"], ec["c1"]),                 # Cin*9  -> 32
        "c2": _block_diag(ea["c2"], ec["c2"]),               # 32*9   -> 64
        "c3": _block_diag(ea["c3"], ec["c3"]),               # 64*9   -> 128
        "fc": _fuse_enc_fc(ea["fc"], ec["fc"], f, 64, 64),   # f*f*128-> 2*latent
    }
    dec = {
        "fc": _fuse_dec_fc(da["fc"], d["fc"], f, latent_dim),  # 2*latent -> f*f*128
        "c1": _block_diag(da["c1"], d["c1"]),                # 128*9 -> 64
        "c2": _block_diag(da["c2"], d["c2"]),                # 64*9  -> 32
        "c3": _block_diag(da["c3"], d["c3"]),                # 32*9  -> 2*Cin
    }
    return {"enc": enc, "dec": dec}


# -----------------------------------------------------------------------------
# Fused encoder / decoder / full forward (NHWC activations, bf16 intermediates)
# -----------------------------------------------------------------------------
def encoder_fused_forward(x, p, latent_dim):
    B = x.shape[0]
    h = conv2d_nhwc(x, p["c1"], 32, 2, "lrelu")
    h = conv2d_nhwc(h, p["c2"], 64, 2, "lrelu")
    h = conv2d_nhwc(h, p["c3"], 128, 2, "lrelu")
    z = mm_bias_act(h.reshape(B, -1), p["fc"]["w"], p["fc"]["b"],
                    2 * latent_dim, "none")
    return z          # [:, :latent]=Z_anatomy, [:, latent:]=Z_characteristics


def decoder_fused_forward(z, p, f, in_channel):
    # TODO(synk): DecoderConv source not provided; Linear + LeakyReLU head and
    # nearest-upsample + conv body are assumptions.
    B = z.shape[0]
    h = mm_bias_act(z, p["fc"]["w"], p["fc"]["b"], f * f * 128, "lrelu")
    h = h.reshape(B, f, f, 128)
    h = upsample2_nhwc(h)
    h = conv2d_nhwc(h, p["c1"], 64, 1, "lrelu")
    h = upsample2_nhwc(h)
    h = conv2d_nhwc(h, p["c2"], 32, 1, "lrelu")
    h = upsample2_nhwc(h)
    # TODO(synk): final conv has only 2*Cin true output channels padded to 128;
    # a transposed (M-on-lanes) epilogue kernel would recover the wasted MXU
    # columns / writeback on the full-res tensor.
    h = conv2d_nhwc(h, p["c3"], 2 * in_channel, 1, "sigmoid",
                    out_dtype=jnp.float32)
    return h          # [..., :Cin]=X_hat_anatomy, [..., Cin:]=X_hat


@partial(jax.jit, static_argnames=("img_size", "in_channel", "latent_dim"))
def _unoranic_core(X_orig, X, fparams, img_size, in_channel, latent_dim):
    B = X.shape[0]
    f = img_size // 8
    x_nhwc = jnp.transpose(X, (0, 2, 3, 1))
    xo_nhwc = jnp.transpose(X_orig, (0, 2, 3, 1))

    Z = encoder_fused_forward(x_nhwc.astype(jnp.bfloat16),
                              fparams["enc"], latent_dim)
    recon = decoder_fused_forward(Z, fparams["dec"], f, in_channel)
    xhat_a_nhwc = recon[..., :in_channel]
    xhat_nhwc = recon[..., in_channel:]

    losses = recon_losses(x_nhwc.reshape(B, -1), xo_nhwc.reshape(B, -1),
                          xhat_nhwc.reshape(B, -1), xhat_a_nhwc.reshape(B, -1))

    X_diff = X - X_orig
    X_hat = jnp.transpose(xhat_nhwc, (0, 3, 1, 2))
    X_hat_anatomy = jnp.transpose(xhat_a_nhwc, (0, 3, 1, 2))
    X_hat_diff = X_hat - X_hat_anatomy
    return losses, X_diff, X_hat, X_hat_anatomy, X_hat_diff


def unoranic_forward(X_orig, X, X_anatomy, X_characteristics, fparams, *,
                     img_size, in_channel, latent_dim):
    if X_anatomy is not None:
        # TODO(synk): Loss.compute_embedding_consistency source not provided;
        # pass X_anatomy=None to take the PyTorch else-branch.
        raise NotImplementedError("embedding-consistency branch not implemented")

    losses, X_diff, X_hat, X_hat_anatomy, X_hat_diff = _unoranic_core(
        X_orig, X, fparams,
        img_size=img_size, in_channel=in_channel, latent_dim=latent_dim)

    mse_in, ssim_in, psnr_in = losses[0], losses[1], losses[2]
    mse_an, ssim_an, psnr_an = losses[3], losses[4], losses[5]
    mse_df, ssim_df, psnr_df = losses[6], losses[7], losses[8]

    return (
        (mse_in, mse_an, mse_df),
        (ssim_in, ssim_an, ssim_df),
        (psnr_in, psnr_an, psnr_df),
        (None, None),
        (None, None),
        (X_diff, X_hat, X_hat_anatomy, X_hat_diff),
    )


# -----------------------------------------------------------------------------
# Example run
# -----------------------------------------------------------------------------
if __name__ == "__main__":
    img_size, in_channel, latent_dim, dropout = 16, 4, 32, 0.0
    B = 2

    key = jax.random.PRNGKey(0)
    kx, ko, kp = jax.random.split(key, 3)
    X = jax.random.uniform(kx, (B, in_channel, img_size, img_size), jnp.float32)
    X_orig = jnp.clip(
        X + 0.05 * jax.random.normal(ko, X.shape, jnp.float32), 0.0, 1.0)

    params = init_unoranic(kp, img_size, in_channel, latent_dim, dropout)
    fused = prepare_params(params, img_size, in_channel, latent_dim)

    out = unoranic_forward(X_orig, X, None, None, fused,
                           img_size=img_size, in_channel=in_channel,
                           latent_dim=latent_dim)
    jax.block_until_ready(out)
    print("KERNEL_OK")
</pallas_src>

<mosaic_0001>
module attributes {stable_mosaic.version = 11 : i64} {
  func.func @_mm_bias_act_single_kernel(%arg0: i32, %arg1: i32, %arg2: memref<64x36xbf16, #tpu.memory_space<vmem>>, %arg3: memref<36x128xbf16, #tpu.memory_space<vmem>>, %arg4: memref<1x128xf32, #tpu.memory_space<vmem>>, %arg5: memref<64x128xbf16, #tpu.memory_space<vmem>>) attributes {dimension_semantics = [#tpu.dimension_semantics<parallel>, #tpu.dimension_semantics<parallel>], iteration_bounds = array<i64: 2, 1>, scalar_prefetch = 0 : i64, scratch_operands = 0 : i64, tpu.core_type = #tpu.core_type<tc>, window_params = [{transform_indices = @transform_0, window_bounds = array<i64: 64, 36>}, {transform_indices = @transform_1, window_bounds = array<i64: 36, 128>}, {transform_indices = @transform_2, window_bounds = array<i64: 1, 128>}, {transform_indices = @transform_3, window_bounds = array<i64: 64, 128>}]} {
    %c0 = arith.constant 0 : index
    %c0_0 = arith.constant 0 : index
    %0 = vector.load %arg2[%c0, %c0_0] : memref<64x36xbf16, #tpu.memory_space<vmem>>, vector<64x36xbf16>
    %c0_1 = arith.constant 0 : index
    %c0_2 = arith.constant 0 : index
    %1 = vector.load %arg3[%c0_1, %c0_2] : memref<36x128xbf16, #tpu.memory_space<vmem>>, vector<36x128xbf16>
    %cst = arith.constant dense<0.000000e+00> : vector<64x128xf32>
    %2 = tpu.matmul %0, %1, %cst {dimension_numbers = #tpu.dot_dimension_numbers<[1], [0], [0], [1], [0, 0, 1, 1], [], []>} : vector<64x36xbf16>, vector<36x128xbf16>, vector<64x128xf32> -> vector<64x128xf32>
    %c0_3 = arith.constant 0 : index
    %c0_4 = arith.constant 0 : index
    %3 = vector.load %arg4[%c0_3, %c0_4] : memref<1x128xf32, #tpu.memory_space<vmem>>, vector<1x128xf32>
    %4 = vector.broadcast %3 : vector<1x128xf32> to vector<64x128xf32>
    %5 = arith.addf %2, %4 : vector<64x128xf32>
    %cst_5 = arith.constant 0.000000e+00 : f32
    %6 = vector.broadcast %cst_5 : f32 to vector<64x128xf32>
    %7 = arith.cmpf ogt, %5, %6 : vector<64x128xf32>
    %cst_6 = arith.constant 0.00999999977 : f32
    %8 = vector.broadcast %cst_6 : f32 to vector<64x128xf32>
    %9 = arith.mulf %8, %5 : vector<64x128xf32>
    %10 = arith.select %7, %5, %9 : vector<64x128xi1>, vector<64x128xf32>
    %11 = arith.truncf %10 : vector<64x128xf32> to vector<64x128xbf16>
    %c0_7 = arith.constant 0 : index
    %c0_8 = arith.constant 0 : index
    %12 = vector.load %arg5[%c0_7, %c0_8] : memref<64x128xbf16, #tpu.memory_space<vmem>>, vector<64x128xbf16>
    tpu.vector_store %arg5[%c0_7, %c0_8], %11 {strides = array<i32>} : memref<64x128xbf16, #tpu.memory_space<vmem>>, vector<64x128xbf16>,
    return
  }
  func.func @transform_0(%arg0: i32, %arg1: i32) -> (i32, i32) {
    %c0_i32 = arith.constant 0 : i32
    %c0_i32_0 = arith.constant 0 : i32
    return %arg0, %c0_i32 : i32, i32
  }
  func.func @transform_1(%arg0: i32, %arg1: i32) -> (i32, i32) {
    %c0_i32 = arith.constant 0 : i32
    %c0_i32_0 = arith.constant 0 : i32
    return %c0_i32, %arg1 : i32, i32
  }
  func.func @transform_2(%arg0: i32, %arg1: i32) -> (i32, i32) {
    %c0_i32 = arith.constant 0 : i32
    %c0_i32_0 = arith.constant 0 : i32
    return %c0_i32, %arg1 : i32, i32
  }
  func.func @transform_3(%arg0: i32, %arg1: i32) -> (i32, i32) {
    %c0_i32 = arith.constant 0 : i32
    return %arg0, %arg1 : i32, i32
  }
}

module attributes {stable_mosaic.version = 11 : i64} {
  func.func @_mm_bias_act_single_kernel(%arg0: i32, %arg1: i32, %arg2: memref<16x288xbf16, #tpu.memory_space<vmem>>, %arg3: memref<288x128xbf16, #tpu.memory_space<vmem>>, %arg4: memref<1x128xf32, #tpu.memory_space<vmem>>, %arg5: memref<16x128xbf16, #tpu.memory_space<vmem>>) attributes {dimension_semantics = [#tpu.dimension_semantics<parallel>, #tpu.dimension_semantics<parallel>], iteration_bounds = array<i64: 2, 1>, scalar_prefetch = 0 : i64, scratch_operands = 0 : i64, tpu.core_type = #tpu.core_type<tc>, window_params = [{transform_indices = @transform_0, window_bounds = array<i64: 16, 288>}, {transform_indices = @transform_1, window_bounds = array<i64: 288, 128>}, {transform_indices = @transform_2, window_bounds = array<i64: 1, 128>}, {transform_indices = @transform_3, window_bounds = array<i64: 16, 128>}]} {
    %c0 = arith.constant 0 : index
    %c0_0 = arith.constant 0 : index
    %0 = vector.load %arg2[%c0, %c0_0] : memref<16x288xbf16, #tpu.memory_space<vmem>>, vector<16x288xbf16>
    %c0_1 = arith.constant 0 : index
    %c0_2 = arith.constant 0 : index
    %1 = vector.load %arg3[%c0_1, %c0_2] : memref<288x128xbf16, #tpu.memory_space<vmem>>, vector<288x128xbf16>
    %cst = arith.constant dense<0.000000e+00> : vector<16x128xf32>
    %2 = tpu.matmul %0, %1, %cst {dimension_numbers = #tpu.dot_dimension_numbers<[1], [0], [0], [1], [0, 0, 1, 1], [], []>} : vector<16x288xbf16>, vector<288x128xbf16>, vector<16x128xf32> -> vector<16x128xf32>
    %c0_3 = arith.constant 0 : index
    %c0_4 = arith.constant 0 : index
    %3 = vector.load %arg4[%c0_3, %c0_4] : memref<1x128xf32, #tpu.memory_space<vmem>>, vector<1x128xf32>
    %4 = vector.broadcast %3 : vector<1x128xf32> to vector<16x128xf32>
    %5 = arith.addf %2, %4 : vector<16x128xf32>
    %cst_5 = arith.constant 0.000000e+00 : f32
    %6 = vector.broadcast %cst_5 : f32 to vector<16x128xf32>
    %7 = arith.cmpf ogt, %5, %6 : vector<16x128xf32>
    %cst_6 = arith.constant 0.00999999977 : f32
    %8 = vector.broadcast %cst_6 : f32 to vector<16x128xf32>
    %9 = arith.mulf %8, %5 : vector<16x128xf32>
    %10 = arith.select %7, %5, %9 : vector<16x128xi1>, vector<16x128xf32>
    %11 = arith.truncf %10 : vector<16x128xf32> to vector<16x128xbf16>
    %c0_7 = arith.constant 0 : index
    %c0_8 = arith.constant 0 : index
    %12 = vector.load %arg5[%c0_7, %c0_8] : memref<16x128xbf16, #tpu.memory_space<vmem>>, vector<16x128xbf16>
    tpu.vector_store %arg5[%c0_7, %c0_8], %11 {strides = array<i32>} : memref<16x128xbf16, #tpu.memory_space<vmem>>, vector<16x128xbf16>,
    return
  }
  func.func @transform_0(%arg0: i32, %arg1: i32) -> (i32, i32) {
    %c0_i32 = arith.constant 0 : i32
    %c0_i32_0 = arith.constant 0 : i32
    return %arg0, %c0_i32 : i32, i32
  }
  func.func @transform_1(%arg0: i32, %arg1: i32) -> (i32, i32) {
    %c0_i32 = arith.constant 0 : i32
    %c0_i32_0 = arith.constant 0 : i32
    return %c0_i32, %arg1 : i32, i32
  }
  func.func @transform_2(%arg0: i32, %arg1: i32) -> (i32, i32) {
    %c0_i32 = arith.constant 0 : i32
    %c0_i32_0 = arith.constant 0 : i32
    return %c0_i32, %arg1 : i32, i32
  }
  func.func @transform_3(%arg0: i32, %arg1: i32) -> (i32, i32) {
    %c0_i32 = arith.constant 0 : i32
    return %arg0, %arg1 : i32, i32
  }
}

module attributes {stable_mosaic.version = 11 : i64} {
  func.func @_mm_bias_act_single_kernel(%arg0: i32, %arg1: i32, %arg2: memref<16x576xbf16, #tpu.memory_space<vmem>>, %arg3: memref<576x128xbf16, #tpu.memory_space<vmem>>, %arg4: memref<1x128xf32, #tpu.memory_space<vmem>>, %arg5: memref<16x128xbf16, #tpu.memory_space<vmem>>) attributes {dimension_semantics = [#tpu.dimension_semantics<parallel>, #tpu.dimension_semantics<parallel>], iteration_bounds = array<i64: 1, 1>, scalar_prefetch = 0 : i64, scratch_operands = 0 : i64, tpu.core_type = #tpu.core_type<tc>, window_params = [{transform_indices = @transform_0, window_bounds = array<i64: 16, 576>}, {transform_indices = @transform_1, window_bounds = array<i64: 576, 128>}, {transform_indices = @transform_2, window_bounds = array<i64: 1, 128>}, {transform_indices = @transform_3, window_bounds = array<i64: 16, 128>}]} {
    %c0 = arith.constant 0 : index
    %c0_0 = arith.constant 0 : index
    %0 = vector.load %arg2[%c0, %c0_0] : memref<16x576xbf16, #tpu.memory_space<vmem>>, vector<16x576xbf16>
    %c0_1 = arith.constant 0 : index
    %c0_2 = arith.constant 0 : index
    %1 = vector.load %arg3[%c0_1, %c0_2] : memref<576x128xbf16, #tpu.memory_space<vmem>>, vector<576x128xbf16>
    %cst = arith.constant dense<0.000000e+00> : vector<16x128xf32>
    %2 = tpu.matmul %0, %1, %cst {dimension_numbers = #tpu.dot_dimension_numbers<[1], [0], [0], [1], [0, 0, 1, 1], [], []>} : vector<16x576xbf16>, vector<576x128xbf16>, vector<16x128xf32> -> vector<16x128xf32>
    %c0_3 = arith.constant 0 : index
    %c0_4 = arith.constant 0 : index
    %3 = vector.load %arg4[%c0_3, %c0_4] : memref<1x128xf32, #tpu.memory_space<vmem>>, vector<1x128xf32>
    %4 = vector.broadcast %3 : vector<1x128xf32> to vector<16x128xf32>
    %5 = arith.addf %2, %4 : vector<16x128xf32>
    %cst_5 = arith.constant 0.000000e+00 : f32
    %6 = vector.broadcast %cst_5 : f32 to vector<16x128xf32>
    %7 = arith.cmpf ogt, %5, %6 : vector<16x128xf32>
    %cst_6 = arith.constant 0.00999999977 : f32
    %8 = vector.broadcast %cst_6 : f32 to vector<16x128xf32>
    %9 = arith.mulf %8, %5 : vector<16x128xf32>
    %10 = arith.select %7, %5, %9 : vector<16x128xi1>, vector<16x128xf32>
    %11 = arith.truncf %10 : vector<16x128xf32> to vector<16x128xbf16>
    %c0_7 = arith.constant 0 : index
    %c0_8 = arith.constant 0 : index
    %12 = vector.load %arg5[%c0_7, %c0_8] : memref<16x128xbf16, #tpu.memory_space<vmem>>, vector<16x128xbf16>
    tpu.vector_store %arg5[%c0_7, %c0_8], %11 {strides = array<i32>} : memref<16x128xbf16, #tpu.memory_space<vmem>>, vector<16x128xbf16>,
    return
  }
  func.func @transform_0(%arg0: i32, %arg1: i32) -> (i32, i32) {
    %c0_i32 = arith.constant 0 : i32
    %c0_i32_0 = arith.constant 0 : i32
    return %arg0, %c0_i32 : i32, i32
  }
  func.func @transform_1(%arg0: i32, %arg1: i32) -> (i32, i32) {
    %c0_i32 = arith.constant 0 : i32
    %c0_i32_0 = arith.constant 0 : i32
    return %c0_i32, %arg1 : i32, i32
  }
  func.func @transform_2(%arg0: i32, %arg1: i32) -> (i32, i32) {
    %c0_i32 = arith.constant 0 : i32
    %c0_i32_0 = arith.constant 0 : i32
    return %c0_i32, %arg1 : i32, i32
  }
  func.func @transform_3(%arg0: i32, %arg1: i32) -> (i32, i32) {
    %c0_i32 = arith.constant 0 : i32
    return %arg0, %arg1 : i32, i32
  }
}

module attributes {stable_mosaic.version = 11 : i64} {
  func.func @_mm_bias_act_single_kernel(%arg0: i32, %arg1: i32, %arg2: memref<16x512xbf16, #tpu.memory_space<vmem>>, %arg3: memref<512x128xbf16, #tpu.memory_space<vmem>>, %arg4: memref<1x128xf32, #tpu.memory_space<vmem>>, %arg5: memref<16x128xbf16, #tpu.memory_space<vmem>>) attributes {dimension_semantics = [#tpu.dimension_semantics<parallel>, #tpu.dimension_semantics<parallel>], iteration_bounds = array<i64: 1, 1>, scalar_prefetch = 0 : i64, scratch_operands = 0 : i64, tpu.core_type = #tpu.core_type<tc>, window_params = [{transform_indices = @transform_0, window_bounds = array<i64: 16, 512>}, {transform_indices = @transform_1, window_bounds = array<i64: 512, 128>}, {transform_indices = @transform_2, window_bounds = array<i64: 1, 128>}, {transform_indices = @transform_3, window_bounds = array<i64: 16, 128>}]} {
    %c0 = arith.constant 0 : index
    %c0_0 = arith.constant 0 : index
    %0 = vector.load %arg2[%c0, %c0_0] : memref<16x512xbf16, #tpu.memory_space<vmem>>, vector<16x512xbf16>
    %c0_1 = arith.constant 0 : index
    %c0_2 = arith.constant 0 : index
    %1 = vector.load %arg3[%c0_1, %c0_2] : memref<512x128xbf16, #tpu.memory_space<vmem>>, vector<512x128xbf16>
    %cst = arith.constant dense<0.000000e+00> : vector<16x128xf32>
    %2 = tpu.matmul %0, %1, %cst {dimension_numbers = #tpu.dot_dimension_numbers<[1], [0], [0], [1], [0, 0, 1, 1], [], []>} : vector<16x512xbf16>, vector<512x128xbf16>, vector<16x128xf32> -> vector<16x128xf32>
    %c0_3 = arith.constant 0 : index
    %c0_4 = arith.constant 0 : index
    %3 = vector.load %arg4[%c0_3, %c0_4] : memref<1x128xf32, #tpu.memory_space<vmem>>, vector<1x128xf32>
    %4 = vector.broadcast %3 : vector<1x128xf32> to vector<16x128xf32>
    %5 = arith.addf %2, %4 : vector<16x128xf32>
    %6 = arith.truncf %5 : vector<16x128xf32> to vector<16x128xbf16>
    %c0_5 = arith.constant 0 : index
    %c0_6 = arith.constant 0 : index
    %7 = vector.load %arg5[%c0_5, %c0_6] : memref<16x128xbf16, #tpu.memory_space<vmem>>, vector<16x128xbf16>
    tpu.vector_store %arg5[%c0_5, %c0_6], %6 {strides = array<i32>} : memref<16x128xbf16, #tpu.memory_space<vmem>>, vector<16x128xbf16>,
    return
  }
  func.func @transform_0(%arg0: i32, %arg1: i32) -> (i32, i32) {
    %c0_i32 = arith.constant 0 : i32
    %c0_i32_0 = arith.constant 0 : i32
    return %arg0, %c0_i32 : i32, i32
  }
  func.func @transform_1(%arg0: i32, %arg1: i32) -> (i32, i32) {
    %c0_i32 = arith.constant 0 : i32
    %c0_i32_0 = arith.constant 0 : i32
    return %c0_i32, %arg1 : i32, i32
  }
  func.func @transform_2(%arg0: i32, %arg1: i32) -> (i32, i32) {
    %c0_i32 = arith.constant 0 : i32
    %c0_i32_0 = arith.constant 0 : i32
    return %c0_i32, %arg1 : i32, i32
  }
  func.func @transform_3(%arg0: i32, %arg1: i32) -> (i32, i32) {
    %c0_i32 = arith.constant 0 : i32
    return %arg0, %arg1 : i32, i32
  }
}

module attributes {stable_mosaic.version = 11 : i64} {
  func.func @_mm_bias_act_single_kernel(%arg0: i32, %arg1: i32, %arg2: memref<16x64xbf16, #tpu.memory_space<vmem>>, %arg3: memref<64x256xbf16, #tpu.memory_space<vmem>>, %arg4: memref<1x256xf32, #tpu.memory_space<vmem>>, %arg5: memref<16x256xbf16, #tpu.memory_space<vmem>>) attributes {dimension_semantics = [#tpu.dimension_semantics<parallel>, #tpu.dimension_semantics<parallel>], iteration_bounds = array<i64: 1, 2>, scalar_prefetch = 0 : i64, scratch_operands = 0 : i64, tpu.core_type = #tpu.core_type<tc>, window_params = [{transform_indices = @transform_0, window_bounds = array<i64: 16, 64>}, {transform_indices = @transform_1, window_bounds = array<i64: 64, 256>}, {transform_indices = @transform_2, window_bounds = array<i64: 1, 256>}, {transform_indices = @transform_3, window_bounds = array<i64: 16, 256>}]} {
    %c0 = arith.constant 0 : index
    %c0_0 = arith.constant 0 : index
    %0 = vector.load %arg2[%c0, %c0_0] : memref<16x64xbf16, #tpu.memory_space<vmem>>, vector<16x64xbf16>
    %c0_1 = arith.constant 0 : index
    %c0_2 = arith.constant 0 : index
    %1 = vector.load %arg3[%c0_1, %c0_2] : memref<64x256xbf16, #tpu.memory_space<vmem>>, vector<64x256xbf16>
    %cst = arith.constant dense<0.000000e+00> : vector<16x256xf32>
    %2 = tpu.matmul %0, %1, %cst {dimension_numbers = #tpu.dot_dimension_numbers<[1], [0], [0], [1], [0, 0, 1, 1], [], []>} : vector<16x64xbf16>, vector<64x256xbf16>, vector<16x256xf32> -> vector<16x256xf32>
    %c0_3 = arith.constant 0 : index
    %c0_4 = arith.constant 0 : index
    %3 = vector.load %arg4[%c0_3, %c0_4] : memref<1x256xf32, #tpu.memory_space<vmem>>, vector<1x256xf32>
    %4 = vector.broadcast %3 : vector<1x256xf32> to vector<16x256xf32>
    %5 = arith.addf %2, %4 : vector<16x256xf32>
    %cst_5 = arith.constant 0.000000e+00 : f32
    %6 = vector.broadcast %cst_5 : f32 to vector<16x256xf32>
    %7 = arith.cmpf ogt, %5, %6 : vector<16x256xf32>
    %cst_6 = arith.constant 0.00999999977 : f32
    %8 = vector.broadcast %cst_6 : f32 to vector<16x256xf32>
    %9 = arith.mulf %8, %5 : vector<16x256xf32>
    %10 = arith.select %7, %5, %9 : vector<16x256xi1>, vector<16x256xf32>
    %11 = arith.truncf %10 : vector<16x256xf32> to vector<16x256xbf16>
    %c0_7 = arith.constant 0 : index
    %c0_8 = arith.constant 0 : index
    %12 = vector.load %arg5[%c0_7, %c0_8] : memref<16x256xbf16, #tpu.memory_space<vmem>>, vector<16x256xbf16>
    tpu.vector_store %arg5[%c0_7, %c0_8], %11 {strides = array<i32>} : memref<16x256xbf16, #tpu.memory_space<vmem>>, vector<16x256xbf16>,
    return
  }
  func.func @transform_0(%arg0: i32, %arg1: i32) -> (i32, i32) {
    %c0_i32 = arith.constant 0 : i32
    %c0_i32_0 = arith.constant 0 : i32
    return %arg0, %c0_i32 : i32, i32
  }
  func.func @transform_1(%arg0: i32, %arg1: i32) -> (i32, i32) {
    %c0_i32 = arith.constant 0 : i32
    %c0_i32_0 = arith.constant 0 : i32
    return %c0_i32, %arg1 : i32, i32
  }
  func.func @transform_2(%arg0: i32, %arg1: i32) -> (i32, i32) {
    %c0_i32 = arith.constant 0 : i32
    %c0_i32_0 = arith.constant 0 : i32
    return %c0_i32, %arg1 : i32, i32
  }
  func.func @transform_3(%arg0: i32, %arg1: i32) -> (i32, i32) {
    %c0_i32 = arith.constant 0 : i32
    return %arg0, %arg1 : i32, i32
  }
}

module attributes {stable_mosaic.version = 11 : i64} {
  func.func @_mm_bias_act_single_kernel(%arg0: i32, %arg1: i32, %arg2: memref<16x1152xbf16, #tpu.memory_space<vmem>>, %arg3: memref<1152x128xbf16, #tpu.memory_space<vmem>>, %arg4: memref<1x128xf32, #tpu.memory_space<vmem>>, %arg5: memref<16x128xbf16, #tpu.memory_space<vmem>>) attributes {dimension_semantics = [#tpu.dimension_semantics<parallel>, #tpu.dimension_semantics<parallel>], iteration_bounds = array<i64: 2, 1>, scalar_prefetch = 0 : i64, scratch_operands = 0 : i64, tpu.core_type = #tpu.core_type<tc>, window_params = [{transform_indices = @transform_0, window_bounds = array<i64: 16, 1152>}, {transform_indices = @transform_1, window_bounds = array<i64: 1152, 128>}, {transform_indices = @transform_2, window_bounds = array<i64: 1, 128>}, {transform_indices = @transform_3, window_bounds = array<i64: 16, 128>}]} {
    %c0 = arith.constant 0 : index
    %c0_0 = arith.constant 0 : index
    %0 = vector.load %arg2[%c0, %c0_0] : memref<16x1152xbf16, #tpu.memory_space<vmem>>, vector<16x1152xbf16>
    %c0_1 = arith.constant 0 : index
    %c0_2 = arith.constant 0 : index
    %1 = vector.load %arg3[%c0_1, %c0_2] : memref<1152x128xbf16, #tpu.memory_space<vmem>>, vector<1152x128xbf16>
    %cst = arith.constant dense<0.000000e+00> : vector<16x128xf32>
    %2 = tpu.matmul %0, %1, %cst {dimension_numbers = #tpu.dot_dimension_numbers<[1], [0], [0], [1], [0, 0, 1, 1], [], []>} : vector<16x1152xbf16>, vector<1152x128xbf16>, vector<16x128xf32> -> vector<16x128xf32>
    %c0_3 = arith.constant 0 : index
    %c0_4 = arith.constant 0 : index
    %3 = vector.load %arg4[%c0_3, %c0_4] : memref<1x128xf32, #tpu.memory_space<vmem>>, vector<1x128xf32>
    %4 = vector.broadcast %3 : vector<1x128xf32> to vector<16x128xf32>
    %5 = arith.addf %2, %4 : vector<16x128xf32>
    %cst_5 = arith.constant 0.000000e+00 : f32
    %6 = vector.broadcast %cst_5 : f32 to vector<16x128xf32>
    %7 = arith.cmpf ogt, %5, %6 : vector<16x128xf32>
    %cst_6 = arith.constant 0.00999999977 : f32
    %8 = vector.broadcast %cst_6 : f32 to vector<16x128xf32>
    %9 = arith.mulf %8, %5 : vector<16x128xf32>
    %10 = arith.select %7, %5, %9 : vector<16x128xi1>, vector<16x128xf32>
    %11 = arith.truncf %10 : vector<16x128xf32> to vector<16x128xbf16>
    %c0_7 = arith.constant 0 : index
    %c0_8 = arith.constant 0 : index
    %12 = vector.load %arg5[%c0_7, %c0_8] : memref<16x128xbf16, #tpu.memory_space<vmem>>, vector<16x128xbf16>
    tpu.vector_store %arg5[%c0_7, %c0_8], %11 {strides = array<i32>} : memref<16x128xbf16, #tpu.memory_space<vmem>>, vector<16x128xbf16>,
    return
  }
  func.func @transform_0(%arg0: i32, %arg1: i32) -> (i32, i32) {
    %c0_i32 = arith.constant 0 : i32
    %c0_i32_0 = arith.constant 0 : i32
    return %arg0, %c0_i32 : i32, i32
  }
  func.func @transform_1(%arg0: i32, %arg1: i32) -> (i32, i32) {
    %c0_i32 = arith.constant 0 : i32
    %c0_i32_0 = arith.constant 0 : i32
    return %c0_i32, %arg1 : i32, i32
  }
  func.func @transform_2(%arg0: i32, %arg1: i32) -> (i32, i32) {
    %c0_i32 = arith.constant 0 : i32
    %c0_i32_0 = arith.constant 0 : i32
    return %c0_i32, %arg1 : i32, i32
  }
  func.func @transform_3(%arg0: i32, %arg1: i32) -> (i32, i32) {
    %c0_i32 = arith.constant 0 : i32
    return %arg0, %arg1 : i32, i32
  }
}

module attributes {stable_mosaic.version = 11 : i64} {
  func.func @_mm_bias_act_single_kernel(%arg0: i32, %arg1: i32, %arg2: memref<64x576xbf16, #tpu.memory_space<vmem>>, %arg3: memref<576x128xbf16, #tpu.memory_space<vmem>>, %arg4: memref<1x128xf32, #tpu.memory_space<vmem>>, %arg5: memref<64x128xbf16, #tpu.memory_space<vmem>>) attributes {dimension_semantics = [#tpu.dimension_semantics<parallel>, #tpu.dimension_semantics<parallel>], iteration_bounds = array<i64: 2, 1>, scalar_prefetch = 0 : i64, scratch_operands = 0 : i64, tpu.core_type = #tpu.core_type<tc>, window_params = [{transform_indices = @transform_0, window_bounds = array<i64: 64, 576>}, {transform_indices = @transform_1, window_bounds = array<i64: 576, 128>}, {transform_indices = @transform_2, window_bounds = array<i64: 1, 128>}, {transform_indices = @transform_3, window_bounds = array<i64: 64, 128>}]} {
    %c0 = arith.constant 0 : index
    %c0_0 = arith.constant 0 : index
    %0 = vector.load %arg2[%c0, %c0_0] : memref<64x576xbf16, #tpu.memory_space<vmem>>, vector<64x576xbf16>
    %c0_1 = arith.constant 0 : index
    %c0_2 = arith.constant 0 : index
    %1 = vector.load %arg3[%c0_1, %c0_2] : memref<576x128xbf16, #tpu.memory_space<vmem>>, vector<576x128xbf16>
    %cst = arith.constant dense<0.000000e+00> : vector<64x128xf32>
    %2 = tpu.matmul %0, %1, %cst {dimension_numbers = #tpu.dot_dimension_numbers<[1], [0], [0], [1], [0, 0, 1, 1], [], []>} : vector<64x576xbf16>, vector<576x128xbf16>, vector<64x128xf32> -> vector<64x128xf32>
    %c0_3 = arith.constant 0 : index
    %c0_4 = arith.constant 0 : index
    %3 = vector.load %arg4[%c0_3, %c0_4] : memref<1x128xf32, #tpu.memory_space<vmem>>, vector<1x128xf32>
    %4 = vector.broadcast %3 : vector<1x128xf32> to vector<64x128xf32>
    %5 = arith.addf %2, %4 : vector<64x128xf32>
    %cst_5 = arith.constant 0.000000e+00 : f32
    %6 = vector.broadcast %cst_5 : f32 to vector<64x128xf32>
    %7 = arith.cmpf ogt, %5, %6 : vector<64x128xf32>
    %cst_6 = arith.constant 0.00999999977 : f32
    %8 = vector.broadcast %cst_6 : f32 to vector<64x128xf32>
    %9 = arith.mulf %8, %5 : vector<64x128xf32>
    %10 = arith.select %7, %5, %9 : vector<64x128xi1>, vector<64x128xf32>
    %11 = arith.truncf %10 : vector<64x128xf32> to vector<64x128xbf16>
    %c0_7 = arith.constant 0 : index
    %c0_8 = arith.constant 0 : index
    %12 = vector.load %arg5[%c0_7, %c0_8] : memref<64x128xbf16, #tpu.memory_space<vmem>>, vector<64x128xbf16>
    tpu.vector_store %arg5[%c0_7, %c0_8], %11 {strides = array<i32>} : memref<64x128xbf16, #tpu.memory_space<vmem>>, vector<64x128xbf16>,
    return
  }
  func.func @transform_0(%arg0: i32, %arg1: i32) -> (i32, i32) {
    %c0_i32 = arith.constant 0 : i32
    %c0_i32_0 = arith.constant 0 : i32
    return %arg0, %c0_i32 : i32, i32
  }
  func.func @transform_1(%arg0: i32, %arg1: i32) -> (i32, i32) {
    %c0_i32 = arith.constant 0 : i32
    %c0_i32_0 = arith.constant 0 : i32
    return %c0_i32, %arg1 : i32, i32
  }
  func.func @transform_2(%arg0: i32, %arg1: i32) -> (i32, i32) {
    %c0_i32 = arith.constant 0 : i32
    %c0_i32_0 = arith.constant 0 : i32
    return %c0_i32, %arg1 : i32, i32
  }
  func.func @transform_3(%arg0: i32, %arg1: i32) -> (i32, i32) {
    %c0_i32 = arith.constant 0 : i32
    return %arg0, %arg1 : i32, i32
  }
}

module attributes {stable_mosaic.version = 11 : i64} {
  func.func @_mm_bias_act_single_kernel(%arg0: i32, %arg1: i32, %arg2: memref<256x288xbf16, #tpu.memory_space<vmem>>, %arg3: memref<288x128xbf16, #tpu.memory_space<vmem>>, %arg4: memref<1x128xf32, #tpu.memory_space<vmem>>, %arg5: memref<256x128xf32, #tpu.memory_space<vmem>>) attributes {dimension_semantics = [#tpu.dimension_semantics<parallel>, #tpu.dimension_semantics<parallel>], iteration_bounds = array<i64: 2, 1>, scalar_prefetch = 0 : i64, scratch_operands = 0 : i64, tpu.core_type = #tpu.core_type<tc>, window_params = [{transform_indices = @transform_0, window_bounds = array<i64: 256, 288>}, {transform_indices = @transform_1, window_bounds = array<i64: 288, 128>}, {transform_indices = @transform_2, window_bounds = array<i64: 1, 128>}, {transform_indices = @transform_3, window_bounds = array<i64: 256, 128>}]} {
    %c0 = arith.constant 0 : index
    %c0_0 = arith.constant 0 : index
    %0 = vector.load %arg2[%c0, %c0_0] : memref<256x288xbf16, #tpu.memory_space<vmem>>, vector<256x288xbf16>
    %c0_1 = arith.constant 0 : index
    %c0_2 = arith.constant 0 : index
    %1 = vector.load %arg3[%c0_1, %c0_2] : memref<288x128xbf16, #tpu.memory_space<vmem>>, vector<288x128xbf16>
    %cst = arith.constant dense<0.000000e+00> : vector<256x128xf32>
    %2 = tpu.matmul %0, %1, %cst {dimension_numbers = #tpu.dot_dimension_numbers<[1], [0], [0], [1], [0, 0, 1, 1], [], []>} : vector<256x288xbf16>, vector<288x128xbf16>, vector<256x128xf32> -> vector<256x128xf32>
    %c0_3 = arith.constant 0 : index
    %c0_4 = arith.constant 0 : index
    %3 = vector.load %arg4[%c0_3, %c0_4] : memref<1x128xf32, #tpu.memory_space<vmem>>, vector<1x128xf32>
    %4 = vector.broadcast %3 : vector<1x128xf32> to vector<256x128xf32>
    %5 = arith.addf %2, %4 : vector<256x128xf32>
    %cst_5 = arith.constant 0.000000e+00 : f32
    %6 = vector.broadcast %cst_5 : f32 to vector<256x128xf32>
    %7 = arith.subf %6, %5 : vector<256x128xf32>
    %8 = math.exp %7 : vector<256x128xf32>
    %cst_6 = arith.constant 1.000000e+00 : f32
    %9 = vector.broadcast %cst_6 : f32 to vector<256x128xf32>
    %10 = arith.addf %9, %8 : vector<256x128xf32>
    %cst_7 = arith.constant 1.000000e+00 : f32
    %11 = vector.broadcast %cst_7 : f32 to vector<256x128xf32>
    %12 = arith.divf %11, %10 : vector<256x128xf32>
    %c0_8 = arith.constant 0 : index
    %c0_9 = arith.constant 0 : index
    %13 = vector.load %arg5[%c0_8, %c0_9] : memref<256x128xf32, #tpu.memory_space<vmem>>, vector<256x128xf32>
    tpu.vector_store %arg5[%c0_8, %c0_9], %12 {strides = array<i32>} : memref<256x128xf32, #tpu.memory_space<vmem>>, vector<256x128xf32>,
    return
  }
  func.func @transform_0(%arg0: i32, %arg1: i32) -> (i32, i32) {
    %c0_i32 = arith.constant 0 : i32
    %c0_i32_0 = arith.constant 0 : i32
    return %arg0, %c0_i32 : i32, i32
  }
  func.func @transform_1(%arg0: i32, %arg1: i32) -> (i32, i32) {
    %c0_i32 = arith.constant 0 : i32
    %c0_i32_0 = arith.constant 0 : i32
    return %c0_i32, %arg1 : i32, i32
  }
  func.func @transform_2(%arg0: i32, %arg1: i32) -> (i32, i32) {
    %c0_i32 = arith.constant 0 : i32
    %c0_i32_0 = arith.constant 0 : i32
    return %c0_i32, %arg1 : i32, i32
  }
  func.func @transform_3(%arg0: i32, %arg1: i32) -> (i32, i32) {
    %c0_i32 = arith.constant 0 : i32
    return %arg0, %arg1 : i32, i32
  }
}

module attributes {stable_mosaic.version = 11 : i64} {
  func.func @_loss3_kernel(%arg0: i32, %arg1: memref<16x128xf32, #tpu.memory_space<vmem>>, %arg2: memref<16x128xf32, #tpu.memory_space<vmem>>, %arg3: memref<16x128xf32, #tpu.memory_space<vmem>>, %arg4: memref<16x128xf32, #tpu.memory_space<vmem>>, %arg5: memref<9xf32, #tpu.memory_space<smem>>, %arg6: memref<15x16x128xf32, #tpu.memory_space<vmem>>) attributes {dimension_semantics = [#tpu.dimension_semantics<arbitrary>], iteration_bounds = array<i64: 1>, scalar_prefetch = 0 : i64, scratch_operands = 1 : i64, tpu.core_type = #tpu.core_type<tc>, window_params = [{transform_indices = @transform_0, window_bounds = array<i64: 16, 128>}, {transform_indices = @transform_1, window_bounds = array<i64: 16, 128>}, {transform_indices = @transform_2, window_bounds = array<i64: 16, 128>}, {transform_indices = @transform_3, window_bounds = array<i64: 16, 128>}, {transform_indices = @transform_4, window_bounds = array<i64: 9>}]} {
    %c0_i32 = arith.constant 0 : i32
    %0 = arith.cmpi eq, %arg0, %c0_i32 : i32
    %1 = arith.extui %0 : i1 to i32
    %c0_i32_0 = arith.constant 0 : i32
    %2 = arith.cmpi ne, %1, %c0_i32_0 : i32
    scf.if %2 {
      %cst = arith.constant 0.000000e+00 : f32
      %111 = vector.broadcast %cst : f32 to vector<15x16x128xf32>
      %c0_86 = arith.constant 0 : index
      %c0_87 = arith.constant 0 : index
      %c0_88 = arith.constant 0 : index
      %112 = vector.load %arg6[%c0_86, %c0_87, %c0_88] : memref<15x16x128xf32, #tpu.memory_space<vmem>>, vector<15x16x128xf32>
      tpu.vector_store %arg6[%c0_86, %c0_87, %c0_88], %111 {strides = array<i32>} : memref<15x16x128xf32, #tpu.memory_space<vmem>>, vector<15x16x128xf32>,
    } else {
    }
    %c0 = arith.constant 0 : index
    %c0_1 = arith.constant 0 : index
    %3 = vector.load %arg1[%c0, %c0_1] : memref<16x128xf32, #tpu.memory_space<vmem>>, vector<16x128xf32>
    %c0_2 = arith.constant 0 : index
    %c0_3 = arith.constant 0 : index
    %4 = vector.load %arg2[%c0_2, %c0_3] : memref<16x128xf32, #tpu.memory_space<vmem>>, vector<16x128xf32>
    %c0_4 = arith.constant 0 : index
    %c0_5 = arith.constant 0 : index
    %5 = vector.load %arg3[%c0_4, %c0_5] : memref<16x128xf32, #tpu.memory_space<vmem>>, vector<16x128xf32>
    %c0_6 = arith.constant 0 : index
    %c0_7 = arith.constant 0 : index
    %6 = vector.load %arg4[%c0_6, %c0_7] : memref<16x128xf32, #tpu.memory_space<vmem>>, vector<16x128xf32>
    %7 = arith.subf %3, %4 : vector<16x128xf32>
    %8 = arith.subf %5, %6 : vector<16x128xf32>
    %c0_8 = arith.constant 0 : index
    %c0_9 = arith.constant 0 : index
    %c0_10 = arith.constant 0 : index
    %9 = vector.load %arg6[%c0_8, %c0_9, %c0_10] : memref<15x16x128xf32, #tpu.memory_space<vmem>>, vector<1x16x128xf32>
    %10 = vector.shape_cast %9 : vector<1x16x128xf32> to vector<16x128xf32>
    %11 = arith.addf %10, %3 : vector<16x128xf32>
    %c0_11 = arith.constant 0 : index
    %c0_12 = arith.constant 0 : index
    %c0_13 = arith.constant 0 : index
    %12 = vector.load %arg6[%c0_11, %c0_12, %c0_13] : memref<15x16x128xf32, #tpu.memory_space<vmem>>, vector<1x16x128xf32>
    %13 = vector.shape_cast %12 : vector<1x16x128xf32> to vector<16x128xf32>
    %14 = vector.shape_cast %11 : vector<16x128xf32> to vector<1x16x128xf32>
    tpu.vector_store %arg6[%c0_11, %c0_12, %c0_13], %14 {strides = array<i32>} : memref<15x16x128xf32, #tpu.memory_space<vmem>>, vector<1x16x128xf32>,
    %c1 = arith.constant 1 : index
    %c0_14 = arith.constant 0 : index
    %c0_15 = arith.constant 0 : index
    %15 = vector.load %arg6[%c1, %c0_14, %c0_15] : memref<15x16x128xf32, #tpu.memory_space<vmem>>, vector<1x16x128xf32>
    %16 = vector.shape_cast %15 : vector<1x16x128xf32> to vector<16x128xf32>
    %17 = arith.addf %16, %5 : vector<16x128xf32>
    %c1_16 = arith.constant 1 : index
    %c0_17 = arith.constant 0 : index
    %c0_18 = arith.constant 0 : index
    %18 = vector.load %arg6[%c1_16, %c0_17, %c0_18] : memref<15x16x128xf32, #tpu.memory_space<vmem>>, vector<1x16x128xf32>
    %19 = vector.shape_cast %18 : vector<1x16x128xf32> to vector<16x128xf32>
    %20 = vector.shape_cast %17 : vector<16x128xf32> to vector<1x16x128xf32>
    tpu.vector_store %arg6[%c1_16, %c0_17, %c0_18], %20 {strides = array<i32>} : memref<15x16x128xf32, #tpu.memory_space<vmem>>, vector<1x16x128xf32>,
    %c2 = arith.constant 2 : index
    %c0_19 = arith.constant 0 : index
    %c0_20 = arith.constant 0 : index
    %21 = vector.load %arg6[%c2, %c0_19, %c0_20] : memref<15x16x128xf32, #tpu.memory_space<vmem>>, vector<1x16x128xf32>
    %22 = vector.shape_cast %21 : vector<1x16x128xf32> to vector<16x128xf32>
    %23 = arith.mulf %3, %3 : vector<16x128xf32>
    %24 = arith.addf %22, %23 : vector<16x128xf32>
    %c2_21 = arith.constant 2 : index
    %c0_22 = arith.constant 0 : index
    %c0_23 = arith.constant 0 : index
    %25 = vector.load %arg6[%c2_21, %c0_22, %c0_23] : memref<15x16x128xf32, #tpu.memory_space<vmem>>, vector<1x16x128xf32>
    %26 = vector.shape_cast %25 : vector<1x16x128xf32> to vector<16x128xf32>
    %27 = vector.shape_cast %24 : vector<16x128xf32> to vector<1x16x128xf32>
    tpu.vector_store %arg6[%c2_21, %c0_22, %c0_23], %27 {strides = array<i32>} : memref<15x16x128xf32, #tpu.memory_space<vmem>>, vector<1x16x128xf32>,
    %c3 = arith.constant 3 : index
    %c0_24 = arith.constant 0 : index
    %c0_25 = arith.constant 0 : index
    %28 = vector.load %arg6[%c3, %c0_24, %c0_25] : memref<15x16x128xf32, #tpu.memory_space<vmem>>, vector<1x16x128xf32>
    %29 = vector.shape_cast %28 : vector<1x16x128xf32> to vector<16x128xf32>
    %30 = arith.mulf %5, %5 : vector<16x128xf32>
    %31 = arith.addf %29, %30 : vector<16x128xf32>
    %c3_26 = arith.constant 3 : index
    %c0_27 = arith.constant 0 : index
    %c0_28 = arith.constant 0 : index
    %32 = vector.load %arg6[%c3_26, %c0_27, %c0_28] : memref<15x16x128xf32, #tpu.memory_space<vmem>>, vector<1x16x128xf32>
    %33 = vector.shape_cast %32 : vector<1x16x128xf32> to vector<16x128xf32>
    %34 = vector.shape_cast %31 : vector<16x128xf32> to vector<1x16x128xf32>
    tpu.vector_store %arg6[%c3_26, %c0_27, %c0_28], %34 {strides = array<i32>} : memref<15x16x128xf32, #tpu.memory_space<vmem>>, vector<1x16x128xf32>,
    %c4 = arith.constant 4 : index
    %c0_29 = arith.constant 0 : index
    %c0_30 = arith.constant 0 : index
    %35 = vector.load %arg6[%c4, %c0_29, %c0_30] : memref<15x16x128xf32, #tpu.memory_space<vmem>>, vector<1x16x128xf32>
    %36 = vector.shape_cast %35 : vector<1x16x128xf32> to vector<16x128xf32>
    %37 = arith.mulf %3, %5 : vector<16x128xf32>
    %38 = arith.addf %36, %37 : vector<16x128xf32>
    %c4_31 = arith.constant 4 : index
    %c0_32 = arith.constant 0 : index
    %c0_33 = arith.constant 0 : index
    %39 = vector.load %arg6[%c4_31, %c0_32, %c0_33] : memref<15x16x128xf32, #tpu.memory_space<vmem>>, vector<1x16x128xf32>
    %40 = vector.shape_cast %39 : vector<1x16x128xf32> to vector<16x128xf32>
    %41 = vector.shape_cast %38 : vector<16x128xf32> to vector<1x16x128xf32>
    tpu.vector_store %arg6[%c4_31, %c0_32, %c0_33], %41 {strides = array<i32>} : memref<15x16x128xf32, #tpu.memory_space<vmem>>, vector<1x16x128xf32>,
    %c5 = arith.constant 5 : index
    %c0_34 = arith.constant 0 : index
    %c0_35 = arith.constant 0 : index
    %42 = vector.load %arg6[%c5, %c0_34, %c0_35] : memref<15x16x128xf32, #tpu.memory_space<vmem>>, vector<1x16x128xf32>
    %43 = vector.shape_cast %42 : vector<1x16x128xf32> to vector<16x128xf32>
    %44 = arith.addf %43, %4 : vector<16x128xf32>
    %c5_36 = arith.constant 5 : index
    %c0_37 = arith.constant 0 : index
    %c0_38 = arith.constant 0 : index
    %45 = vector.load %arg6[%c5_36, %c0_37, %c0_38] : memref<15x16x128xf32, #tpu.memory_space<vmem>>, vector<1x16x128xf32>
    %46 = vector.shape_cast %45 : vector<1x16x128xf32> to vector<16x128xf32>
    %47 = vector.shape_cast %44 : vector<16x128xf32> to vector<1x16x128xf32>
    tpu.vector_store %arg6[%c5_36, %c0_37, %c0_38], %47 {strides = array<i32>} : memref<15x16x128xf32, #tpu.memory_space<vmem>>, vector<1x16x128xf32>,
    %c6 = arith.constant 6 : index
    %c0_39 = arith.constant 0 : index
    %c0_40 = arith.constant 0 : index
    %48 = vector.load %arg6[%c6, %c0_39, %c0_40] : memref<15x16x128xf32, #tpu.memory_space<vmem>>, vector<1x16x128xf32>
    %49 = vector.shape_cast %48 : vector<1x16x128xf32> to vector<16x128xf32>
    %50 = arith.addf %49, %6 : vector<16x128xf32>
    %c6_41 = arith.constant 6 : index
    %c0_42 = arith.constant 0 : index
    %c0_43 = arith.constant 0 : index
    %51 = vector.load %arg6[%c6_41, %c0_42, %c0_43] : memref<15x16x128xf32, #tpu.memory_space<vmem>>, vector<1x16x128xf32>
    %52 = vector.shape_cast %51 : vector<1x16x128xf32> to vector<16x128xf32>
    %53 = vector.shape_cast %50 : vector<16x128xf32> to vector<1x16x128xf32>
    tpu.vector_store %arg6[%c6_41, %c0_42, %c0_43], %53 {strides = array<i32>} : memref<15x16x128xf32, #tpu.memory_space<vmem>>, vector<1x16x128xf32>,
    %c7 = arith.constant 7 : index
    %c0_44 = arith.constant 0 : index
    %c0_45 = arith.constant 0 : index
    %54 = vector.load %arg6[%c7, %c0_44, %c0_45] : memref<15x16x128xf32, #tpu.memory_space<vmem>>, vector<1x16x128xf32>
    %55 = vector.shape_cast %54 : vector<1x16x128xf32> to vector<16x128xf32>
    %56 = arith.mulf %4, %4 : vector<16x128xf32>
    %57 = arith.addf %55, %56 : vector<16x128xf32>
    %c7_46 = arith.constant 7 : index
    %c0_47 = arith.constant 0 : index
    %c0_48 = arith.constant 0 : index
    %58 = vector.load %arg6[%c7_46, %c0_47, %c0_48] : memref<15x16x128xf32, #tpu.memory_space<vmem>>, vector<1x16x128xf32>
    %59 = vector.shape_cast %58 : vector<1x16x128xf32> to vector<16x128xf32>
    %60 = vector.shape_cast %57 : vector<16x128xf32> to vector<1x16x128xf32>
    tpu.vector_store %arg6[%c7_46, %c0_47, %c0_48], %60 {strides = array<i32>} : memref<15x16x128xf32, #tpu.memory_space<vmem>>, vector<1x16x128xf32>,
    %c8 = arith.constant 8 : index
    %c0_49 = arith.constant 0 : index
    %c0_50 = arith.constant 0 : index
    %61 = vector.load %arg6[%c8, %c0_49, %c0_50] : memref<15x16x128xf32, #tpu.memory_space<vmem>>, vector<1x16x128xf32>
    %62 = vector.shape_cast %61 : vector<1x16x128xf32> to vector<16x128xf32>
    %63 = arith.mulf %6, %6 : vector<16x128xf32>
    %64 = arith.addf %62, %63 : vector<16x128xf32>
    %c8_51 = arith.constant 8 : index
    %c0_52 = arith.constant 0 : index
    %c0_53 = arith.constant 0 : index
    %65 = vector.load %arg6[%c8_51, %c0_52, %c0_53] : memref<15x16x128xf32, #tpu.memory_space<vmem>>, vector<1x16x128xf32>
    %66 = vector.shape_cast %65 : vector<1x16x128xf32> to vector<16x128xf32>
    %67 = vector.shape_cast %64 : vector<16x128xf32> to vector<1x16x128xf32>
    tpu.vector_store %arg6[%c8_51, %c0_52, %c0_53], %67 {strides = array<i32>} : memref<15x16x128xf32, #tpu.memory_space<vmem>>, vector<1x16x128xf32>,
    %c9 = arith.constant 9 : index
    %c0_54 = arith.constant 0 : index
    %c0_55 = arith.constant 0 : index
    %68 = vector.load %arg6[%c9, %c0_54, %c0_55] : memref<15x16x128xf32, #tpu.memory_space<vmem>>, vector<1x16x128xf32>
    %69 = vector.shape_cast %68 : vector<1x16x128xf32> to vector<16x128xf32>
    %70 = arith.mulf %4, %6 : vector<16x128xf32>
    %71 = arith.addf %69, %70 : vector<16x128xf32>
    %c9_56 = arith.constant 9 : index
    %c0_57 = arith.constant 0 : index
    %c0_58 = arith.constant 0 : index
    %72 = vector.load %arg6[%c9_56, %c0_57, %c0_58] : memref<15x16x128xf32, #tpu.memory_space<vmem>>, vector<1x16x128xf32>
    %73 = vector.shape_cast %72 : vector<1x16x128xf32> to vector<16x128xf32>
    %74 = vector.shape_cast %71 : vector<16x128xf32> to vector<1x16x128xf32>
    tpu.vector_store %arg6[%c9_56, %c0_57, %c0_58], %74 {strides = array<i32>} : memref<15x16x128xf32, #tpu.memory_space<vmem>>, vector<1x16x128xf32>,
    %c10 = arith.constant 10 : index
    %c0_59 = arith.constant 0 : index
    %c0_60 = arith.constant 0 : index
    %75 = vector.load %arg6[%c10, %c0_59, %c0_60] : memref<15x16x128xf32, #tpu.memory_space<vmem>>, vector<1x16x128xf32>
    %76 = vector.shape_cast %75 : vector<1x16x128xf32> to vector<16x128xf32>
    %77 = arith.addf %76, %7 : vector<16x128xf32>
    %c10_61 = arith.constant 10 : index
    %c0_62 = arith.constant 0 : index
    %c0_63 = arith.constant 0 : index
    %78 = vector.load %arg6[%c10_61, %c0_62, %c0_63] : memref<15x16x128xf32, #tpu.memory_space<vmem>>, vector<1x16x128xf32>
    %79 = vector.shape_cast %78 : vector<1x16x128xf32> to vector<16x128xf32>
    %80 = vector.shape_cast %77 : vector<16x128xf32> to vector<1x16x128xf32>
    tpu.vector_store %arg6[%c10_61, %c0_62, %c0_63], %80 {strides = array<i32>} : memref<15x16x128xf32, #tpu.memory_space<vmem>>, vector<1x16x128xf32>,
    %c11 = arith.constant 11 : index
    %c0_64 = arith.constant 0 : index
    %c0_65 = arith.constant 0 : index
    %81 = vector.load %arg6[%c11, %c0_64, %c0_65] : memref<15x16x128xf32, #tpu.memory_space<vmem>>, vector<1x16x128xf32>
    %82 = vector.shape_cast %81 : vector<1x16x128xf32> to vector<16x128xf32>
    %83 = arith.addf %82, %8 : vector<16x128xf32>
    %c11_66 = arith.constant 11 : index
    %c0_67 = arith.constant 0 : index
    %c0_68 = arith.constant 0 : index
    %84 = vector.load %arg6[%c11_66, %c0_67, %c0_68] : memref<15x16x128xf32, #tpu.memory_space<vmem>>, vector<1x16x128xf32>
    %85 = vector.shape_cast %84 : vector<1x16x128xf32> to vector<16x128xf32>
    %86 = vector.shape_cast %83 : vector<16x128xf32> to vector<1x16x128xf32>
    tpu.vector_store %arg6[%c11_66, %c0_67, %c0_68], %86 {strides = array<i32>} : memref<15x16x128xf32, #tpu.memory_space<vmem>>, vector<1x16x128xf32>,
    %c12 = arith.constant 12 : index
    %c0_69 = arith.constant 0 : index
    %c0_70 = arith.constant 0 : index
    %87 = vector.load %arg6[%c12, %c0_69, %c0_70] : memref<15x16x128xf32, #tpu.memory_space<vmem>>, vector<1x16x128xf32>
    %88 = vector.shape_cast %87 : vector<1x16x128xf32> to vector<16x128xf32>
    %89 = arith.mulf %7, %7 : vector<16x128xf32>
    %90 = arith.addf %88, %89 : vector<16x128xf32>
    %c12_71 = arith.constant 12 : index
    %c0_72 = arith.constant 0 : index
    %c0_73 = arith.constant 0 : index
    %91 = vector.load %arg6[%c12_71, %c0_72, %c0_73] : memref<15x16x128xf32, #tpu.memory_space<vmem>>, vector<1x16x128xf32>
    %92 = vector.shape_cast %91 : vector<1x16x128xf32> to vector<16x128xf32>
    %93 = vector.shape_cast %90 : vector<16x128xf32> to vector<1x16x128xf32>
    tpu.vector_store %arg6[%c12_71, %c0_72, %c0_73], %93 {strides = array<i32>} : memref<15x16x128xf32, #tpu.memory_space<vmem>>, vector<1x16x128xf32>,
    %c13 = arith.constant 13 : index
    %c0_74 = arith.constant 0 : index
    %c0_75 = arith.constant 0 : index
    %94 = vector.load %arg6[%c13, %c0_74, %c0_75] : memref<15x16x128xf32, #tpu.memory_space<vmem>>, vector<1x16x128xf32>
    %95 = vector.shape_cast %94 : vector<1x16x128xf32> to vector<16x128xf32>
    %96 = arith.mulf %8, %8 : vector<16x128xf32>
    %97 = arith.addf %95, %96 : vector<16x128xf32>
    %c13_76 = arith.constant 13 : index
    %c0_77 = arith.constant 0 : index
    %c0_78 = arith.constant 0 : index
    %98 = vector.load %arg6[%c13_76, %c0_77, %c0_78] : memref<15x16x128xf32, #tpu.memory_space<vmem>>, vector<1x16x128xf32>
    %99 = vector.shape_cast %98 : vector<1x16x128xf32> to vector<16x128xf32>
    %100 = vector.shape_cast %97 : vector<16x128xf32> to vector<1x16x128xf32>
    tpu.vector_store %arg6[%c13_76, %c0_77, %c0_78], %100 {strides = array<i32>} : memref<15x16x128xf32, #tpu.memory_space<vmem>>, vector<1x16x128xf32>,
    %c14 = arith.constant 14 : index
    %c0_79 = arith.constant 0 : index
    %c0_80 = arith.constant 0 : index
    %101 = vector.load %arg6[%c14, %c0_79, %c0_80] : memref<15x16x128xf32, #tpu.memory_space<vmem>>, vector<1x16x128xf32>
    %102 = vector.shape_cast %101 : vector<1x16x128xf32> to vector<16x128xf32>
    %103 = arith.mulf %7, %8 : vector<16x128xf32>
    %104 = arith.addf %102, %103 : vector<16x128xf32>
    %c14_81 = arith.constant 14 : index
    %c0_82 = arith.constant 0 : index
    %c0_83 = arith.constant 0 : index
    %105 = vector.load %arg6[%c14_81, %c0_82, %c0_83] : memref<15x16x128xf32, #tpu.memory_space<vmem>>, vector<1x16x128xf32>
    %106 = vector.shape_cast %105 : vector<1x16x128xf32> to vector<16x128xf32>
    %107 = vector.shape_cast %104 : vector<16x128xf32> to vector<1x16x128xf32>
    tpu.vector_store %arg6[%c14_81, %c0_82, %c0_83], %107 {strides = array<i32>} : memref<15x16x128xf32, #tpu.memory_space<vmem>>, vector<1x16x128xf32>,
    %c0_i32_84 = arith.constant 0 : i32
    %108 = arith.cmpi eq, %arg0, %c0_i32_84 : i32
    %109 = arith.extui %108 : i1 to i32
    %c0_i32_85 = arith.constant 0 : i32
    %110 = arith.cmpi ne, %109, %c0_i32_85 : i32
    scf.if %110 {
      %c0_86 = arith.constant 0 : index
      %c0_87 = arith.constant 0 : index
      %c0_88 = arith.constant 0 : index
      %111 = vector.load %arg6[%c0_86, %c0_87, %c0_88] : memref<15x16x128xf32, #tpu.memory_space<vmem>>, vector<1x16x128xf32>
      %112 = vector.shape_cast %111 : vector<1x16x128xf32> to vector<16x128xf32>
      %c1_89 = arith.constant 1 : index
      %c0_90 = arith.constant 0 : index
      %c0_91 = arith.constant 0 : index
      %113 = vector.load %arg6[%c1_89, %c0_90, %c0_91] : memref<15x16x128xf32, #tpu.memory_space<vmem>>, vector<1x16x128xf32>
      %114 = vector.shape_cast %113 : vector<1x16x128xf32> to vector<16x128xf32>
      %c2_92 = arith.constant 2 : index
      %c0_93 = arith.constant 0 : index
      %c0_94 = arith.constant 0 : index
      %115 = vector.load %arg6[%c2_92, %c0_93, %c0_94] : memref<15x16x128xf32, #tpu.memory_space<vmem>>, vector<1x16x128xf32>
      %116 = vector.shape_cast %115 : vector<1x16x128xf32> to vector<16x128xf32>
      %c3_95 = arith.constant 3 : index
      %c0_96 = arith.constant 0 : index
      %c0_97 = arith.constant 0 : index
      %117 = vector.load %arg6[%c3_95, %c0_96, %c0_97] : memref<15x16x128xf32, #tpu.memory_space<vmem>>, vector<1x16x128xf32>
      %118 = vector.shape_cast %117 : vector<1x16x128xf32> to vector<16x128xf32>
      %c4_98 = arith.constant 4 : index
      %c0_99 = arith.constant 0 : index
      %c0_100 = arith.constant 0 : index
      %119 = vector.load %arg6[%c4_98, %c0_99, %c0_100] : memref<15x16x128xf32, #tpu.memory_space<vmem>>, vector<1x16x128xf32>
      %120 = vector.shape_cast %119 : vector<1x16x128xf32> to vector<16x128xf32>
      %121 = vector.extract_strided_slice %112 {offsets = [0, 0], sizes = [8, 128], strides = [1, 1]} : vector<16x128xf32> to vector<8x128xf32>
      %122 = vector.shape_cast %121 : vector<8x128xf32> to vector<1x8x128xf32>
      %cst = arith.constant dense<0.000000e+00> : vector<1xf32>
      %123 = vector.multi_reduction <add>, %122, %cst [1, 2] : vector<1x8x128xf32> to vector<1xf32>
      %124 = vector.shape_cast %123 : vector<1xf32> to vector<1x1x1xf32>
      %125 = vector.extract %124[0, 0, 0] : f32 from vector<1x1x1xf32>
      %126 = vector.extract_strided_slice %114 {offsets = [0, 0], sizes = [8, 128], strides = [1, 1]} : vector<16x128xf32> to vector<8x128xf32>
      %127 = vector.shape_cast %126 : vector<8x128xf32> to vector<1x8x128xf32>
      %cst_101 = arith.constant dense<0.000000e+00> : vector<1xf32>
      %128 = vector.multi_reduction <add>, %127, %cst_101 [1, 2] : vector<1x8x128xf32> to vector<1xf32>
      %129 = vector.shape_cast %128 : vector<1xf32> to vector<1x1x1xf32>
      %130 = vector.extract %129[0, 0, 0] : f32 from vector<1x1x1xf32>
      %131 = vector.extract_strided_slice %116 {offsets = [0, 0], sizes = [8, 128], strides = [1, 1]} : vector<16x128xf32> to vector<8x128xf32>
      %132 = vector.shape_cast %131 : vector<8x128xf32> to vector<1x8x128xf32>
      %cst_102 = arith.constant dense<0.000000e+00> : vector<1xf32>
      %133 = vector.multi_reduction <add>, %132, %cst_102 [1, 2] : vector<1x8x128xf32> to vector<1xf32>
      %134 = vector.shape_cast %133 : vector<1xf32> to vector<1x1x1xf32>
      %135 = vector.extract %134[0, 0, 0] : f32 from vector<1x1x1xf32>
      %136 = vector.extract_strided_slice %118 {offsets = [0, 0], sizes = [8, 128], strides = [1, 1]} : vector<16x128xf32> to vector<8x128xf32>
      %137 = vector.shape_cast %136 : vector<8x128xf32> to vector<1x8x128xf32>
      %cst_103 = arith.constant dense<0.000000e+00> : vector<1xf32>
      %138 = vector.multi_reduction <add>, %137, %cst_103 [1, 2] : vector<1x8x128xf32> to vector<1xf32>
      %139 = vector.shape_cast %138 : vector<1xf32> to vector<1x1x1xf32>
      %140 = vector.extract %139[0, 0, 0] : f32 from vector<1x1x1xf32>
      %141 = vector.extract_strided_slice %120 {offsets = [0, 0], sizes = [8, 128], strides = [1, 1]} : vector<16x128xf32> to vector<8x128xf32>
      %142 = vector.shape_cast %141 : vector<8x128xf32> to vector<1x8x128xf32>
      %cst_104 = arith.constant dense<0.000000e+00> : vector<1xf32>
      %143 = vector.multi_reduction <add>, %142, %cst_104 [1, 2] : vector<1x8x128xf32> to vector<1xf32>
      %144 = vector.shape_cast %143 : vector<1xf32> to vector<1x1x1xf32>
      %145 = vector.extract %144[0, 0, 0] : f32 from vector<1x1x1xf32>
      %cst_105 = arith.constant 2.000000e+00 : f32
      %146 = arith.mulf %cst_105, %145 : f32
      %147 = arith.subf %135, %146 : f32
      %148 = arith.addf %147, %140 : f32
      %cst_106 = arith.constant 0.000000e+00 : f32
      %149 = arith.addf %cst_106, %148 : f32
      %cst_107 = arith.constant 1.024000e+03 : f32
      %150 = arith.divf %125, %cst_107 : f32
      %cst_108 = arith.constant 1.024000e+03 : f32
      %151 = arith.divf %130, %cst_108 : f32
      %cst_109 = arith.constant 1.024000e+03 : f32
      %152 = arith.divf %135, %cst_109 : f32
      %153 = arith.mulf %150, %150 : f32
      %154 = arith.subf %152, %153 : f32
      %cst_110 = arith.constant 1.024000e+03 : f32
      %155 = arith.divf %140, %cst_110 : f32
      %156 = arith.mulf %151, %151 : f32
      %157 = arith.subf %155, %156 : f32
      %cst_111 = arith.constant 1.024000e+03 : f32
      %158 = arith.divf %145, %cst_111 : f32
      %159 = arith.mulf %150, %151 : f32
      %160 = arith.subf %158, %159 : f32
      %cst_112 = arith.constant 2.000000e+00 : f32
      %161 = arith.mulf %cst_112, %150 : f32
      %162 = arith.mulf %161, %151 : f32
      %cst_113 = arith.constant 9.99999974E-5 : f32
      %163 = arith.addf %162, %cst_113 : f32
      %cst_114 = arith.constant 2.000000e+00 : f32
      %164 = arith.mulf %cst_114, %160 : f32
      %cst_115 = arith.constant 8.99999984E-4 : f32
      %165 = arith.addf %164, %cst_115 : f32
      %166 = arith.mulf %163, %165 : f32
      %167 = arith.mulf %150, %150 : f32
      %168 = arith.mulf %151, %151 : f32
      %169 = arith.addf %167, %168 : f32
      %cst_116 = arith.constant 9.99999974E-5 : f32
      %170 = arith.addf %169, %cst_116 : f32
      %171 = arith.addf %154, %157 : f32
      %cst_117 = arith.constant 8.99999984E-4 : f32
      %172 = arith.addf %171, %cst_117 : f32
      %173 = arith.mulf %170, %172 : f32
      %174 = arith.divf %166, %173 : f32
      %cst_118 = arith.constant 0.000000e+00 : f32
      %175 = arith.addf %cst_118, %174 : f32
      %176 = vector.extract_strided_slice %112 {offsets = [8, 0], sizes = [8, 128], strides = [1, 1]} : vector<16x128xf32> to vector<8x128xf32>
      %177 = vector.shape_cast %176 : vector<8x128xf32> to vector<1x8x128xf32>
      %cst_119 = arith.constant dense<0.000000e+00> : vector<1xf32>
      %178 = vector.multi_reduction <add>, %177, %cst_119 [1, 2] : vector<1x8x128xf32> to vector<1xf32>
      %179 = vector.shape_cast %178 : vector<1xf32> to vector<1x1x1xf32>
      %180 = vector.extract %179[0, 0, 0] : f32 from vector<1x1x1xf32>
      %181 = vector.extract_strided_slice %114 {offsets = [8, 0], sizes = [8, 128], strides = [1, 1]} : vector<16x128xf32> to vector<8x128xf32>
      %182 = vector.shape_cast %181 : vector<8x128xf32> to vector<1x8x128xf32>
      %cst_120 = arith.constant dense<0.000000e+00> : vector<1xf32>
      %183 = vector.multi_reduction <add>, %182, %cst_120 [1, 2] : vector<1x8x128xf32> to vector<1xf32>
      %184 = vector.shape_cast %183 : vector<1xf32> to vector<1x1x1xf32>
      %185 = vector.extract %184[0, 0, 0] : f32 from vector<1x1x1xf32>
      %186 = vector.extract_strided_slice %116 {offsets = [8, 0], sizes = [8, 128], strides = [1, 1]} : vector<16x128xf32> to vector<8x128xf32>
      %187 = vector.shape_cast %186 : vector<8x128xf32> to vector<1x8x128xf32>
      %cst_121 = arith.constant dense<0.000000e+00> : vector<1xf32>
      %188 = vector.multi_reduction <add>, %187, %cst_121 [1, 2] : vector<1x8x128xf32> to vector<1xf32>
      %189 = vector.shape_cast %188 : vector<1xf32> to vector<1x1x1xf32>
      %190 = vector.extract %189[0, 0, 0] : f32 from vector<1x1x1xf32>
      %191 = vector.extract_strided_slice %118 {offsets = [8, 0], sizes = [8, 128], strides = [1, 1]} : vector<16x128xf32> to vector<8x128xf32>
      %192 = vector.shape_cast %191 : vector<8x128xf32> to vector<1x8x128xf32>
      %cst_122 = arith.constant dense<0.000000e+00> : vector<1xf32>
      %193 = vector.multi_reduction <add>, %192, %cst_122 [1, 2] : vector<1x8x128xf32> to vector<1xf32>
      %194 = vector.shape_cast %193 : vector<1xf32> to vector<1x1x1xf32>
      %195 = vector.extract %194[0, 0, 0] : f32 from vector<1x1x1xf32>
      %196 = vector.extract_strided_slice %120 {offsets = [8, 0], sizes = [8, 128], strides = [1, 1]} : vector<16x128xf32> to vector<8x128xf32>
      %197 = vector.shape_cast %196 : vector<8x128xf32> to vector<1x8x128xf32>
      %cst_123 = arith.constant dense<0.000000e+00> : vector<1xf32>
      %198 = vector.multi_reduction <add>, %197, %cst_123 [1, 2] : vector<1x8x128xf32> to vector<1xf32>
      %199 = vector.shape_cast %198 : vector<1xf32> to vector<1x1x1xf32>
      %200 = vector.extract %199[0, 0, 0] : f32 from vector<1x1x1xf32>
      %cst_124 = arith.constant 2.000000e+00 : f32
      %201 = arith.mulf %cst_124, %200 : f32
      %202 = arith.subf %190, %201 : f32
      %203 = arith.addf %202, %195 : f32
      %204 = arith.addf %149, %203 : f32
      %cst_125 = arith.constant 1.024000e+03 : f32
      %205 = arith.divf %180, %cst_125 : f32
      %cst_126 = arith.constant 1.024000e+03 : f32
      %206 = arith.divf %185, %cst_126 : f32
      %cst_127 = arith.constant 1.024000e+03 : f32
      %207 = arith.divf %190, %cst_127 : f32
      %208 = arith.mulf %205, %205 : f32
      %209 = arith.subf %207, %208 : f32
      %cst_128 = arith.constant 1.024000e+03 : f32
      %210 = arith.divf %195, %cst_128 : f32
      %211 = arith.mulf %206, %206 : f32
      %212 = arith.subf %210, %211 : f32
      %cst_129 = arith.constant 1.024000e+03 : f32
      %213 = arith.divf %200, %cst_129 : f32
      %214 = arith.mulf %205, %206 : f32
      %215 = arith.subf %213, %214 : f32
      %cst_130 = arith.constant 2.000000e+00 : f32
      %216 = arith.mulf %cst_130, %205 : f32
      %217 = arith.mulf %216, %206 : f32
      %cst_131 = arith.constant 9.99999974E-5 : f32
      %218 = arith.addf %217, %cst_131 : f32
      %cst_132 = arith.constant 2.000000e+00 : f32
      %219 = arith.mulf %cst_132, %215 : f32
      %cst_133 = arith.constant 8.99999984E-4 : f32
      %220 = arith.addf %219, %cst_133 : f32
      %221 = arith.mulf %218, %220 : f32
      %222 = arith.mulf %205, %205 : f32
      %223 = arith.mulf %206, %206 : f32
      %224 = arith.addf %222, %223 : f32
      %cst_134 = arith.constant 9.99999974E-5 : f32
      %225 = arith.addf %224, %cst_134 : f32
      %226 = arith.addf %209, %212 : f32
      %cst_135 = arith.constant 8.99999984E-4 : f32
      %227 = arith.addf %226, %cst_135 : f32
      %228 = arith.mulf %225, %227 : f32
      %229 = arith.divf %221, %228 : f32
      %230 = arith.addf %175, %229 : f32
      %cst_136 = arith.constant 1.024000e+03 : f32
      %cst_137 = arith.constant 2.000000e+00 : f32
      %231 = arith.mulf %cst_136, %cst_137 : f32
      %232 = arith.divf %204, %231 : f32
      %cst_138 = arith.constant 9.99999996E-13 : f32
      %233 = arith.maximumf %232, %cst_138 : f32
      %cst_139 = arith.constant 1.000000e+00 : f32
      %234 = arith.divf %cst_139, %233 : f32
      %235 = math.log %234 : f32
      %cst_140 = arith.constant 0.434294492 : f32
      %236 = arith.mulf %235, %cst_140 : f32
      %cst_141 = arith.constant 1.000000e+01 : f32
      %237 = arith.mulf %cst_141, %236 : f32
      %c0_142 = arith.constant 0 : index
      %238 = memref.load %arg5[%c0_142] : memref<9xf32, #tpu.memory_space<smem>>
      memref.store %232, %arg5[%c0_142] : memref<9xf32, #tpu.memory_space<smem>>
      %cst_143 = arith.constant 2.000000e+00 : f32
      %239 = arith.divf %230, %cst_143 : f32
      %c1_144 = arith.constant 1 : index
      %240 = memref.load %arg5[%c1_144] : memref<9xf32, #tpu.memory_space<smem>>
      memref.store %239, %arg5[%c1_144] : memref<9xf32, #tpu.memory_space<smem>>
      %c2_145 = arith.constant 2 : index
      %241 = memref.load %arg5[%c2_145] : memref<9xf32, #tpu.memory_space<smem>>
      memref.store %237, %arg5[%c2_145] : memref<9xf32, #tpu.memory_space<smem>>
      %c5_146 = arith.constant 5 : index
      %c0_147 = arith.constant 0 : index
      %c0_148 = arith.constant 0 : index
      %242 = vector.load %arg6[%c5_146, %c0_147, %c0_148] : memref<15x16x128xf32, #tpu.memory_space<vmem>>, vector<1x16x128xf32>
      %243 = vector.shape_cast %242 : vector<1x16x128xf32> to vector<16x128xf32>
      %c6_149 = arith.constant 6 : index
      %c0_150 = arith.constant 0 : index
      %c0_151 = arith.constant 0 : index
      %244 = vector.load %arg6[%c6_149, %c0_150, %c0_151] : memref<15x16x128xf32, #tpu.memory_space<vmem>>, vector<1x16x128xf32>
      %245 = vector.shape_cast %244 : vector<1x16x128xf32> to vector<16x128xf32>
      %c7_152 = arith.constant 7 : index
      %c0_153 = arith.constant 0 : index
      %c0_154 = arith.constant 0 : index
      %246 = vector.load %arg6[%c7_152, %c0_153, %c0_154] : memref<15x16x128xf32, #tpu.memory_space<vmem>>, vector<1x16x128xf32>
      %247 = vector.shape_cast %246 : vector<1x16x128xf32> to vector<16x128xf32>
      %c8_155 = arith.constant 8 : index
      %c0_156 = arith.constant 0 : index
      %c0_157 = arith.constant 0 : index
      %248 = vector.load %arg6[%c8_155, %c0_156, %c0_157] : memref<15x16x128xf32, #tpu.memory_space<vmem>>, vector<1x16x128xf32>
      %249 = vector.shape_cast %248 : vector<1x16x128xf32> to vector<16x128xf32>
      %c9_158 = arith.constant 9 : index
      %c0_159 = arith.constant 0 : index
      %c0_160 = arith.constant 0 : index
      %250 = vector.load %arg6[%c9_158, %c0_159, %c0_160] : memref<15x16x128xf32, #tpu.memory_space<vmem>>, vector<1x16x128xf32>
      %251 = vector.shape_cast %250 : vector<1x16x128xf32> to vector<16x128xf32>
      %252 = vector.extract_strided_slice %243 {offsets = [0, 0], sizes = [8, 128], strides = [1, 1]} : vector<16x128xf32> to vector<8x128xf32>
      %253 = vector.shape_cast %252 : vector<8x128xf32> to vector<1x8x128xf32>
      %cst_161 = arith.constant dense<0.000000e+00> : vector<1xf32>
      %254 = vector.multi_reduction <add>, %253, %cst_161 [1, 2] : vector<1x8x128xf32> to vector<1xf32>
      %255 = vector.shape_cast %254 : vector<1xf32> to vector<1x1x1xf32>
      %256 = vector.extract %255[0, 0, 0] : f32 from vector<1x1x1xf32>
      %257 = vector.extract_strided_slice %245 {offsets = [0, 0], sizes = [8, 128], strides = [1, 1]} : vector<16x128xf32> to vector<8x128xf32>
      %258 = vector.shape_cast %257 : vector<8x128xf32> to vector<1x8x128xf32>
      %cst_162 = arith.constant dense<0.000000e+00> : vector<1xf32>
      %259 = vector.multi_reduction <add>, %258, %cst_162 [1, 2] : vector<1x8x128xf32> to vector<1xf32>
      %260 = vector.shape_cast %259 : vector<1xf32> to vector<1x1x1xf32>
      %261 = vector.extract %260[0, 0, 0] : f32 from vector<1x1x1xf32>
      %262 = vector.extract_strided_slice %247 {offsets = [0, 0], sizes = [8, 128], strides = [1, 1]} : vector<16x128xf32> to vector<8x128xf32>
      %263 = vector.shape_cast %262 : vector<8x128xf32> to vector<1x8x128xf32>
      %cst_163 = arith.constant dense<0.000000e+00> : vector<1xf32>
      %264 = vector.multi_reduction <add>, %263, %cst_163 [1, 2] : vector<1x8x128xf32> to vector<1xf32>
      %265 = vector.shape_cast %264 : vector<1xf32> to vector<1x1x1xf32>
      %266 = vector.extract %265[0, 0, 0] : f32 from vector<1x1x1xf32>
      %267 = vector.extract_strided_slice %249 {offsets = [0, 0], sizes = [8, 128], strides = [1, 1]} : vector<16x128xf32> to vector<8x128xf32>
      %268 = vector.shape_cast %267 : vector<8x128xf32> to vector<1x8x128xf32>
      %cst_164 = arith.constant dense<0.000000e+00> : vector<1xf32>
      %269 = vector.multi_reduction <add>, %268, %cst_164 [1, 2] : vector<1x8x128xf32> to vector<1xf32>
      %270 = vector.shape_cast %269 : vector<1xf32> to vector<1x1x1xf32>
      %271 = vector.extract %270[0, 0, 0] : f32 from vector<1x1x1xf32>
      %272 = vector.extract_strided_slice %251 {offsets = [0, 0], sizes = [8, 128], strides = [1, 1]} : vector<16x128xf32> to vector<8x128xf32>
      %273 = vector.shape_cast %272 : vector<8x128xf32> to vector<1x8x128xf32>
      %cst_165 = arith.constant dense<0.000000e+00> : vector<1xf32>
      %274 = vector.multi_reduction <add>, %273, %cst_165 [1, 2] : vector<1x8x128xf32> to vector<1xf32>
      %275 = vector.shape_cast %274 : vector<1xf32> to vector<1x1x1xf32>
      %276 = vector.extract %275[0, 0, 0] : f32 from vector<1x1x1xf32>
      %cst_166 = arith.constant 2.000000e+00 : f32
      %277 = arith.mulf %cst_166, %276 : f32
      %278 = arith.subf %266, %277 : f32
      %279 = arith.addf %278, %271 : f32
      %cst_167 = arith.constant 0.000000e+00 : f32
      %280 = arith.addf %cst_167, %279 : f32
      %cst_168 = arith.constant 1.024000e+03 : f32
      %281 = arith.divf %256, %cst_168 : f32
      %cst_169 = arith.constant 1.024000e+03 : f32
      %282 = arith.divf %261, %cst_169 : f32
      %cst_170 = arith.constant 1.024000e+03 : f32
      %283 = arith.divf %266, %cst_170 : f32
      %284 = arith.mulf %281, %281 : f32
      %285 = arith.subf %283, %284 : f32
      %cst_171 = arith.constant 1.024000e+03 : f32
      %286 = arith.divf %271, %cst_171 : f32
      %287 = arith.mulf %282, %282 : f32
      %288 = arith.subf %286, %287 : f32
      %cst_172 = arith.constant 1.024000e+03 : f32
      %289 = arith.divf %276, %cst_172 : f32
      %290 = arith.mulf %281, %282 : f32
      %291 = arith.subf %289, %290 : f32
      %cst_173 = arith.constant 2.000000e+00 : f32
      %292 = arith.mulf %cst_173, %281 : f32
      %293 = arith.mulf %292, %282 : f32
      %cst_174 = arith.constant 9.99999974E-5 : f32
      %294 = arith.addf %293, %cst_174 : f32
      %cst_175 = arith.constant 2.000000e+00 : f32
      %295 = arith.mulf %cst_175, %291 : f32
      %cst_176 = arith.constant 8.99999984E-4 : f32
      %296 = arith.addf %295, %cst_176 : f32
      %297 = arith.mulf %294, %296 : f32
      %298 = arith.mulf %281, %281 : f32
      %299 = arith.mulf %282, %282 : f32
      %300 = arith.addf %298, %299 : f32
      %cst_177 = arith.constant 9.99999974E-5 : f32
      %301 = arith.addf %300, %cst_177 : f32
      %302 = arith.addf %285, %288 : f32
      %cst_178 = arith.constant 8.99999984E-4 : f32
      %303 = arith.addf %302, %cst_178 : f32
      %304 = arith.mulf %301, %303 : f32
      %305 = arith.divf %297, %304 : f32
      %cst_179 = arith.constant 0.000000e+00 : f32
      %306 = arith.addf %cst_179, %305 : f32
      %307 = vector.extract_strided_slice %243 {offsets = [8, 0], sizes = [8, 128], strides = [1, 1]} : vector<16x128xf32> to vector<8x128xf32>
      %308 = vector.shape_cast %307 : vector<8x128xf32> to vector<1x8x128xf32>
      %cst_180 = arith.constant dense<0.000000e+00> : vector<1xf32>
      %309 = vector.multi_reduction <add>, %308, %cst_180 [1, 2] : vector<1x8x128xf32> to vector<1xf32>
      %310 = vector.shape_cast %309 : vector<1xf32> to vector<1x1x1xf32>
      %311 = vector.extract %310[0, 0, 0] : f32 from vector<1x1x1xf32>
      %312 = vector.extract_strided_slice %245 {offsets = [8, 0], sizes = [8, 128], strides = [1, 1]} : vector<16x128xf32> to vector<8x128xf32>
      %313 = vector.shape_cast %312 : vector<8x128xf32> to vector<1x8x128xf32>
      %cst_181 = arith.constant dense<0.000000e+00> : vector<1xf32>
      %314 = vector.multi_reduction <add>, %313, %cst_181 [1, 2] : vector<1x8x128xf32> to vector<1xf32>
      %315 = vector.shape_cast %314 : vector<1xf32> to vector<1x1x1xf32>
      %316 = vector.extract %315[0, 0, 0] : f32 from vector<1x1x1xf32>
      %317 = vector.extract_strided_slice %247 {offsets = [8, 0], sizes = [8, 128], strides = [1, 1]} : vector<16x128xf32> to vector<8x128xf32>
      %318 = vector.shape_cast %317 : vector<8x128xf32> to vector<1x8x128xf32>
      %cst_182 = arith.constant dense<0.000000e+00> : vector<1xf32>
      %319 = vector.multi_reduction <add>, %318, %cst_182 [1, 2] : vector<1x8x128xf32> to vector<1xf32>
      %320 = vector.shape_cast %319 : vector<1xf32> to vector<1x1x1xf32>
      %321 = vector.extract %320[0, 0, 0] : f32 from vector<1x1x1xf32>
      %322 = vector.extract_strided_slice %249 {offsets = [8, 0], sizes = [8, 128], strides = [1, 1]} : vector<16x128xf32> to vector<8x128xf32>
      %323 = vector.shape_cast %322 : vector<8x128xf32> to vector<1x8x128xf32>
      %cst_183 = arith.constant dense<0.000000e+00> : vector<1xf32>
      %324 = vector.multi_reduction <add>, %323, %cst_183 [1, 2] : vector<1x8x128xf32> to vector<1xf32>
      %325 = vector.shape_cast %324 : vector<1xf32> to vector<1x1x1xf32>
      %326 = vector.extract %325[0, 0, 0] : f32 from vector<1x1x1xf32>
      %327 = vector.extract_strided_slice %251 {offsets = [8, 0], sizes = [8, 128], strides = [1, 1]} : vector<16x128xf32> to vector<8x128xf32>
      %328 = vector.shape_cast %327 : vector<8x128xf32> to vector<1x8x128xf32>
      %cst_184 = arith.constant dense<0.000000e+00> : vector<1xf32>
      %329 = vector.multi_reduction <add>, %328, %cst_184 [1, 2] : vector<1x8x128xf32> to vector<1xf32>
      %330 = vector.shape_cast %329 : vector<1xf32> to vector<1x1x1xf32>
      %331 = vector.extract %330[0, 0, 0] : f32 from vector<1x1x1xf32>
      %cst_185 = arith.constant 2.000000e+00 : f32
      %332 = arith.mulf %cst_185, %331 : f32
      %333 = arith.subf %321, %332 : f32
      %334 = arith.addf %333, %326 : f32
      %335 = arith.addf %280, %334 : f32
      %cst_186 = arith.constant 1.024000e+03 : f32
      %336 = arith.divf %311, %cst_186 : f32
      %cst_187 = arith.constant 1.024000e+03 : f32
      %337 = arith.divf %316, %cst_187 : f32
      %cst_188 = arith.constant 1.024000e+03 : f32
      %338 = arith.divf %321, %cst_188 : f32
      %339 = arith.mulf %336, %336 : f32
      %340 = arith.subf %338, %339 : f32
      %cst_189 = arith.constant 1.024000e+03 : f32
      %341 = arith.divf %326, %cst_189 : f32
      %342 = arith.mulf %337, %337 : f32
      %343 = arith.subf %341, %342 : f32
      %cst_190 = arith.constant 1.024000e+03 : f32
      %344 = arith.divf %331, %cst_190 : f32
      %345 = arith.mulf %336, %337 : f32
      %346 = arith.subf %344, %345 : f32
      %cst_191 = arith.constant 2.000000e+00 : f32
      %347 = arith.mulf %cst_191, %336 : f32
      %348 = arith.mulf %347, %337 : f32
      %cst_192 = arith.constant 9.99999974E-5 : f32
      %349 = arith.addf %348, %cst_192 : f32
      %cst_193 = arith.constant 2.000000e+00 : f32
      %350 = arith.mulf %cst_193, %346 : f32
      %cst_194 = arith.constant 8.99999984E-4 : f32
      %351 = arith.addf %350, %cst_194 : f32
      %352 = arith.mulf %349, %351 : f32
      %353 = arith.mulf %336, %336 : f32
      %354 = arith.mulf %337, %337 : f32
      %355 = arith.addf %353, %354 : f32
      %cst_195 = arith.constant 9.99999974E-5 : f32
      %356 = arith.addf %355, %cst_195 : f32
      %357 = arith.addf %340, %343 : f32
      %cst_196 = arith.constant 8.99999984E-4 : f32
      %358 = arith.addf %357, %cst_196 : f32
      %359 = arith.mulf %356, %358 : f32
      %360 = arith.divf %352, %359 : f32
      %361 = arith.addf %306, %360 : f32
      %cst_197 = arith.constant 1.024000e+03 : f32
      %cst_198 = arith.constant 2.000000e+00 : f32
      %362 = arith.mulf %cst_197, %cst_198 : f32
      %363 = arith.divf %335, %362 : f32
      %cst_199 = arith.constant 9.99999996E-13 : f32
      %364 = arith.maximumf %363, %cst_199 : f32
      %cst_200 = arith.constant 1.000000e+00 : f32
      %365 = arith.divf %cst_200, %364 : f32
      %366 = math.log %365 : f32
      %cst_201 = arith.constant 0.434294492 : f32
      %367 = arith.mulf %366, %cst_201 : f32
      %cst_202 = arith.constant 1.000000e+01 : f32
      %368 = arith.mulf %cst_202, %367 : f32
      %c3_203 = arith.constant 3 : index
      %369 = memref.load %arg5[%c3_203] : memref<9xf32, #tpu.memory_space<smem>>
      memref.store %363, %arg5[%c3_203] : memref<9xf32, #tpu.memory_space<smem>>
      %cst_204 = arith.constant 2.000000e+00 : f32
      %370 = arith.divf %361, %cst_204 : f32
      %c4_205 = arith.constant 4 : index
      %371 = memref.load %arg5[%c4_205] : memref<9xf32, #tpu.memory_space<smem>>
      memref.store %370, %arg5[%c4_205] : memref<9xf32, #tpu.memory_space<smem>>
      %c5_206 = arith.constant 5 : index
      %372 = memref.load %arg5[%c5_206] : memref<9xf32, #tpu.memory_space<smem>>
      memref.store %368, %arg5[%c5_206] : memref<9xf32, #tpu.memory_space<smem>>
      %c10_207 = arith.constant 10 : index
      %c0_208 = arith.constant 0 : index
      %c0_209 = arith.constant 0 : index
      %373 = vector.load %arg6[%c10_207, %c0_208, %c0_209] : memref<15x16x128xf32, #tpu.memory_space<vmem>>, vector<1x16x128xf32>
      %374 = vector.shape_cast %373 : vector<1x16x128xf32> to vector<16x128xf32>
      %c11_210 = arith.constant 11 : index
      %c0_211 = arith.constant 0 : index
      %c0_212 = arith.constant 0 : index
      %375 = vector.load %arg6[%c11_210, %c0_211, %c0_212] : memref<15x16x128xf32, #tpu.memory_space<vmem>>, vector<1x16x128xf32>
      %376 = vector.shape_cast %375 : vector<1x16x128xf32> to vector<16x128xf32>
      %c12_213 = arith.constant 12 : index
      %c0_214 = arith.constant 0 : index
      %c0_215 = arith.constant 0 : index
      %377 = vector.load %arg6[%c12_213, %c0_214, %c0_215] : memref<15x16x128xf32, #tpu.memory_space<vmem>>, vector<1x16x128xf32>
      %378 = vector.shape_cast %377 : vector<1x16x128xf32> to vector<16x128xf32>
      %c13_216 = arith.constant 13 : index
      %c0_217 = arith.constant 0 : index
      %c0_218 = arith.constant 0 : index
      %379 = vector.load %arg6[%c13_216, %c0_217, %c0_218] : memref<15x16x128xf32, #tpu.memory_space<vmem>>, vector<1x16x128xf32>
      %380 = vector.shape_cast %379 : vector<1x16x128xf32> to vector<16x128xf32>
      %c14_219 = arith.constant 14 : index
      %c0_220 = arith.constant 0 : index
      %c0_221 = arith.constant 0 : index
      %381 = vector.load %arg6[%c14_219, %c0_220, %c0_221] : memref<15x16x128xf32, #tpu.memory_space<vmem>>, vector<1x16x128xf32>
      %382 = vector.shape_cast %381 : vector<1x16x128xf32> to vector<16x128xf32>
      %383 = vector.extract_strided_slice %374 {offsets = [0, 0], sizes = [8, 128], strides = [1, 1]} : vector<16x128xf32> to vector<8x128xf32>
      %384 = vector.shape_cast %383 : vector<8x128xf32> to vector<1x8x128xf32>
      %cst_222 = arith.constant dense<0.000000e+00> : vector<1xf32>
      %385 = vector.multi_reduction <add>, %384, %cst_222 [1, 2] : vector<1x8x128xf32> to vector<1xf32>
      %386 = vector.shape_cast %385 : vector<1xf32> to vector<1x1x1xf32>
      %387 = vector.extract %386[0, 0, 0] : f32 from vector<1x1x1xf32>
      %388 = vector.extract_strided_slice %376 {offsets = [0, 0], sizes = [8, 128], strides = [1, 1]} : vector<16x128xf32> to vector<8x128xf32>
      %389 = vector.shape_cast %388 : vector<8x128xf32> to vector<1x8x128xf32>
      %cst_223 = arith.constant dense<0.000000e+00> : vector<1xf32>
      %390 = vector.multi_reduction <add>, %389, %cst_223 [1, 2] : vector<1x8x128xf32> to vector<1xf32>
      %391 = vector.shape_cast %390 : vector<1xf32> to vector<1x1x1xf32>
      %392 = vector.extract %391[0, 0, 0] : f32 from vector<1x1x1xf32>
      %393 = vector.extract_strided_slice %378 {offsets = [0, 0], sizes = [8, 128], strides = [1, 1]} : vector<16x128xf32> to vector<8x128xf32>
      %394 = vector.shape_cast %393 : vector<8x128xf32> to vector<1x8x128xf32>
      %cst_224 = arith.constant dense<0.000000e+00> : vector<1xf32>
      %395 = vector.multi_reduction <add>, %394, %cst_224 [1, 2] : vector<1x8x128xf32> to vector<1xf32>
      %396 = vector.shape_cast %395 : vector<1xf32> to vector<1x1x1xf32>
      %397 = vector.extract %396[0, 0, 0] : f32 from vector<1x1x1xf32>
      %398 = vector.extract_strided_slice %380 {offsets = [0, 0], sizes = [8, 128], strides = [1, 1]} : vector<16x128xf32> to vector<8x128xf32>
      %399 = vector.shape_cast %398 : vector<8x128xf32> to vector<1x8x128xf32>
      %cst_225 = arith.constant dense<0.000000e+00> : vector<1xf32>
      %400 = vector.multi_reduction <add>, %399, %cst_225 [1, 2] : vector<1x8x128xf32> to vector<1xf32>
      %401 = vector.shape_cast %400 : vector<1xf32> to vector<1x1x1xf32>
      %402 = vector.extract %401[0, 0, 0] : f32 from vector<1x1x1xf32>
      %403 = vector.extract_strided_slice %382 {offsets = [0, 0], sizes = [8, 128], strides = [1, 1]} : vector<16x128xf32> to vector<8x128xf32>
      %404 = vector.shape_cast %403 : vector<8x128xf32> to vector<1x8x128xf32>
      %cst_226 = arith.constant dense<0.000000e+00> : vector<1xf32>
      %405 = vector.multi_reduction <add>, %404, %cst_226 [1, 2] : vector<1x8x128xf32> to vector<1xf32>
      %406 = vector.shape_cast %405 : vector<1xf32> to vector<1x1x1xf32>
      %407 = vector.extract %406[0, 0, 0] : f32 from vector<1x1x1xf32>
      %cst_227 = arith.constant 2.000000e+00 : f32
      %408 = arith.mulf %cst_227, %407 : f32
      %409 = arith.subf %397, %408 : f32
      %410 = arith.addf %409, %402 : f32
      %cst_228 = arith.constant 0.000000e+00 : f32
      %411 = arith.addf %cst_228, %410 : f32
      %cst_229 = arith.constant 1.024000e+03 : f32
      %412 = arith.divf %387, %cst_229 : f32
      %cst_230 = arith.constant 1.024000e+03 : f32
      %413 = arith.divf %392, %cst_230 : f32
      %cst_231 = arith.constant 1.024000e+03 : f32
      %414 = arith.divf %397, %cst_231 : f32
      %415 = arith.mulf %412, %412 : f32
      %416 = arith.subf %414, %415 : f32
      %cst_232 = arith.constant 1.024000e+03 : f32
      %417 = arith.divf %402, %cst_232 : f32
      %418 = arith.mulf %413, %413 : f32
      %419 = arith.subf %417, %418 : f32
      %cst_233 = arith.constant 1.024000e+03 : f32
      %420 = arith.divf %407, %cst_233 : f32
      %421 = arith.mulf %412, %413 : f32
      %422 = arith.subf %420, %421 : f32
      %cst_234 = arith.constant 2.000000e+00 : f32
      %423 = arith.mulf %cst_234, %412 : f32
      %424 = arith.mulf %423, %413 : f32
      %cst_235 = arith.constant 9.99999974E-5 : f32
      %425 = arith.addf %424, %cst_235 : f32
      %cst_236 = arith.constant 2.000000e+00 : f32
      %426 = arith.mulf %cst_236, %422 : f32
      %cst_237 = arith.constant 8.99999984E-4 : f32
      %427 = arith.addf %426, %cst_237 : f32
      %428 = arith.mulf %425, %427 : f32
      %429 = arith.mulf %412, %412 : f32
      %430 = arith.mulf %413, %413 : f32
      %431 = arith.addf %429, %430 : f32
      %cst_238 = arith.constant 9.99999974E-5 : f32
      %432 = arith.addf %431, %cst_238 : f32
      %433 = arith.addf %416, %419 : f32
      %cst_239 = arith.constant 8.99999984E-4 : f32
      %434 = arith.addf %433, %cst_239 : f32
      %435 = arith.mulf %432, %434 : f32
      %436 = arith.divf %428, %435 : f32
      %cst_240 = arith.constant 0.000000e+00 : f32
      %437 = arith.addf %cst_240, %436 : f32
      %438 = vector.extract_strided_slice %374 {offsets = [8, 0], sizes = [8, 128], strides = [1, 1]} : vector<16x128xf32> to vector<8x128xf32>
      %439 = vector.shape_cast %438 : vector<8x128xf32> to vector<1x8x128xf32>
      %cst_241 = arith.constant dense<0.000000e+00> : vector<1xf32>
      %440 = vector.multi_reduction <add>, %439, %cst_241 [1, 2] : vector<1x8x128xf32> to vector<1xf32>
      %441 = vector.shape_cast %440 : vector<1xf32> to vector<1x1x1xf32>
      %442 = vector.extract %441[0, 0, 0] : f32 from vector<1x1x1xf32>
      %443 = vector.extract_strided_slice %376 {offsets = [8, 0], sizes = [8, 128], strides = [1, 1]} : vector<16x128xf32> to vector<8x128xf32>
      %444 = vector.shape_cast %443 : vector<8x128xf32> to vector<1x8x128xf32>
      %cst_242 = arith.constant dense<0.000000e+00> : vector<1xf32>
      %445 = vector.multi_reduction <add>, %444, %cst_242 [1, 2] : vector<1x8x128xf32> to vector<1xf32>
      %446 = vector.shape_cast %445 : vector<1xf32> to vector<1x1x1xf32>
      %447 = vector.extract %446[0, 0, 0] : f32 from vector<1x1x1xf32>
      %448 = vector.extract_strided_slice %378 {offsets = [8, 0], sizes = [8, 128], strides = [1, 1]} : vector<16x128xf32> to vector<8x128xf32>
      %449 = vector.shape_cast %448 : vector<8x128xf32> to vector<1x8x128xf32>
      %cst_243 = arith.constant dense<0.000000e+00> : vector<1xf32>
      %450 = vector.multi_reduction <add>, %449, %cst_243 [1, 2] : vector<1x8x128xf32> to vector<1xf32>
      %451 = vector.shape_cast %450 : vector<1xf32> to vector<1x1x1xf32>
      %452 = vector.extract %451[0, 0, 0] : f32 from vector<1x1x1xf32>
      %453 = vector.extract_strided_slice %380 {offsets = [8, 0], sizes = [8, 128], strides = [1, 1]} : vector<16x128xf32> to vector<8x128xf32>
      %454 = vector.shape_cast %453 : vector<8x128xf32> to vector<1x8x128xf32>
      %cst_244 = arith.constant dense<0.000000e+00> : vector<1xf32>
      %455 = vector.multi_reduction <add>, %454, %cst_244 [1, 2] : vector<1x8x128xf32> to vector<1xf32>
      %456 = vector.shape_cast %455 : vector<1xf32> to vector<1x1x1xf32>
      %457 = vector.extract %456[0, 0, 0] : f32 from vector<1x1x1xf32>
      %458 = vector.extract_strided_slice %382 {offsets = [8, 0], sizes = [8, 128], strides = [1, 1]} : vector<16x128xf32> to vector<8x128xf32>
      %459 = vector.shape_cast %458 : vector<8x128xf32> to vector<1x8x128xf32>
      %cst_245 = arith.constant dense<0.000000e+00> : vector<1xf32>
      %460 = vector.multi_reduction <add>, %459, %cst_245 [1, 2] : vector<1x8x128xf32> to vector<1xf32>
      %461 = vector.shape_cast %460 : vector<1xf32> to vector<1x1x1xf32>
      %462 = vector.extract %461[0, 0, 0] : f32 from vector<1x1x1xf32>
      %cst_246 = arith.constant 2.000000e+00 : f32
      %463 = arith.mulf %cst_246, %462 : f32
      %464 = arith.subf %452, %463 : f32
      %465 = arith.addf %464, %457 : f32
      %466 = arith.addf %411, %465 : f32
      %cst_247 = arith.constant 1.024000e+03 : f32
      %467 = arith.divf %442, %cst_247 : f32
      %cst_248 = arith.constant 1.024000e+03 : f32
      %468 = arith.divf %447, %cst_248 : f32
      %cst_249 = arith.constant 1.024000e+03 : f32
      %469 = arith.divf %452, %cst_249 : f32
      %470 = arith.mulf %467, %467 : f32
      %471 = arith.subf %469, %470 : f32
      %cst_250 = arith.constant 1.024000e+03 : f32
      %472 = arith.divf %457, %cst_250 : f32
      %473 = arith.mulf %468, %468 : f32
      %474 = arith.subf %472, %473 : f32
      %cst_251 = arith.constant 1.024000e+03 : f32
      %475 = arith.divf %462, %cst_251 : f32
      %476 = arith.mulf %467, %468 : f32
      %477 = arith.subf %475, %476 : f32
      %cst_252 = arith.constant 2.000000e+00 : f32
      %478 = arith.mulf %cst_252, %467 : f32
      %479 = arith.mulf %478, %468 : f32
      %cst_253 = arith.constant 9.99999974E-5 : f32
      %480 = arith.addf %479, %cst_253 : f32
      %cst_254 = arith.constant 2.000000e+00 : f32
      %481 = arith.mulf %cst_254, %477 : f32
      %cst_255 = arith.constant 8.99999984E-4 : f32
      %482 = arith.addf %481, %cst_255 : f32
      %483 = arith.mulf %480, %482 : f32
      %484 = arith.mulf %467, %467 : f32
      %485 = arith.mulf %468, %468 : f32
      %486 = arith.addf %484, %485 : f32
      %cst_256 = arith.constant 9.99999974E-5 : f32
      %487 = arith.addf %486, %cst_256 : f32
      %488 = arith.addf %471, %474 : f32
      %cst_257 = arith.constant 8.99999984E-4 : f32
      %489 = arith.addf %488, %cst_257 : f32
      %490 = arith.mulf %487, %489 : f32
      %491 = arith.divf %483, %490 : f32
      %492 = arith.addf %437, %491 : f32
      %cst_258 = arith.constant 1.024000e+03 : f32
      %cst_259 = arith.constant 2.000000e+00 : f32
      %493 = arith.mulf %cst_258, %cst_259 : f32
      %494 = arith.divf %466, %493 : f32
      %cst_260 = arith.constant 9.99999996E-13 : f32
      %495 = arith.maximumf %494, %cst_260 : f32
      %cst_261 = arith.constant 1.000000e+00 : f32
      %496 = arith.divf %cst_261, %495 : f32
      %497 = math.log %496 : f32
      %cst_262 = arith.constant 0.434294492 : f32
      %498 = arith.mulf %497, %cst_262 : f32
      %cst_263 = arith.constant 1.000000e+01 : f32
      %499 = arith.mulf %cst_263, %498 : f32
      %c6_264 = arith.constant 6 : index
      %500 = memref.load %arg5[%c6_264] : memref<9xf32, #tpu.memory_space<smem>>
      memref.store %494, %arg5[%c6_264] : memref<9xf32, #tpu.memory_space<smem>>
      %cst_265 = arith.constant 2.000000e+00 : f32
      %501 = arith.divf %492, %cst_265 : f32
      %c7_266 = arith.constant 7 : index
      %502 = memref.load %arg5[%c7_266] : memref<9xf32, #tpu.memory_space<smem>>
      memref.store %501, %arg5[%c7_266] : memref<9xf32, #tpu.memory_space<smem>>
      %c8_267 = arith.constant 8 : index
      %503 = memref.load %arg5[%c8_267] : memref<9xf32, #tpu.memory_space<smem>>
      memref.store %499, %arg5[%c8_267] : memref<9xf32, #tpu.memory_space<smem>>
    } else {
    }
    return
  }
  func.func @transform_0(%arg0: i32) -> (i32, i32) {
    %c0_i32 = arith.constant 0 : i32
    %c0_i32_0 = arith.constant 0 : i32
    return %c0_i32, %arg0 : i32, i32
  }
  func.func @transform_1(%arg0: i32) -> (i32, i32) {
    %c0_i32 = arith.constant 0 : i32
    %c0_i32_0 = arith.constant 0 : i32
    return %c0_i32, %arg0 : i32, i32
  }
  func.func @transform_2(%arg0: i32) -> (i32, i32) {
    %c0_i32 = arith.constant 0 : i32
    %c0_i32_0 = arith.constant 0 : i32
    return %c0_i32, %arg0 : i32, i32
  }
  func.func @transform_3(%arg0: i32) -> (i32, i32) {
    %c0_i32 = arith.constant 0 : i32
    %c0_i32_0 = arith.constant 0 : i32
    return %c0_i32, %arg0 : i32, i32
  }
  func.func @transform_4(%arg0: i32) -> i32 {
    %c0_i32 = arith.constant 0 : i32
    %c0_i32_0 = arith.constant 0 : i32
    return %c0_i32 : i32
  }
}

</mosaic_0001>

<bundles_post_ra>
// kernel: _unoranic_core.9
= control target key start
LH: loop header
LB: loop body
LE: loop exit
PB: predicated region body
PF: predicated region fallthrough
CT: control target
= control target key end

     0   :  { %s697_s12 = smov 0   ;;  %s699_s13 = smov 0   ;;  %s749_s0 = inlined_call_operand.vmem [shape: bf16[128,36], index: 0, kind: input, shape index: {}]   ;;  %s750_s1 = inlined_call_operand.vmem [shape: bf16[36,128], index: 1, kind: input, shape index: {}]   ;;  %s751_s2 = inlined_call_operand.vmem [shape: f32[1,128], index: 2, kind: input, shape index: {}]   ;;  %s752_s3 = inlined_call_operand.vmem [shape: bf16[128,128], index: 3, kind: output, shape index: {}]  }
   0x1   :  { %s701_s14 = smov 0  }
   0x2 LB: > { %s25_s15 = sadd.s32 1, %s671_s13  ;;  %p535_p0 = scmp.ge.s32.totalorder %s675_s14, 1  ;;  %s675_s14 = sphi %s701_s14, %s13_s14   ;;  %s671_s13 = sphi %s699_s13, %s754_s13   ;;  %s667_s12 = sphi %s697_s12, %s753_s12  }
   0x3   : > { %p27_p1 = scmp.ge.s32.totalorder %s25_s15, 2  ;;  %p169_p2 = scmp.lt.s32.totalorder %s675_s14, 3 }
   0x5   : > { %s756_s15 = smov (%p27_p1, %s25_s15), 0  ;;  %p170_p3 = pnand %p535_p0, %p169_p2 }
   0x6   : > { %s536_s20 = sshll.u32 (!%p170_p3), %s667_s12, 3 }
   0x7   : > { %173 = sbr.rel (%p170_p3) target bundleno = 234 (0xea), region = 32  ;;  %p204_p4 = scmp.lt.s32.totalorder (!%p170_p3), %s536_s20, 15 }
   0xc   : > { %v646_v0 = vld [vmem:[%s750_s1 + $0x10] ss:$0 sps:$4 sm:$0x33]   ;;  %vm294_vm0 = vcmask 1041408   ;;  %v647_v1 = vld [vmem:[%s750_s1 + $0x8] sm:$0xff]   ;;  %v648_v3 = vld [vmem:[%s750_s1] sm:$0xff]  }
   0xd   : > { %620 = vmatprep.subr.msk.bf16.mxu0 %vm294_vm0, %v646_v0  ;;  %621 = vmatprep.subr.msk.bf16.mxu1 %vm294_vm0, %v646_v0  ;;  %v296_v2 = vsel %vm294_vm0, %v646_v0, 0  ;;  %s758_s20 = smov (!%p204_p4, %s536_s20), 15  ;;  %vm281_vm1 = vcmask 293888   ;;  %v540_v8 = vld [vmem:[%s751_s2] ss:$0 sm:$0xff] }
   0xe   : > { %601 = vmatpush3.bf16.msra.mxu0 %v296_v2  ;;  %617 = vmatpush3.bf16.msra.mxu1 %v296_v2  ;;  %s537_s23 = sshll.u32 %s758_s20, 2 }
   0xf   : > { %602 = vmatprep.subr.bf16.mxu0 %v647_v1  ;;  %615 = vmatprep.subr.bf16.mxu1 %v647_v1  ;;  %s207_s26 = scalar_lea.vmem %s749_s0, %s537_s23  ;;  %s223_s4 = scalar_lea.vmem %s752_s3, %s537_s23 }
  0x10   : > { %v649_v4 = vld [vmem:[%s207_s26] sm:$0xff]   ;;  %v650_v5 = vld [vmem:[%s207_s26 + $0x10] sm:$0xff]   ;;  %v651_v6 = vld [vmem:[%s207_s26 + $0x8] sm:$0xff]  }
  0x11   : > { %606 = vmatprep.mubr.msk.bf16.mxu0 %vm281_vm1, %v649_v4  ;;  %610 = vmatprep.mubr.msk.bf16.mxu1 %vm281_vm1, %v650_v5  ;;  %v652_v7 = vld [vmem:[%s207_s26 + $0x18] sm:$0xff]  }
  0x12   : > { %603 = vmatpush3.bf16.msra.mxu0 %v647_v1  ;;  %618 = vmatpush3.bf16.msra.mxu1 %v647_v1 }
  0x13   : > { %604 = vmatprep.subr.bf16.mxu0 %v648_v3  ;;  %616 = vmatprep.subr.bf16.mxu1 %v648_v3 }
  0x16   : > { %605 = vmatpush3.bf16.msra.mxu0 %v648_v3  ;;  %619 = vmatpush3.bf16.msra.mxu1 %v648_v3 }
  0x19   : > { %607 = vmatmul.mubr.msk.bf16.vlgmr.msra.gmra.mxu0 %vm281_vm1, %v651_v6  ;;  %611 = vmatmul.mubr.msk.bf16.vlgmr.msra.gmra.mxu1 %vm281_vm1, %v652_v7 }
  0xd9   : > { %v608_v9 = vpop.f32.mrf.mxu0  ;;  %v612_v10 = vpop.f32.mrf.mxu1 }
  0xda   : > { %v341_v11 = vadd.f32 %v608_v9, %v540_v8  ;;  %v357_v12 = vadd.f32 %v612_v10, %v540_v8 }
  0xdb   : > { %v332_v13 = vpop.f32.mrf.mxu0  ;;  %v348_v14 = vpop.f32.mrf.mxu1 }
  0xdc   : > { %vm365_vm2 = vcmp.gt.f32.partialorder %v341_v11, 0.0  ;;  %v373_v15 = vmul.f32 0.01, %v341_v11  ;;  %vm369_vm3 = vcmp.gt.f32.partialorder %v357_v12, 0.0  ;;  %v377_v16 = vmul.f32 0.01, %v357_v12 }
  0xdd   : > { %v333_v17 = vadd.f32 %v540_v8, %v332_v13  ;;  %v609_v18 = vpop.f32.mrf.mxu0  ;;  %v613_v19 = vpop.f32.mrf.mxu1  ;;  %v349_v20 = vadd.f32 %v540_v8, %v348_v14 }
  0xde   : > { %v344_v21 = vadd.f32 %v609_v18, %v540_v8  ;;  %v360_v22 = vadd.f32 %v613_v19, %v540_v8  ;;  %v381_v23 = vsel %vm365_vm2, %v341_v11, %v373_v15  ;;  %v385_v24 = vsel %vm369_vm3, %v357_v12, %v377_v16 }
  0xdf   : > { %v335_v25 = vpop.f32.mrf.mxu0  ;;  %v351_v26 = vpop.f32.mrf.mxu1  ;;  %vm363_vm6 = vcmp.gt.f32.partialorder %v333_v17, 0.0  ;;  %v371_v29 = vmul.f32 0.01, %v333_v17  ;;  %vm367_vm7 = vcmp.gt.f32.partialorder %v349_v20, 0.0  ;;  %v375_v32 = vmul.f32 0.01, %v349_v20 }
  0xe0   : > { %vm366_vm4 = vcmp.gt.f32.partialorder %v344_v21, 0.0  ;;  %v374_v27 = vmul.f32 0.01, %v344_v21  ;;  %vm370_vm5 = vcmp.gt.f32.partialorder %v360_v22, 0.0  ;;  %v378_v28 = vmul.f32 0.01, %v360_v22 }
  0xe1   : > { %v336_v30 = vadd.f32 %v540_v8, %v335_v25  ;;  %v352_v31 = vadd.f32 %v540_v8, %v351_v26  ;;  %v379_v39 = vsel %vm363_vm6, %v333_v17, %v371_v29  ;;  %v383_v41 = vsel %vm367_vm7, %v349_v20, %v375_v32 }
  0xe2   : > { %v382_v33 = vsel %vm366_vm4, %v344_v21, %v374_v27  ;;  %v386_v34 = vsel %vm370_vm5, %v360_v22, %v378_v28 }
  0xe3   : > { %v578_v35 = vpack.c.bf16 %v382_v33, %v381_v23  ;;  %v588_v36 = vpack.c.bf16 %v386_v34, %v385_v24  ;;  %vm364_vm8 = vcmp.gt.f32.partialorder %v336_v30, 0.0  ;;  %v372_v37 = vmul.f32 0.01, %v336_v30 }
  0xe4   : > { %vm368_vm9 = vcmp.gt.f32.partialorder %v352_v31, 0.0  ;;  %v376_v38 = vmul.f32 0.01, %v352_v31 }
  0xe5   : > { %590 = vst [vmem:[%s223_s4 + $0x8] sm:$0xff] %v578_v35   ;;  %592 = vst [vmem:[%s223_s4 + $0x18] sm:$0xff] %v588_v36   ;;  %v380_v40 = vsel %vm364_vm8, %v336_v30, %v372_v37 }
  0xe6   : > { %v573_v42 = vpack.c.bf16 %v380_v40, %v379_v39  ;;  %v384_v43 = vsel %vm368_vm9, %v352_v31, %v376_v38 }
  0xe7   : > { %v583_v44 = vpack.c.bf16 %v384_v43, %v383_v41 }
  0xe8   : > { %574 = vst [vmem:[%s223_s4] sm:$0xff] %v573_v42  }
  0xe9   : > { %591 = vst [vmem:[%s223_s4 + $0x10] sm:$0xff] %v583_v44  }
  0xea PF: > { %s13_s14 = sadd.s32 1, %s675_s14   ;;  %s753_s12 = smov %s671_s13 }
  0xeb   : > { %p10_p5 = scmp.ge.s32.totalorder %s13_s14, 4   ;;  %s754_s13 = smov %s756_s15 }
  0xed   :  { %12 = sbr.rel (!%p10_p5) target bundleno = 2 (0x2), region = 68 }

// kernel: _unoranic_core.10
= control target key start
LH: loop header
LB: loop body
LE: loop exit
PB: predicated region body
PF: predicated region fallthrough
CT: control target
= control target key end

     0   :  { %s776_s12 = smov 0   ;;  %s778_s13 = smov 0   ;;  %s870_s0 = inlined_call_operand.vmem [shape: bf16[32,288], index: 0, kind: input, shape index: {}]   ;;  %s871_s1 = inlined_call_operand.vmem [shape: bf16[288,128], index: 1, kind: input, shape index: {}]   ;;  %s872_s2 = inlined_call_operand.vmem [shape: f32[1,128], index: 2, kind: input, shape index: {}]   ;;  %s873_s3 = inlined_call_operand.vmem [shape: bf16[32,128], index: 3, kind: output, shape index: {}]  }
   0x1   :  { %s780_s14 = smov 0  }
   0x2 LB: > { %s25_s15 = sadd.s32 1, %s748_s13  ;;  %p609_p0 = scmp.ge.s32.totalorder %s752_s14, 1  ;;  %s752_s14 = sphi %s780_s14, %s13_s14   ;;  %s748_s13 = sphi %s778_s13, %s875_s13   ;;  %s744_s12 = sphi %s776_s12, %s874_s12  }
   0x3   : > { %p27_p1 = scmp.ge.s32.totalorder %s25_s15, 2  ;;  %p170_p2 = scmp.lt.s32.totalorder %s752_s14, 3 }
   0x5   : > { %s877_s15 = smov (%p27_p1, %s25_s15), 0  ;;  %p171_p3 = pnand %p609_p0, %p170_p2 }
   0x6   : > { %s610_s20 = sshll.u32 (!%p171_p3), %s744_s12, 1 }
   0x7   : > { %174 = sbr.rel (%p171_p3) target bundleno = 256 (0x100), region = 32  ;;  %p206_p4 = scmp.lt.s32.totalorder (!%p171_p3), %s610_s20, 3 }
   0xc   : > { %v708_v0 = vld [vmem:[%s871_s1 + $0x78] sm:$0xff]   ;;  %v754_v2 = vmov 0.0   ;;  %v710_v3 = vld [vmem:[%s871_s1 + $0x70] sm:$0xff]   ;;  %v712_v5 = vld [vmem:[%s871_s1 + $0x68] sm:$0xff]   ;;  %vm755_vm0 = vmmov 0   ;;  %s879_s20 = smov (!%p206_p4, %s610_s20), 3 }
   0xd   : > { %v709_v1 = vld [vmem:[%s871_s1 + $0x38] sm:$0xff]   ;;  %673 = vmatprep.subr.bf16.mxu1 %v754_v2  ;;  %648 = vmatprep.subr.bf16.mxu0 %v708_v0  ;;  %v711_v4 = vld [vmem:[%s871_s1 + $0x30] sm:$0xff]   ;;  %v713_v6 = vld [vmem:[%s871_s1 + $0x28] sm:$0xff]   ;;  %s681_s8 = smul.u32 12, %s879_s20  ;;  %vm399_vm1 = vcmask 261120   ;;  %s613_s9 = sshll.u32 %s879_s20, 2 }
   0xe   : > { %649 = vmatpush3.bf16.msra.mxu0 %v709_v1  ;;  %677 = vmatprep.mubr.msk.bf16.mxu1 %vm755_vm0, %v754_v2  ;;  %v714_v7 = vld [vmem:[%s871_s1 + $0x60] sm:$0xff]   ;;  %v716_v9 = vld [vmem:[%s871_s1 + $0x58] sm:$0xff]   ;;  %v722_v10 = vld [vmem:[%s871_s1 + $0x88] sm:$0xff]   ;;  %s226_s12 = scalar_lea.vmem %s873_s3, %s613_s9 }
   0xf   : > { %650 = vmatprep.subr.bf16.mxu0 %v710_v3  ;;  %v715_v8 = vld [vmem:[%s871_s1 + $0x20] sm:$0xff]   ;;  %v717_v11 = vld [vmem:[%s871_s1 + $0x18] sm:$0xff]   ;;  %v718_v12 = vld [vmem:[%s871_s1 + $0x50] sm:$0xff]   ;;  %674 = vmatpush3.bf16.msra.mxu1 %v722_v10  ;;  %s210_s21 = scalar_lea.vmem %s870_s0, %s681_s8 }
  0x10   : > { %675 = vmatprep.subr.bf16.mxu1 %v754_v2  ;;  %v725_v13 = vld [vmem:[%s871_s1 + $0x80] sm:$0xff]   ;;  %v719_v14 = vld [vmem:[%s871_s1 + $0x10] sm:$0xff]   ;;  %v720_v16 = vld [vmem:[%s871_s1 + $0x48] sm:$0xff]  }
  0x11   : > { %v728_v15 = vld [vmem:[%s210_s21 + $0x4] ss:$12 sps:$4 sm:$0xff]   ;;  %v729_v17 = vld [vmem:[%s210_s21 + $0x8] ss:$12 sps:$4 sm:$0xff]   ;;  %v726_v21 = vld [vmem:[%s210_s21] ss:$12 sps:$4 sm:$0xff]  }
  0x12   : > { %651 = vmatpush3.bf16.msra.mxu0 %v711_v4  ;;  %435 = vmatprep.mubr.bf16.mxu0 %v728_v15  ;;  %v721_v18 = vld [vmem:[%s871_s1 + $0x8] sm:$0xff]   ;;  %v723_v19 = vld [vmem:[%s871_s1 + $0x40] sm:$0xff]  }
  0x13   : > { %652 = vmatprep.subr.bf16.mxu0 %v712_v5  ;;  %676 = vmatpush3.bf16.msra.mxu1 %v725_v13  ;;  %v724_v20 = vld [vmem:[%s871_s1] sm:$0xff]  }
  0x14   : > { %v614_v27 = vld [vmem:[%s872_s2] ss:$0 sm:$0xff] }
  0x16   : > { %653 = vmatpush3.bf16.msra.mxu0 %v713_v6  ;;  %678 = vmatmul.mubr.msk.bf16.vlgmr.msra.gmra.mxu1 %vm399_vm1, %v729_v17 }
  0x17   : > { %654 = vmatprep.subr.bf16.mxu0 %v714_v7 }
  0x1a   : > { %655 = vmatpush3.bf16.msra.mxu0 %v715_v8 }
  0x1b   : > { %656 = vmatprep.subr.bf16.mxu0 %v716_v9 }
  0x1e   : > { %657 = vmatpush3.bf16.msra.mxu0 %v717_v11 }
  0x1f   : > { %658 = vmatprep.subr.bf16.mxu0 %v718_v12 }
  0x22   : > { %659 = vmatpush3.bf16.msra.mxu0 %v719_v14 }
  0x23   : > { %660 = vmatprep.subr.bf16.mxu0 %v720_v16 }
  0x26   : > { %661 = vmatpush3.bf16.msra.mxu0 %v721_v18 }
  0x27   : > { %662 = vmatprep.subr.bf16.mxu0 %v723_v19 }
  0x2a   : > { %663 = vmatpush3.bf16.msra.mxu0 %v724_v20 }
  0x2d   : > { %436 = vmatmul.mubr.bf16.vlgmr.msra.gmra.mxu0 %v726_v21 }
  0xd6   : > { %v478_v22 = vpop.f32.mrf.mxu1 }
  0xd8   : > { %v679_v23 = vpop.f32.mrf.mxu1 }
  0xda   : > { %v481_v24 = vpop.f32.mrf.mxu1 }
  0xdc   : > { %v680_v25 = vpop.f32.mrf.mxu1 }
  0xed   : > { %v664_v26 = vpop.f32.mrf.mxu0 }
  0xef   : > { %v665_v28 = vpop.f32.mrf.mxu0 }
  0xf0   : > { %v666_v29 = vadd.f32 %v665_v28, %v664_v26 }
  0xf1   : > { %v667_v30 = vpop.f32.mrf.mxu0 }
  0xf2   : > { %v438_v31 = vadd.f32 %v666_v29, %v614_v27 }
  0xf3   : > { %v668_v32 = vpop.f32.mrf.mxu0 }
  0xf4   : > { %v479_v33 = vadd.f32 %v478_v22, %v438_v31  ;;  %v669_v34 = vadd.f32 %v668_v32, %v667_v30 }
  0xf6   : > { %v441_v35 = vadd.f32 %v669_v34, %v614_v27  ;;  %v487_v36 = vmul.f32 0.01, %v479_v33  ;;  %vm485_vm2 = vcmp.gt.f32.partialorder %v479_v33, 0.0 }
  0xf8   : > { %v482_v37 = vadd.f32 %v481_v24, %v441_v35  ;;  %v489_v39 = vsel %vm485_vm2, %v479_v33, %v487_v36 }
  0xfa   : > { %vm486_vm3 = vcmp.gt.f32.partialorder %v482_v37, 0.0  ;;  %v488_v38 = vmul.f32 0.01, %v482_v37 }
  0xfc   : > { %v490_v40 = vsel %vm486_vm3, %v482_v37, %v488_v38 }
  0xfd   : > { %v646_v41 = vpack.c.bf16 %v490_v40, %v489_v39 }
  0xff   : > { %647 = vst [vmem:[%s226_s12] sm:$0xff] %v646_v41  }
 0x100 PF: > { %s13_s14 = sadd.s32 1, %s752_s14   ;;  %s874_s12 = smov %s748_s13 }
 0x101   : > { %p10_p5 = scmp.ge.s32.totalorder %s13_s14, 4   ;;  %s875_s13 = smov %s877_s15 }
 0x103   :  { %12 = sbr.rel (!%p10_p5) target bundleno = 2 (0x2), region = 68 }

// kernel: _unoranic_core.11
= control target key start
LH: loop header
LB: loop body
LE: loop exit
PB: predicated region body
PF: predicated region fallthrough
CT: control target
= control target key end

     0   :  { %v646_v33 = vmov 0.0   ;;  %vm647_vm0 = vmmov 0   ;;  %vm341_vm1 = vcmask 523264   ;;  %s797_s1 = inlined_call_operand.vmem [shape: bf16[576,128], index: 1, kind: input, shape index: {}]   ;;  %s798_s0 = inlined_call_operand.vmem [shape: bf16[16,576], index: 0, kind: input, shape index: {}]   ;;  %s799_s2 = inlined_call_operand.vmem [shape: f32[1,128], index: 2, kind: input, shape index: {}]   ;;  %s800_s3 = inlined_call_operand.vmem [shape: bf16[16,128], index: 3, kind: output, shape index: {}]  }
   0x1   :  { %v603_v0 = vld [vmem:[%s797_s1 + $0x78] sm:$0xff]   ;;  %v607_v4 = vld [vmem:[%s797_s1 + $0x70] sm:$0xff]   ;;  %v611_v8 = vld [vmem:[%s797_s1 + $0x68] sm:$0xff]  }
   0x2   :  { %v604_v1 = vld [vmem:[%s797_s1 + $0x38] sm:$0xff]   ;;  %540 = vmatprep.subr.bf16.mxu0 %v603_v0  ;;  %v608_v5 = vld [vmem:[%s797_s1 + $0x30] sm:$0xff]   ;;  %v612_v9 = vld [vmem:[%s797_s1 + $0x28] sm:$0xff]  }
   0x3   :  { %v605_v2 = vld [vmem:[%s797_s1 + $0xf8] sm:$0xff]   ;;  %541 = vmatpush3.bf16.msra.mxu0 %v604_v1  ;;  %v609_v6 = vld [vmem:[%s797_s1 + $0xf0] sm:$0xff]   ;;  %v613_v10 = vld [vmem:[%s797_s1 + $0xe8] sm:$0xff]  }
   0x4   :  { %v606_v3 = vld [vmem:[%s797_s1 + $0xb8] sm:$0xff]   ;;  %562 = vmatprep.subr.bf16.mxu1 %v605_v2  ;;  %542 = vmatprep.subr.bf16.mxu0 %v607_v4  ;;  %v610_v7 = vld [vmem:[%s797_s1 + $0xb0] sm:$0xff]   ;;  %v614_v11 = vld [vmem:[%s797_s1 + $0xa8] sm:$0xff]  }
   0x5   :  { %563 = vmatpush3.bf16.msra.mxu1 %v606_v3  ;;  %v615_v12 = vld [vmem:[%s797_s1 + $0x60] sm:$0xff]   ;;  %v619_v16 = vld [vmem:[%s797_s1 + $0x58] sm:$0xff]   ;;  %v623_v20 = vld [vmem:[%s797_s1 + $0x50] sm:$0xff]  }
   0x6   :  { %564 = vmatprep.subr.bf16.mxu1 %v609_v6  ;;  %v616_v13 = vld [vmem:[%s797_s1 + $0x20] sm:$0xff]   ;;  %v620_v17 = vld [vmem:[%s797_s1 + $0x18] sm:$0xff]   ;;  %v624_v21 = vld [vmem:[%s797_s1 + $0x10] sm:$0xff]  }
   0x7   :  { %543 = vmatpush3.bf16.msra.mxu0 %v608_v5  ;;  %v617_v14 = vld [vmem:[%s797_s1 + $0xe0] sm:$0xff]   ;;  %v621_v18 = vld [vmem:[%s797_s1 + $0xd8] sm:$0xff]   ;;  %v625_v22 = vld [vmem:[%s797_s1 + $0xd0] sm:$0xff]  }
   0x8   :  { %544 = vmatprep.subr.bf16.mxu0 %v611_v8  ;;  %v618_v15 = vld [vmem:[%s797_s1 + $0xa0] sm:$0xff]   ;;  %v622_v19 = vld [vmem:[%s797_s1 + $0x98] sm:$0xff]   ;;  %v626_v23 = vld [vmem:[%s797_s1 + $0x90] sm:$0xff]  }
   0x9   :  { %565 = vmatpush3.bf16.msra.mxu1 %v610_v7  ;;  %v627_v24 = vld [vmem:[%s797_s1 + $0x48] sm:$0xff]   ;;  %v631_v28 = vld [vmem:[%s797_s1 + $0x40] sm:$0xff]   ;;  %v641_v37 = vld [vmem:[%s797_s1 + $0x118] sm:$0xff]  }
   0xa   :  { %566 = vmatprep.subr.bf16.mxu1 %v613_v10  ;;  %v628_v25 = vld [vmem:[%s797_s1 + $0x8] sm:$0xff]   ;;  %v632_v29 = vld [vmem:[%s797_s1] sm:$0xff]   ;;  %v642_v38 = vld [vmem:[%s797_s1 + $0x110] sm:$0xff]  }
   0xb   :  { %545 = vmatpush3.bf16.msra.mxu0 %v612_v9  ;;  %v629_v26 = vld [vmem:[%s797_s1 + $0xc8] sm:$0xff]   ;;  %v633_v30 = vld [vmem:[%s797_s1 + $0xc0] sm:$0xff]  }
   0xc   :  { %546 = vmatprep.subr.bf16.mxu0 %v615_v12  ;;  %v630_v27 = vld [vmem:[%s797_s1 + $0x88] sm:$0xff]   ;;  %v634_v31 = vld [vmem:[%s798_s0] ss:$20 sps:$4 sm:$0xff]   ;;  %v636_v32 = vld [vmem:[%s798_s0 + $0x4] ss:$20 sps:$4 sm:$0xff]  }
   0xd   :  { %567 = vmatpush3.bf16.msra.mxu1 %v614_v11  ;;  %v637_v34 = vld [vmem:[%s797_s1 + $0x80] sm:$0xff]   ;;  %377 = vmatprep.mubr.bf16.mxu0 %v636_v32  ;;  %v638_v35 = vld [vmem:[%s798_s0 + $0x8] ss:$20 sps:$4 sm:$0xff]  }
   0xe   :  { %568 = vmatprep.subr.bf16.mxu1 %v617_v14  ;;  %v640_v36 = vld [vmem:[%s798_s0 + $0xc] ss:$20 sps:$4 sm:$0xff]   ;;  %v645_v41 = vld [vmem:[%s798_s0 + $0x10] ss:$20 sps:$4 sm:$0xff]  }
   0xf   :  { %547 = vmatpush3.bf16.msra.mxu0 %v616_v13  ;;  %418 = vmatprep.mubr.bf16.mxu1 %v640_v36  ;;  %v643_v39 = vld [vmem:[%s797_s1 + $0x108] sm:$0xff]   ;;  %v644_v40 = vld [vmem:[%s797_s1 + $0x100] sm:$0xff]  }
  0x10   :  { %548 = vmatprep.subr.bf16.mxu0 %v619_v16  ;;  %v488_v48 = vld [vmem:[%s799_s2] ss:$0 sm:$0xff] }
  0x11   :  { %569 = vmatpush3.bf16.msra.mxu1 %v618_v15 }
  0x12   :  { %570 = vmatprep.subr.bf16.mxu1 %v621_v18 }
  0x13   :  { %549 = vmatpush3.bf16.msra.mxu0 %v620_v17 }
  0x14   :  { %550 = vmatprep.subr.bf16.mxu0 %v623_v20 }
  0x15   :  { %571 = vmatpush3.bf16.msra.mxu1 %v622_v19 }
  0x16   :  { %572 = vmatprep.subr.bf16.mxu1 %v625_v22 }
  0x17   :  { %551 = vmatpush3.bf16.msra.mxu0 %v624_v21 }
  0x18   :  { %552 = vmatprep.subr.bf16.mxu0 %v627_v24 }
  0x19   :  { %573 = vmatpush3.bf16.msra.mxu1 %v626_v23 }
  0x1a   :  { %574 = vmatprep.subr.bf16.mxu1 %v629_v26 }
  0x1b   :  { %553 = vmatpush3.bf16.msra.mxu0 %v628_v25 }
  0x1c   :  { %554 = vmatprep.subr.bf16.mxu0 %v631_v28 }
  0x1d   :  { %575 = vmatpush3.bf16.msra.mxu1 %v630_v27 }
  0x1e   :  { %576 = vmatprep.subr.bf16.mxu1 %v633_v30 }
  0x1f   :  { %555 = vmatpush3.bf16.msra.mxu0 %v632_v29 }
  0x20   :  { %589 = vmatprep.subr.bf16.mxu0 %v646_v33 }
  0x21   :  { %577 = vmatpush3.bf16.msra.mxu1 %v637_v34 }
  0x22   :  { %378 = vmatmul.mubr.bf16.vlgmr.msra.gmra.mxu0 %v634_v31 }
  0x23   :  { %597 = vmatprep.mubr.msk.bf16.mxu0 %vm647_vm0, %v646_v33  ;;  %590 = vmatpush3.bf16.msra.mxu0 %v641_v37 }
  0x24   :  { %419 = vmatmul.mubr.bf16.vlgmr.msra.gmra.mxu1 %v638_v35  ;;  %591 = vmatprep.subr.bf16.mxu0 %v646_v33 }
  0x27   :  { %592 = vmatpush3.bf16.msra.mxu0 %v642_v38 }
  0x28   :  { %593 = vmatprep.subr.bf16.mxu0 %v646_v33 }
  0x2b   :  { %594 = vmatpush3.bf16.msra.mxu0 %v643_v39 }
  0x2c   :  { %595 = vmatprep.subr.bf16.mxu0 %v646_v33 }
  0x2f   :  { %596 = vmatpush3.bf16.msra.mxu0 %v644_v40 }
  0x32   :  { %598 = vmatmul.mubr.msk.bf16.vlgmr.msra.gmra.mxu0 %vm341_vm1, %v645_v41 }
  0xe2   :  { %v556_v42 = vpop.f32.mrf.mxu0 }
  0xe4   :  { %v557_v43 = vpop.f32.mrf.mxu0  ;;  %v578_v44 = vpop.f32.mrf.mxu1 }
  0xe5   :  { %v558_v47 = vadd.f32 %v557_v43, %v556_v42 }
  0xe6   :  { %v559_v45 = vpop.f32.mrf.mxu0  ;;  %v579_v46 = vpop.f32.mrf.mxu1 }
  0xe7   :  { %v380_v51 = vadd.f32 %v558_v47, %v488_v48  ;;  %v580_v52 = vadd.f32 %v579_v46, %v578_v44 }
  0xe8   :  { %v560_v49 = vpop.f32.mrf.mxu0  ;;  %v581_v50 = vpop.f32.mrf.mxu1 }
  0xe9   :  { %v561_v53 = vadd.f32 %v560_v49, %v559_v45  ;;  %v421_v57 = vadd.f32 %v580_v52, %v380_v51 }
  0xea   :  { %v582_v54 = vpop.f32.mrf.mxu1 }
  0xeb   :  { %v383_v55 = vadd.f32 %v561_v53, %v488_v48  ;;  %v583_v56 = vadd.f32 %v582_v54, %v581_v50 }
  0xed   :  { %v424_v61 = vadd.f32 %v583_v56, %v383_v55 }
  0xf2   :  { %v461_v58 = vpop.f32.mrf.mxu0 }
  0xf3   :  { %v462_v59 = vadd.f32 %v461_v58, %v421_v57 }
  0xf4   :  { %v599_v60 = vpop.f32.mrf.mxu0 }
  0xf5   :  { %v470_v63 = vmul.f32 0.01, %v462_v59  ;;  %vm468_vm2 = vcmp.gt.f32.partialorder %v462_v59, 0.0 }
  0xf6   :  { %v464_v62 = vpop.f32.mrf.mxu0 }
  0xf7   :  { %v465_v0 = vadd.f32 %v464_v62, %v424_v61  ;;  %v472_v3 = vsel %vm468_vm2, %v462_v59, %v470_v63 }
  0xf8   :  { %v600_v1 = vpop.f32.mrf.mxu0 }
  0xf9   :  { %vm469_vm3 = vcmp.gt.f32.partialorder %v465_v0, 0.0  ;;  %v471_v2 = vmul.f32 0.01, %v465_v0 }
  0xfb   :  { %v473_v4 = vsel %vm469_vm3, %v465_v0, %v471_v2 }
  0xfc   :  { %v538_v5 = vpack.c.bf16 %v473_v4, %v472_v3 }
  0xfe   :  { %539 = vst [vmem:[%s800_s3] sm:$0xff] %v538_v5  }

// kernel: _unoranic_core.12
= control target key start
LH: loop header
LB: loop body
LE: loop exit
PB: predicated region body
PF: predicated region fallthrough
CT: control target
= control target key end

     0   :  { %s660_s1 = inlined_call_operand.vmem [shape: bf16[512,128], index: 1, kind: input, shape index: {}]   ;;  %s661_s0 = inlined_call_operand.vmem [shape: bf16[16,512], index: 0, kind: input, shape index: {}]   ;;  %s662_s2 = inlined_call_operand.vmem [shape: f32[1,128], index: 2, kind: input, shape index: {}]   ;;  %s663_s3 = inlined_call_operand.vmem [shape: bf16[16,128], index: 3, kind: output, shape index: {}]  }
   0x1   :  { %v488_v0 = vld [vmem:[%s660_s1 + $0x78] sm:$0xff]   ;;  %v492_v4 = vld [vmem:[%s660_s1 + $0x70] sm:$0xff]   ;;  %v496_v8 = vld [vmem:[%s660_s1 + $0x68] sm:$0xff]  }
   0x2   :  { %v489_v1 = vld [vmem:[%s660_s1 + $0xf8] sm:$0xff]   ;;  %444 = vmatprep.subr.bf16.mxu0 %v488_v0  ;;  %v493_v5 = vld [vmem:[%s660_s1 + $0xf0] sm:$0xff]   ;;  %v497_v9 = vld [vmem:[%s660_s1 + $0xe8] sm:$0xff]  }
   0x3   :  { %v490_v2 = vld [vmem:[%s660_s1 + $0x38] sm:$0xff]   ;;  %466 = vmatprep.subr.bf16.mxu1 %v489_v1  ;;  %v494_v6 = vld [vmem:[%s660_s1 + $0x30] sm:$0xff]   ;;  %v498_v10 = vld [vmem:[%s660_s1 + $0x28] sm:$0xff]  }
   0x4   :  { %v491_v3 = vld [vmem:[%s660_s1 + $0xb8] sm:$0xff]   ;;  %445 = vmatpush3.bf16.msra.mxu0 %v490_v2  ;;  %v495_v7 = vld [vmem:[%s660_s1 + $0xb0] sm:$0xff]   ;;  %v499_v11 = vld [vmem:[%s660_s1 + $0xa8] sm:$0xff]  }
   0x5   :  { %467 = vmatpush3.bf16.msra.mxu1 %v491_v3  ;;  %446 = vmatprep.subr.bf16.mxu0 %v492_v4  ;;  %v500_v12 = vld [vmem:[%s660_s1 + $0x60] sm:$0xff]   ;;  %v504_v16 = vld [vmem:[%s660_s1 + $0x58] sm:$0xff]   ;;  %v508_v20 = vld [vmem:[%s660_s1 + $0x50] sm:$0xff]  }
   0x6   :  { %468 = vmatprep.subr.bf16.mxu1 %v493_v5  ;;  %v501_v13 = vld [vmem:[%s660_s1 + $0xe0] sm:$0xff]   ;;  %v505_v17 = vld [vmem:[%s660_s1 + $0xd8] sm:$0xff]   ;;  %v509_v21 = vld [vmem:[%s660_s1 + $0xd0] sm:$0xff]  }
   0x7   :  { %v502_v14 = vld [vmem:[%s660_s1 + $0x20] sm:$0xff]   ;;  %v506_v18 = vld [vmem:[%s660_s1 + $0x18] sm:$0xff]   ;;  %v510_v22 = vld [vmem:[%s660_s1 + $0x10] sm:$0xff]  }
   0x8   :  { %447 = vmatpush3.bf16.msra.mxu0 %v494_v6  ;;  %v503_v15 = vld [vmem:[%s660_s1 + $0xa0] sm:$0xff]   ;;  %v507_v19 = vld [vmem:[%s660_s1 + $0x98] sm:$0xff]   ;;  %v511_v23 = vld [vmem:[%s660_s1 + $0x90] sm:$0xff]  }
   0x9   :  { %469 = vmatpush3.bf16.msra.mxu1 %v495_v7  ;;  %448 = vmatprep.subr.bf16.mxu0 %v496_v8  ;;  %v512_v24 = vld [vmem:[%s660_s1 + $0x48] sm:$0xff]   ;;  %v516_v28 = vld [vmem:[%s660_s1 + $0x40] sm:$0xff]  }
   0xa   :  { %470 = vmatprep.subr.bf16.mxu1 %v497_v9  ;;  %v513_v25 = vld [vmem:[%s660_s1 + $0xc8] sm:$0xff]   ;;  %v517_v29 = vld [vmem:[%s660_s1 + $0xc0] sm:$0xff]  }
   0xb   :  { %v514_v26 = vld [vmem:[%s660_s1 + $0x8] sm:$0xff]   ;;  %v518_v30 = vld [vmem:[%s660_s1] sm:$0xff]  }
   0xc   :  { %449 = vmatpush3.bf16.msra.mxu0 %v498_v10  ;;  %v515_v27 = vld [vmem:[%s660_s1 + $0x88] sm:$0xff]   ;;  %v519_v31 = vld [vmem:[%s660_s1 + $0x80] sm:$0xff]  }
   0xd   :  { %471 = vmatpush3.bf16.msra.mxu1 %v499_v11  ;;  %450 = vmatprep.subr.bf16.mxu0 %v500_v12  ;;  %v520_v32 = vld [vmem:[%s661_s0] ss:$16 sps:$4 sm:$0xff]   ;;  %v522_v33 = vld [vmem:[%s661_s0 + $0x4] ss:$16 sps:$4 sm:$0xff]   ;;  %v523_v34 = vld [vmem:[%s661_s0 + $0x8] ss:$16 sps:$4 sm:$0xff]  }
   0xe   :  { %472 = vmatprep.subr.bf16.mxu1 %v501_v13  ;;  %v525_v35 = vld [vmem:[%s661_s0 + $0xc] ss:$16 sps:$4 sm:$0xff]   ;;  %334 = vmatprep.mubr.bf16.mxu0 %v522_v33  ;;  %v398_v41 = vld [vmem:[%s662_s2] ss:$0 sm:$0xff] }
   0xf   :  { %375 = vmatprep.mubr.bf16.mxu1 %v525_v35 }
  0x10   :  { %451 = vmatpush3.bf16.msra.mxu0 %v502_v14 }
  0x11   :  { %473 = vmatpush3.bf16.msra.mxu1 %v503_v15  ;;  %452 = vmatprep.subr.bf16.mxu0 %v504_v16 }
  0x12   :  { %474 = vmatprep.subr.bf16.mxu1 %v505_v17 }
  0x14   :  { %453 = vmatpush3.bf16.msra.mxu0 %v506_v18 }
  0x15   :  { %475 = vmatpush3.bf16.msra.mxu1 %v507_v19  ;;  %454 = vmatprep.subr.bf16.mxu0 %v508_v20 }
  0x16   :  { %476 = vmatprep.subr.bf16.mxu1 %v509_v21 }
  0x18   :  { %455 = vmatpush3.bf16.msra.mxu0 %v510_v22 }
  0x19   :  { %477 = vmatpush3.bf16.msra.mxu1 %v511_v23  ;;  %456 = vmatprep.subr.bf16.mxu0 %v512_v24 }
  0x1a   :  { %478 = vmatprep.subr.bf16.mxu1 %v513_v25 }
  0x1c   :  { %457 = vmatpush3.bf16.msra.mxu0 %v514_v26 }
  0x1d   :  { %479 = vmatpush3.bf16.msra.mxu1 %v515_v27  ;;  %458 = vmatprep.subr.bf16.mxu0 %v516_v28 }
  0x1e   :  { %480 = vmatprep.subr.bf16.mxu1 %v517_v29 }
  0x20   :  { %459 = vmatpush3.bf16.msra.mxu0 %v518_v30 }
  0x21   :  { %481 = vmatpush3.bf16.msra.mxu1 %v519_v31 }
  0x23   :  { %335 = vmatmul.mubr.bf16.vlgmr.msra.gmra.mxu0 %v520_v32 }
  0x24   :  { %376 = vmatmul.mubr.bf16.vlgmr.msra.gmra.mxu1 %v523_v34 }
  0xe3   :  { %v460_v36 = vpop.f32.mrf.mxu0 }
  0xe4   :  { %v482_v37 = vpop.f32.mrf.mxu1 }
  0xe5   :  { %v461_v38 = vpop.f32.mrf.mxu0 }
  0xe6   :  { %v462_v39 = vadd.f32 %v461_v38, %v460_v36  ;;  %v483_v40 = vpop.f32.mrf.mxu1 }
  0xe7   :  { %v463_v42 = vpop.f32.mrf.mxu0  ;;  %v484_v48 = vadd.f32 %v483_v40, %v482_v37 }
  0xe8   :  { %v485_v43 = vpop.f32.mrf.mxu1  ;;  %v337_v45 = vadd.f32 %v462_v39, %v398_v41 }
  0xe9   :  { %v464_v44 = vpop.f32.mrf.mxu0 }
  0xea   :  { %v465_v46 = vadd.f32 %v464_v44, %v463_v42  ;;  %v486_v47 = vpop.f32.mrf.mxu1  ;;  %v378_v51 = vadd.f32 %v484_v48, %v337_v45 }
  0xeb   :  { %v487_v50 = vadd.f32 %v486_v47, %v485_v43 }
  0xec   :  { %v340_v49 = vadd.f32 %v465_v46, %v398_v41 }
  0xee   :  { %v381_v52 = vadd.f32 %v487_v50, %v340_v49 }
  0xf0   :  { %v442_v53 = vpack.c.bf16 %v381_v52, %v378_v51 }
  0xf2   :  { %443 = vst [vmem:[%s663_s3] sm:$0xff] %v442_v53  }

// kernel: _unoranic_core.13
= control target key start
LH: loop header
LB: loop body
LE: loop exit
PB: predicated region body
PF: predicated region fallthrough
CT: control target
= control target key end

     0   :  { %s718_s12 = smov 0   ;;  %s720_s13 = smov 0   ;;  %s801_s0 = inlined_call_operand.vmem [shape: bf16[16,64], index: 0, kind: input, shape index: {}]   ;;  %s802_s1 = inlined_call_operand.vmem [shape: bf16[64,512], index: 1, kind: input, shape index: {}]   ;;  %s803_s2 = inlined_call_operand.vmem [shape: f32[1,512], index: 2, kind: input, shape index: {}]   ;;  %s804_s3 = inlined_call_operand.vmem [shape: bf16[16,512], index: 3, kind: output, shape index: {}]  }
   0x1   :  { %s722_s14 = smov 0   ;;  %s724_s15 = smov 0  }
   0x2   :  { %s726_s16 = smov 0  }
   0x3 LB: > { %s22_s17 = sadd.s32 1, %s691_s15  ;;  %s570_s18 = sadd.s32 4294967295, %s695_s16   ;;  %s695_s16 = sphi %s726_s16, %s13_s16   ;;  %s691_s15 = sphi %s724_s15, %s809_s15   ;;  %s687_s14 = sphi %s722_s14, %s808_s14   ;;  %s683_s13 = sphi %s720_s13, %s807_s13   ;;  %s679_s12 = sphi %s718_s12, %s806_s12  }
   0x4   : > { %p23_p0 = scmp.ge.s32.totalorder %s22_s17, 2  ;;  %p65_p1 = scmp.ne.s32.totalorder %s683_s13, %s679_s12 }
   0x5   : > { %p66_p2 = scmp.eq.s32.totalorder %s695_s16, 0  ;;  %p123_p4 = scmp.eq.s32.totalorder %s570_s18, 1 }
   0x6   : > { %s811_s17 = smov (%p23_p0, %s22_s17), 0  ;;  %s58_s20 = sadd.s32 1, %s683_s13 }
   0x7   : > { %p67_p3 = por %p66_p2, %p65_p1  ;;  %s55_s19 = ssub.s32 %s691_s15, %s811_s17 }
   0x8   : > { %p56_p5 = scmp.eq.s32.totalorder %s55_s19, 0  ;;  %p753_p6 = por %p123_p4, %p65_p1 }
   0x9   : > { %p574_p7 = scmp.ge.s32.totalorder %s695_s16, 2 }
   0xa   : > { %s758_s22 = scalar_select %p56_p5, %s683_s13, %s58_s20  }
   0xb   : > { %154 = sbr.rel (%p574_p7) target bundleno = 24 (0x18), region = 20 }
  0x10   : > { %157 = sbr.rel (!%p67_p3) target bundleno = 24 (0x18), region = 24  ;;  %s159_s23 = sand.u32 (%p67_p3), 1, %s683_s13  }
  0x11   : > { %s599_s24 = sshll.u32 (%p67_p3), %s691_s15, 3  ;;  %s575_s25 = sshll.u32 (%p67_p3), %s159_s23, 6 }
  0x12   : > { %s164_s28 = scalar_lea.vmem (%p67_p3), %s802_s1, %s599_s24  ;;  %s161_s29 = scalar_lea.vmem (%p67_p3), [#allocation2], %s575_s25 }
  0x13   : > { %v207_v0 = vld [vmem:[%s164_s28] sm:$0xff] (%p67_p3)  ;;  %v209_v1 = vld [vmem:[%s164_s28 + $0x10] sm:$0xff] (%p67_p3) }
  0x14   : > { %v211_v2 = vld [vmem:[%s164_s28 + $0x20] sm:$0xff] (%p67_p3)  ;;  %208 = vst [vmem:[%s161_s29] sm:$0xff] (%p67_p3), %v207_v0  ;;  %210 = vst [vmem:[%s161_s29 + $0x8] sm:$0xff] (%p67_p3), %v209_v1  ;;  %v213_v3 = vld [vmem:[%s164_s28 + $0x30] sm:$0xff] (%p67_p3) }
  0x15   : > { %212 = vst [vmem:[%s161_s29 + $0x10] sm:$0xff] %v211_v2  ;;  %v215_v4 = vld [vmem:[%s164_s28 + $0x40] sm:$0xff]  ;;  %v217_v5 = vld [vmem:[%s164_s28 + $0x50] sm:$0xff]  ;;  %214 = vst [vmem:[%s161_s29 + $0x18] sm:$0xff] %v213_v3 }
  0x16   : > { %216 = vst [vmem:[%s161_s29 + $0x20] sm:$0xff] %v215_v4  ;;  %218 = vst [vmem:[%s161_s29 + $0x28] sm:$0xff] %v217_v5  ;;  %v219_v6 = vld [vmem:[%s164_s28 + $0x60] sm:$0xff]  ;;  %v221_v7 = vld [vmem:[%s164_s28 + $0x70] sm:$0xff] }
  0x17   : > { %220 = vst [vmem:[%s161_s29 + $0x30] sm:$0xff] %v219_v6  ;;  %222 = vst [vmem:[%s161_s29 + $0x38] sm:$0xff] %v221_v7 }
  0x18 PF: > { %p578_p8 = scmp.ge.s32.totalorder %s695_s16, 1  ;;  %p235_p9 = scmp.lt.s32.totalorder %s695_s16, 3 }
  0x1a   : > { %p236_p10 = pnand %p578_p8, %p235_p9 }
  0x1b   : > { %s242_s30 = sand.u32 (!%p236_p10), 1, %s679_s12   ;;  %s581_s8 = sshll.u32 (!%p236_p10), %s687_s14, 1 }
  0x1c   : > { %239 = sbr.rel (%p236_p10) target bundleno = 265 (0x109), region = 66  ;;  %s579_s4 = sshll.u32 (!%p236_p10), %s242_s30, 6 }
  0x1d   : > { %s244_s5 = scalar_lea.vmem (!%p236_p10), [#allocation2], %s579_s4  ;;  %p281_p11 = scmp.lt.s32.totalorder (!%p236_p10), %s581_s8, 3 }
  0x1e   : > { %s580_s18 = sshll.u32 (!%p236_p10), %s242_s30, 4 }
  0x1f   : > { %s272_s19 = scalar_lea.vmem (!%p236_p10), [#allocation3], %s580_s18 }
  0x21   : > { %v697_v8 = vmov 0   ;;  %v644_v9 = vld [vmem:[%s244_s5 + $0x34] ss:$8 sps:$4 sm:$0xff]   ;;  %v646_v10 = vld [vmem:[%s244_s5 + $0x30] ss:$8 sps:$4 sm:$0xff]   ;;  %v656_v17 = vld [vmem:[%s801_s0] sm:$0xff]   ;;  %v300_v18 = vlaneseq }
  0x22   : > { %391 = vmatprep.mubr.bf16.mxu0 %v697_v8  ;;  %367 = vmatprep.subr.bf16.mxu0 %v644_v9  ;;  %v647_v11 = vld [vmem:[%s244_s5 + $0x24] ss:$8 sps:$4 sm:$0xff]   ;;  %v649_v12 = vld [vmem:[%s244_s5 + $0x20] ss:$8 sps:$4 sm:$0xff]   ;;  %v650_v13 = vld [vmem:[%s244_s5 + $0x14] ss:$8 sps:$4 sm:$0xff]  }
  0x23   : > { %368 = vmatpush1.bf16.msra.mxu0 %v646_v10  ;;  %v652_v14 = vld [vmem:[%s244_s5 + $0x10] ss:$8 sps:$4 sm:$0xff]   ;;  %v653_v15 = vld [vmem:[%s244_s5 + $0x4] ss:$8 sps:$4 sm:$0xff]   ;;  %v655_v16 = vld [vmem:[%s244_s5] ss:$8 sps:$4 sm:$0xff]  }
  0x24   : > { %369 = vmatprep.subr.bf16.mxu0 %v647_v11  ;;  %vm355_vm0 = vcmask 523264   ;;  %s813_s8 = smov (!%p281_p11, %s581_s8), 3  ;;  %v301_v19 = vshrl.u32 %v300_v18, 7  ;;  %s602_s12 = sshll.u32 (%p753_p6), %s687_s14, 3 }
  0x25   : > { %s283_s11 = scalar_lea.vmem %s803_s2, %s813_s8  ;;  %s440_s24 = scalar_lea.vmem (%p753_p6), %s804_s3, %s602_s12 }
  0x26   : > { %v302_v20 = vsub.s32 0, %v301_v19  ;;  %v298_v21 = vld [vmem:[%s283_s11] sm:$0x3]  ;;  %v306_v22 = vsub.s32 1, %v301_v19 }
  0x27   : > { %370 = vmatpush1.bf16.msra.mxu0 %v649_v12 }
  0x28   : > { %371 = vmatprep.subr.bf16.mxu0 %v650_v13  ;;  %v303_v23 = vrot.slane %v298_v21, %v302_v20  ;;  %v307_v24 = vrot.slane %v298_v21, %v306_v22 }
  0x2b   : > { %372 = vmatpush1.bf16.msra.mxu0 %v652_v14 }
  0x2c   : > { %373 = vmatprep.subr.bf16.mxu0 %v653_v15 }
  0x2f   : > { %374 = vmatpush1.bf16.msra.mxu0 %v655_v16 }
  0x32   : > { %591 = vmatmul.mubr.msk.bf16.vlgmr.msra.gmra.mxu0 %vm355_vm0, %v656_v17 }
  0xf2   : > { %v393_v25 = vpop.f32.mrf.mxu0 }
  0xf3   : > { %v394_v26 = vadd.f32 %v393_v25, %v303_v23 }
  0xf4   : > { %v395_v27 = vpop.f32.mrf.mxu0 }
  0xf5   : > { %v406_v28 = vmul.f32 0.01, %v394_v26  ;;  %v396_v29 = vadd.f32 %v395_v27, %v307_v24  ;;  %vm402_vm1 = vcmp.gt.f32.partialorder %v394_v26, 0.0 }
  0xf6   : > { %v397_v30 = vpop.f32.mrf.mxu0 }
  0xf7   : > { %vm403_vm2 = vcmp.gt.f32.partialorder %v396_v29, 0.0  ;;  %v407_v31 = vmul.f32 0.01, %v396_v29  ;;  %v398_v32 = vadd.f32 %v397_v30, %v303_v23  ;;  %v410_v34 = vsel %vm402_vm1, %v394_v26, %v406_v28 }
  0xf8   : > { %v399_v33 = vpop.f32.mrf.mxu0 }
  0xf9   : > { %v411_v35 = vsel %vm403_vm2, %v396_v29, %v407_v31  ;;  %v408_v36 = vmul.f32 0.01, %v398_v32  ;;  %v400_v37 = vadd.f32 %v399_v33, %v307_v24  ;;  %vm404_vm3 = vcmp.gt.f32.partialorder %v398_v32, 0.0 }
  0xfa   : > { %v600_v38 = vpack.c.bf16 %v411_v35, %v410_v34 }
  0xfb   : > { %vm405_vm4 = vcmp.gt.f32.partialorder %v400_v37, 0.0  ;;  %v409_v39 = vmul.f32 0.01, %v400_v37  ;;  %v412_v40 = vsel %vm404_vm3, %v398_v32, %v408_v36 }
  0xfc   : > { %426 = vst [vmem:[%s272_s19] sm:$0xff] %v600_v38  ;;  %434 = sbr.rel (!%p753_p6) target bundleno = 265 (0x109), region = 74 }
  0xfd   : > { %v413_v41 = vsel %vm405_vm4, %v400_v37, %v409_v39 }
  0xfe   : > { %v601_v42 = vpack.c.bf16 %v413_v41, %v412_v40 }
 0x100   : > { %427 = vst [vmem:[%s272_s19 + $0x8] sm:$0xff] %v601_v42 }
 0x103   : > { %v471_v43 = vld [vmem:[%s272_s19] sm:$0xff] }
 0x104   : > { %472 = vst [vmem:[%s440_s24] sm:$0xff] %v471_v43 }
 0x107   : > { %v473_v44 = vld [vmem:[%s272_s19 + $0x8] sm:$0xff] }
 0x108   : > { %474 = vst [vmem:[%s440_s24 + $0x10] sm:$0xff] %v473_v44 }
 0x109 PF: > { %s13_s16 = sadd.s32 1, %s695_s16   ;;  %s806_s12 = smov %s683_s13 }
 0x10a   : > { %p10_p12 = scmp.ge.s32.totalorder %s13_s16, 4   ;;  %s807_s13 = smov %s758_s22 }
 0x10b   : > { %s808_s14 = smov %s691_s15  ;;  %s809_s15 = smov %s811_s17 }
 0x10c   :  { %12 = sbr.rel (!%p10_p12) target bundleno = 3 (0x3), region = 149 }

// kernel: _unoranic_core.14
= control target key start
LH: loop header
LB: loop body
LE: loop exit
PB: predicated region body
PF: predicated region fallthrough
CT: control target
= control target key end

     0   :  { %s1570_s12 = smov 0   ;;  %s1572_s13 = smov 0   ;;  %s1840_s0 = inlined_call_operand.vmem [shape: bf16[32,1152], index: 0, kind: input, shape index: {}]   ;;  %s1841_s1 = inlined_call_operand.vmem [shape: bf16[1152,128], index: 1, kind: input, shape index: {}]   ;;  %s1842_s2 = inlined_call_operand.vmem [shape: f32[1,128], index: 2, kind: input, shape index: {}]   ;;  %s1843_s3 = inlined_call_operand.vmem [shape: bf16[32,128], index: 3, kind: output, shape index: {}]  }
   0x1   :  { %s1574_s14 = smov 0  }
   0x2 LB: > { %s25_s15 = sadd.s32 1, %s1542_s13  ;;  %p1197_p0 = scmp.ge.s32.totalorder %s1546_s14, 1  ;;  %s1546_s14 = sphi %s1574_s14, %s13_s14   ;;  %s1542_s13 = sphi %s1572_s13, %s1845_s13   ;;  %s1538_s12 = sphi %s1570_s12, %s1844_s12  }
   0x3   : > { %p27_p1 = scmp.ge.s32.totalorder %s25_s15, 2  ;;  %p170_p2 = scmp.lt.s32.totalorder %s1546_s14, 3 }
   0x5   : > { %s1847_s15 = smov (%p27_p1, %s25_s15), 0  ;;  %p171_p3 = pnand %p1197_p0, %p170_p2 }
   0x6   : > { %s1198_s21 = sshll.u32 (!%p171_p3), %s1538_s12, 1 }
   0x7   : > { %174 = sbr.rel (%p171_p3) target bundleno = 314 (0x13a), region = 32  ;;  %p206_p4 = scmp.lt.s32.totalorder (!%p171_p3), %s1198_s21, 3 }
   0xc   : > { %v1439_v0 = vld [vmem:[%s1841_s1 + $0x78] sm:$0xff]   ;;  %v1443_v4 = vld [vmem:[%s1841_s1 + $0x70] sm:$0xff]   ;;  %v1447_v8 = vld [vmem:[%s1841_s1 + $0x68] sm:$0xff]   ;;  %s1849_s21 = smov (!%p206_p4, %s1198_s21), 3  ;;  %vm1549_vm0 = vmmov 0  }
   0xd   : > { %v1440_v1 = vld [vmem:[%s1841_s1 + $0x38] sm:$0xff]   ;;  %1295 = vmatprep.subr.bf16.mxu0 %v1439_v0  ;;  %v1444_v5 = vld [vmem:[%s1841_s1 + $0x30] sm:$0xff]   ;;  %v1448_v9 = vld [vmem:[%s1841_s1 + $0x28] sm:$0xff]   ;;  %s1412_s20 = smul.u32 36, %s1849_s21 }
   0xe   : > { %v1441_v2 = vld [vmem:[%s1841_s1 + $0xf8] sm:$0xff]   ;;  %1296 = vmatpush3.bf16.msra.mxu0 %v1440_v1  ;;  %v1445_v6 = vld [vmem:[%s1841_s1 + $0xf0] sm:$0xff]   ;;  %v1449_v10 = vld [vmem:[%s1841_s1 + $0xe8] sm:$0xff]  }
   0xf   : > { %v1442_v3 = vld [vmem:[%s1841_s1 + $0xb8] sm:$0xff]   ;;  %1317 = vmatprep.subr.bf16.mxu1 %v1441_v2  ;;  %1297 = vmatprep.subr.bf16.mxu0 %v1443_v4  ;;  %v1446_v7 = vld [vmem:[%s1841_s1 + $0xb0] sm:$0xff]   ;;  %v1450_v11 = vld [vmem:[%s1841_s1 + $0xa8] sm:$0xff]   ;;  %s1684_s4 = scalar_lea.vmem %s1840_s0, %s1412_s20 }
  0x10   : > { %1318 = vmatpush3.bf16.msra.mxu1 %v1442_v3  ;;  %v1451_v12 = vld [vmem:[%s1841_s1 + $0x60] sm:$0xff]   ;;  %v1455_v16 = vld [vmem:[%s1841_s1 + $0x58] sm:$0xff]   ;;  %v1459_v20 = vld [vmem:[%s1841_s1 + $0x50] sm:$0xff]  }
  0x11   : > { %1319 = vmatprep.subr.bf16.mxu1 %v1445_v6  ;;  %v1452_v13 = vld [vmem:[%s1841_s1 + $0x20] sm:$0xff]   ;;  %v1456_v17 = vld [vmem:[%s1841_s1 + $0x18] sm:$0xff]   ;;  %v1460_v21 = vld [vmem:[%s1841_s1 + $0x10] sm:$0xff]   ;;  %v1548_v6 = vmov 0.0  }
  0x12   : > { %1298 = vmatpush3.bf16.msra.mxu0 %v1444_v5  ;;  %v1453_v14 = vld [vmem:[%s1841_s1 + $0xe0] sm:$0xff]   ;;  %v1457_v18 = vld [vmem:[%s1841_s1 + $0xd8] sm:$0xff]   ;;  %v1461_v22 = vld [vmem:[%s1841_s1 + $0xd0] sm:$0xff]  }
  0x13   : > { %1299 = vmatprep.subr.bf16.mxu0 %v1447_v8  ;;  %v1454_v15 = vld [vmem:[%s1841_s1 + $0xa0] sm:$0xff]   ;;  %v1458_v19 = vld [vmem:[%s1841_s1 + $0x98] sm:$0xff]   ;;  %v1462_v23 = vld [vmem:[%s1841_s1 + $0x90] sm:$0xff]  }
  0x14   : > { %1320 = vmatpush3.bf16.msra.mxu1 %v1446_v7  ;;  %v1463_v24 = vld [vmem:[%s1841_s1 + $0x48] sm:$0xff]   ;;  %v1467_v28 = vld [vmem:[%s1841_s1 + $0x40] sm:$0xff]   ;;  %v1474_v34 = vld [vmem:[%s1841_s1 + $0x178] sm:$0xff]  }
  0x15   : > { %1321 = vmatprep.subr.bf16.mxu1 %v1449_v10  ;;  %v1464_v25 = vld [vmem:[%s1841_s1 + $0x8] sm:$0xff]   ;;  %v1468_v29 = vld [vmem:[%s1841_s1] sm:$0xff]   ;;  %v1478_v37 = vld [vmem:[%s1841_s1 + $0x138] sm:$0xff]  }
  0x16   : > { %1300 = vmatpush3.bf16.msra.mxu0 %v1448_v9  ;;  %v1465_v26 = vld [vmem:[%s1841_s1 + $0xc8] sm:$0xff]   ;;  %v1469_v30 = vld [vmem:[%s1841_s1 + $0xc0] sm:$0xff]   ;;  %v1479_v38 = vld [vmem:[%s1841_s1 + $0x1f8] sm:$0xff]  }
  0x17   : > { %1301 = vmatprep.subr.bf16.mxu0 %v1451_v12  ;;  %v1466_v27 = vld [vmem:[%s1841_s1 + $0x88] sm:$0xff]   ;;  %v1470_v31 = vld [vmem:[%s1684_s4] ss:$36 sps:$4 sm:$0xff]   ;;  %v1480_v39 = vld [vmem:[%s1841_s1 + $0x1b8] sm:$0xff]  }
  0x18   : > { %1322 = vmatpush3.bf16.msra.mxu1 %v1450_v11  ;;  %v1472_v32 = vld [vmem:[%s1684_s4 + $0x4] ss:$36 sps:$4 sm:$0xff]   ;;  %v1477_v36 = vld [vmem:[%s1684_s4 + $0xc] ss:$36 sps:$4 sm:$0xff]   ;;  %v1493_v52 = vld [vmem:[%s1841_s1 + $0x158] sm:$0xff]  }
  0x19   : > { %1323 = vmatprep.subr.bf16.mxu1 %v1453_v14  ;;  %v1473_v33 = vld [vmem:[%s1841_s1 + $0x80] sm:$0xff]   ;;  %900 = vmatprep.mubr.bf16.mxu0 %v1472_v32  ;;  %v1475_v35 = vld [vmem:[%s1684_s4 + $0x8] ss:$36 sps:$4 sm:$0xff]   ;;  %v1481_v40 = vld [vmem:[%s1841_s1 + $0x170] sm:$0xff]  }
  0x1a   : > { %1302 = vmatpush3.bf16.msra.mxu0 %v1452_v13  ;;  %941 = vmatprep.mubr.bf16.mxu1 %v1477_v36  ;;  %v1482_v41 = vld [vmem:[%s1841_s1 + $0x130] sm:$0xff]   ;;  %v1485_v44 = vld [vmem:[%s1841_s1 + $0x168] sm:$0xff]   ;;  %v1489_v48 = vld [vmem:[%s1841_s1 + $0x160] sm:$0xff]  }
  0x1b   : > { %1303 = vmatprep.subr.bf16.mxu0 %v1455_v16  ;;  %v1483_v42 = vld [vmem:[%s1841_s1 + $0x1f0] sm:$0xff]   ;;  %v1486_v45 = vld [vmem:[%s1841_s1 + $0x128] sm:$0xff]   ;;  %v1490_v49 = vld [vmem:[%s1841_s1 + $0x120] sm:$0xff]  }
  0x1c   : > { %1324 = vmatpush3.bf16.msra.mxu1 %v1454_v15  ;;  %v1484_v43 = vld [vmem:[%s1841_s1 + $0x1b0] sm:$0xff]   ;;  %v1487_v46 = vld [vmem:[%s1841_s1 + $0x1e8] sm:$0xff]   ;;  %v1491_v50 = vld [vmem:[%s1841_s1 + $0x1e0] sm:$0xff]  }
  0x1d   : > { %1325 = vmatprep.subr.bf16.mxu1 %v1457_v18  ;;  %v1488_v47 = vld [vmem:[%s1841_s1 + $0x1a8] sm:$0xff]   ;;  %v1492_v51 = vld [vmem:[%s1841_s1 + $0x1a0] sm:$0xff]   ;;  %v1494_v53 = vld [vmem:[%s1841_s1 + $0x118] sm:$0xff]  }
  0x1e   : > { %1304 = vmatpush3.bf16.msra.mxu0 %v1456_v17  ;;  %v1495_v54 = vld [vmem:[%s1841_s1 + $0x1d8] sm:$0xff]   ;;  %v1497_v56 = vld [vmem:[%s1841_s1 + $0x150] sm:$0xff]   ;;  %v1501_v60 = vld [vmem:[%s1841_s1 + $0x148] sm:$0xff]  }
  0x1f   : > { %1305 = vmatprep.subr.bf16.mxu0 %v1459_v20  ;;  %v1496_v55 = vld [vmem:[%s1841_s1 + $0x198] sm:$0xff]   ;;  %v1498_v57 = vld [vmem:[%s1841_s1 + $0x110] sm:$0xff]   ;;  %v1502_v61 = vld [vmem:[%s1841_s1 + $0x108] sm:$0xff]  }
  0x20   : > { %1326 = vmatpush3.bf16.msra.mxu1 %v1458_v19  ;;  %v1499_v58 = vld [vmem:[%s1841_s1 + $0x1d0] sm:$0xff]   ;;  %v1503_v62 = vld [vmem:[%s1841_s1 + $0x1c8] sm:$0xff]   ;;  %v1505_v0 = vld [vmem:[%s1841_s1 + $0x140] sm:$0xff]  }
  0x21   : > { %1327 = vmatprep.subr.bf16.mxu1 %v1461_v22  ;;  %v1500_v59 = vld [vmem:[%s1841_s1 + $0x190] sm:$0xff]   ;;  %v1504_v63 = vld [vmem:[%s1841_s1 + $0x188] sm:$0xff]   ;;  %v1506_v1 = vld [vmem:[%s1841_s1 + $0x100] sm:$0xff]  }
  0x22   : > { %1306 = vmatpush3.bf16.msra.mxu0 %v1460_v21  ;;  %v1507_v2 = vld [vmem:[%s1841_s1 + $0x1c0] sm:$0xff]   ;;  %v1508_v3 = vld [vmem:[%s1684_s4 + $0x10] ss:$36 sps:$4 sm:$0xff]   ;;  %v1512_v7 = vld [vmem:[%s1684_s4 + $0x18] ss:$36 sps:$4 sm:$0xff]  }
  0x23   : > { %1307 = vmatprep.subr.bf16.mxu0 %v1463_v24  ;;  %v1510_v4 = vld [vmem:[%s1684_s4 + $0x14] ss:$36 sps:$4 sm:$0xff]   ;;  %v1511_v5 = vld [vmem:[%s1841_s1 + $0x180] sm:$0xff]   ;;  %v1517_v11 = vld [vmem:[%s1841_s1 + $0x228] sm:$0xff]  }
  0x24   : > { %1328 = vmatpush3.bf16.msra.mxu1 %v1462_v23  ;;  %v1514_v8 = vld [vmem:[%s1684_s4 + $0x1c] ss:$36 sps:$4 sm:$0xff]   ;;  %v1516_v10 = vld [vmem:[%s1841_s1 + $0x230] sm:$0xff]   ;;  %v1521_v15 = vld [vmem:[%s1841_s1 + $0x208] sm:$0xff]  }
  0x25   : > { %1329 = vmatprep.subr.bf16.mxu1 %v1465_v26  ;;  %v1515_v9 = vld [vmem:[%s1841_s1 + $0x238] sm:$0xff]   ;;  %v1518_v12 = vld [vmem:[%s1841_s1 + $0x220] sm:$0xff]   ;;  %v1520_v14 = vld [vmem:[%s1841_s1 + $0x210] sm:$0xff]  }
  0x26   : > { %1308 = vmatpush3.bf16.msra.mxu0 %v1464_v25  ;;  %v1519_v13 = vld [vmem:[%s1841_s1 + $0x218] sm:$0xff]   ;;  %v1522_v16 = vld [vmem:[%s1841_s1 + $0x200] sm:$0xff]  }
  0x27   : > { %1309 = vmatprep.subr.bf16.mxu0 %v1467_v28  ;;  %v1523_v17 = vld [vmem:[%s1684_s4 + $0x20] ss:$36 sps:$4 sm:$0xff]   ;;  %s1201_s4 = sshll.u32 %s1849_s21, 2 }
  0x28   : > { %1330 = vmatpush3.bf16.msra.mxu1 %v1466_v27  ;;  %s226_s7 = scalar_lea.vmem %s1843_s3, %s1201_s4 }
  0x29   : > { %1331 = vmatprep.subr.bf16.mxu1 %v1469_v30  ;;  %v1202_v30 = vld [vmem:[%s1842_s2] ss:$0 sm:$0xff] }
  0x2a   : > { %1310 = vmatpush3.bf16.msra.mxu0 %v1468_v29 }
  0x2b   : > { %1339 = vmatprep.subr.bf16.mxu0 %v1474_v34 }
  0x2c   : > { %1332 = vmatpush3.bf16.msra.mxu1 %v1473_v33 }
  0x2d   : > { %901 = vmatmul.mubr.bf16.vlgmr.msra.gmra.mxu0 %v1470_v31  ;;  %1361 = vmatprep.subr.bf16.mxu1 %v1479_v38 }
  0x2e   : > { %1340 = vmatpush3.bf16.msra.mxu0 %v1478_v37  ;;  %982 = vmatprep.mubr.bf16.mxu0 %v1510_v4 }
  0x2f   : > { %942 = vmatmul.mubr.bf16.vlgmr.msra.gmra.mxu1 %v1475_v35  ;;  %1341 = vmatprep.subr.bf16.mxu0 %v1481_v40 }
  0x30   : > { %1362 = vmatpush3.bf16.msra.mxu1 %v1480_v39  ;;  %1023 = vmatprep.mubr.bf16.mxu1 %v1514_v8 }
  0x31   : > { %1363 = vmatprep.subr.bf16.mxu1 %v1483_v42 }
  0x32   : > { %1342 = vmatpush3.bf16.msra.mxu0 %v1482_v41 }
  0x33   : > { %1343 = vmatprep.subr.bf16.mxu0 %v1485_v44 }
  0x34   : > { %1364 = vmatpush3.bf16.msra.mxu1 %v1484_v43 }
  0x35   : > { %1365 = vmatprep.subr.bf16.mxu1 %v1487_v46 }
  0x36   : > { %1344 = vmatpush3.bf16.msra.mxu0 %v1486_v45 }
  0x37   : > { %1345 = vmatprep.subr.bf16.mxu0 %v1489_v48 }
  0x38   : > { %1366 = vmatpush3.bf16.msra.mxu1 %v1488_v47 }
  0x39   : > { %1367 = vmatprep.subr.bf16.mxu1 %v1491_v50 }
  0x3a   : > { %1346 = vmatpush3.bf16.msra.mxu0 %v1490_v49 }
  0x3b   : > { %1347 = vmatprep.subr.bf16.mxu0 %v1493_v52 }
  0x3c   : > { %1368 = vmatpush3.bf16.msra.mxu1 %v1492_v51 }
  0x3d   : > { %1369 = vmatprep.subr.bf16.mxu1 %v1495_v54 }
  0x3e   : > { %1348 = vmatpush3.bf16.msra.mxu0 %v1494_v53 }
  0x3f   : > { %1349 = vmatprep.subr.bf16.mxu0 %v1497_v56 }
  0x40   : > { %1370 = vmatpush3.bf16.msra.mxu1 %v1496_v55 }
  0x41   : > { %1371 = vmatprep.subr.bf16.mxu1 %v1499_v58 }
  0x42   : > { %1350 = vmatpush3.bf16.msra.mxu0 %v1498_v57 }
  0x43   : > { %1351 = vmatprep.subr.bf16.mxu0 %v1501_v60 }
  0x44   : > { %1372 = vmatpush3.bf16.msra.mxu1 %v1500_v59 }
  0x45   : > { %1373 = vmatprep.subr.bf16.mxu1 %v1503_v62 }
  0x46   : > { %1352 = vmatpush3.bf16.msra.mxu0 %v1502_v61 }
  0x47   : > { %1353 = vmatprep.subr.bf16.mxu0 %v1505_v0 }
  0x48   : > { %1374 = vmatpush3.bf16.msra.mxu1 %v1504_v63 }
  0x49   : > { %1375 = vmatprep.subr.bf16.mxu1 %v1507_v2 }
  0x4a   : > { %1354 = vmatpush3.bf16.msra.mxu0 %v1506_v1 }
  0x4b   : > { %1392 = vmatprep.subr.bf16.mxu0 %v1548_v6 }
  0x4c   : > { %1376 = vmatpush3.bf16.msra.mxu1 %v1511_v5 }
  0x4d   : > { %983 = vmatmul.mubr.bf16.vlgmr.msra.gmra.mxu0 %v1508_v3 }
  0x4e   : > { %1408 = vmatprep.mubr.msk.bf16.mxu0 %vm1549_vm0, %v1548_v6  ;;  %1393 = vmatpush3.bf16.msra.mxu0 %v1515_v9 }
  0x4f   : > { %1024 = vmatmul.mubr.bf16.vlgmr.msra.gmra.mxu1 %v1512_v7  ;;  %1394 = vmatprep.subr.bf16.mxu0 %v1548_v6 }
  0x52   : > { %1395 = vmatpush3.bf16.msra.mxu0 %v1516_v10 }
  0x53   : > { %1396 = vmatprep.subr.bf16.mxu0 %v1548_v6 }
  0x56   : > { %1397 = vmatpush3.bf16.msra.mxu0 %v1517_v11 }
  0x57   : > { %1398 = vmatprep.subr.bf16.mxu0 %v1548_v6 }
  0x5a   : > { %1399 = vmatpush3.bf16.msra.mxu0 %v1518_v12 }
  0x5b   : > { %1400 = vmatprep.subr.bf16.mxu0 %v1548_v6 }
  0x5e   : > { %1401 = vmatpush3.bf16.msra.mxu0 %v1519_v13 }
  0x5f   : > { %1402 = vmatprep.subr.bf16.mxu0 %v1548_v6 }
  0x62   : > { %1403 = vmatpush3.bf16.msra.mxu0 %v1520_v14 }
  0x63   : > { %1404 = vmatprep.subr.bf16.mxu0 %v1548_v6 }
  0x66   : > { %1405 = vmatpush3.bf16.msra.mxu0 %v1521_v15 }
  0x67   : > { %1406 = vmatprep.subr.bf16.mxu0 %v1548_v6 }
  0x6a   : > { %1407 = vmatpush3.bf16.msra.mxu0 %v1522_v16 }
  0x6d   : > { %1409 = vmatmul.mubr.bf16.vlgmr.msra.gmra.mxu0 %v1523_v17 }
  0xed   : > { %v1311_v18 = vpop.f32.mrf.mxu0 }
  0xef   : > { %v1312_v19 = vpop.f32.mrf.mxu0  ;;  %v1333_v20 = vpop.f32.mrf.mxu1 }
  0xf0   : > { %v1313_v29 = vadd.f32 %v1312_v19, %v1311_v18 }
  0xf1   : > { %v1314_v21 = vpop.f32.mrf.mxu0  ;;  %v1334_v22 = vpop.f32.mrf.mxu1 }
  0xf2   : > { %v903_v33 = vadd.f32 %v1313_v29, %v1202_v30  ;;  %v1335_v34 = vadd.f32 %v1334_v22, %v1333_v20 }
  0xf3   : > { %v1315_v23 = vpop.f32.mrf.mxu0  ;;  %v1336_v24 = vpop.f32.mrf.mxu1 }
  0xf4   : > { %v1316_v35 = vadd.f32 %v1315_v23, %v1314_v21  ;;  %v944_v39 = vadd.f32 %v1335_v34, %v903_v33 }
  0xf5   : > { %v1337_v26 = vpop.f32.mrf.mxu1 }
  0xf6   : > { %v906_v40 = vadd.f32 %v1316_v35, %v1202_v30  ;;  %v1338_v41 = vadd.f32 %v1337_v26, %v1336_v24 }
  0xf8   : > { %v947_v46 = vadd.f32 %v1338_v41, %v906_v40 }
 0x10d   : > { %v1355_v25 = vpop.f32.mrf.mxu0 }
 0x10f   : > { %v1356_v27 = vpop.f32.mrf.mxu0  ;;  %v1377_v28 = vpop.f32.mrf.mxu1 }
 0x110   : > { %v1357_v36 = vadd.f32 %v1356_v27, %v1355_v25 }
 0x111   : > { %v1358_v31 = vpop.f32.mrf.mxu0  ;;  %v1378_v32 = vpop.f32.mrf.mxu1 }
 0x112   : > { %v985_v42 = vadd.f32 %v1357_v36, %v944_v39  ;;  %v1379_v43 = vadd.f32 %v1378_v32, %v1377_v28 }
 0x113   : > { %v1359_v37 = vpop.f32.mrf.mxu0  ;;  %v1380_v38 = vpop.f32.mrf.mxu1 }
 0x114   : > { %v1360_v44 = vadd.f32 %v1359_v37, %v1358_v31  ;;  %v1026_v49 = vadd.f32 %v1379_v43, %v985_v42 }
 0x115   : > { %v1381_v45 = vpop.f32.mrf.mxu1 }
 0x116   : > { %v988_v47 = vadd.f32 %v1360_v44, %v947_v46  ;;  %v1382_v48 = vadd.f32 %v1381_v45, %v1380_v38 }
 0x118   : > { %v1029_v53 = vadd.f32 %v1382_v48, %v988_v47 }
 0x12d   : > { %v1066_v50 = vpop.f32.mrf.mxu0 }
 0x12e   : > { %v1067_v51 = vadd.f32 %v1066_v50, %v1026_v49 }
 0x12f   : > { %v1410_v52 = vpop.f32.mrf.mxu0 }
 0x130   : > { %v1075_v55 = vmul.f32 0.01, %v1067_v51  ;;  %vm1073_vm1 = vcmp.gt.f32.partialorder %v1067_v51, 0.0 }
 0x131   : > { %v1069_v54 = vpop.f32.mrf.mxu0 }
 0x132   : > { %v1070_v56 = vadd.f32 %v1069_v54, %v1029_v53  ;;  %v1077_v59 = vsel %vm1073_vm1, %v1067_v51, %v1075_v55 }
 0x133   : > { %v1411_v57 = vpop.f32.mrf.mxu0 }
 0x134   : > { %vm1074_vm2 = vcmp.gt.f32.partialorder %v1070_v56, 0.0  ;;  %v1076_v58 = vmul.f32 0.01, %v1070_v56 }
 0x136   : > { %v1078_v60 = vsel %vm1074_vm2, %v1070_v56, %v1076_v58 }
 0x137   : > { %v1293_v61 = vpack.c.bf16 %v1078_v60, %v1077_v59 }
 0x139   : > { %1294 = vst [vmem:[%s226_s7] sm:$0xff] %v1293_v61  }
 0x13a PF: > { %s13_s14 = sadd.s32 1, %s1546_s14   ;;  %s1844_s12 = smov %s1542_s13 }
 0x13b   : > { %p10_p5 = scmp.ge.s32.totalorder %s13_s14, 4   ;;  %s1845_s13 = smov %s1847_s15 }
 0x13d   :  { %12 = sbr.rel (!%p10_p5) target bundleno = 2 (0x2), region = 68 }

// kernel: _unoranic_core.15
= control target key start
LH: loop header
LB: loop body
LE: loop exit
PB: predicated region body
PF: predicated region fallthrough
CT: control target
= control target key end

     0   :  { %s1380_s12 = smov 0   ;;  %s1382_s13 = smov 0   ;;  %s1554_s0 = inlined_call_operand.vmem [shape: bf16[128,576], index: 0, kind: input, shape index: {}]   ;;  %s1555_s1 = inlined_call_operand.vmem [shape: bf16[576,128], index: 1, kind: input, shape index: {}]   ;;  %s1556_s2 = inlined_call_operand.vmem [shape: f32[1,128], index: 2, kind: input, shape index: {}]   ;;  %s1557_s3 = inlined_call_operand.vmem [shape: bf16[128,128], index: 3, kind: output, shape index: {}]  }
   0x1   :  { %s1384_s14 = smov 0  }
   0x2 LB: > { %s25_s15 = sadd.s32 1, %s1354_s13  ;;  %p1028_p0 = scmp.ge.s32.totalorder %s1358_s14, 1  ;;  %s1358_s14 = sphi %s1384_s14, %s13_s14   ;;  %s1354_s13 = sphi %s1382_s13, %s1559_s13   ;;  %s1350_s12 = sphi %s1380_s12, %s1558_s12  }
   0x3   : > { %p27_p1 = scmp.ge.s32.totalorder %s25_s15, 2  ;;  %p170_p2 = scmp.lt.s32.totalorder %s1358_s14, 3 }
   0x5   : > { %s1561_s15 = smov (%p27_p1, %s25_s15), 0  ;;  %p171_p3 = pnand %p1028_p0, %p170_p2 }
   0x6   : > { %s1029_s23 = sshll.u32 (!%p171_p3), %s1350_s12, 3 }
   0x7   : > { %174 = sbr.rel (%p171_p3) target bundleno = 286 (0x11e), region = 32  ;;  %p206_p4 = scmp.lt.s32.totalorder (!%p171_p3), %s1029_s23, 15 }
   0xc   : > { %v1272_v0 = vld [vmem:[%s1555_s1 + $0x78] sm:$0xff]   ;;  %v1276_v4 = vld [vmem:[%s1555_s1 + $0x70] sm:$0xff]   ;;  %v1280_v8 = vld [vmem:[%s1555_s1 + $0x68] sm:$0xff]   ;;  %s1563_s23 = smov (!%p206_p4, %s1029_s23), 15  ;;  %vm648_vm0 = vcmask 523264  }
   0xd   : > { %v1273_v1 = vld [vmem:[%s1555_s1 + $0xf8] sm:$0xff]   ;;  %1135 = vmatprep.subr.bf16.mxu0 %v1272_v0  ;;  %v1277_v5 = vld [vmem:[%s1555_s1 + $0xf0] sm:$0xff]   ;;  %v1281_v9 = vld [vmem:[%s1555_s1 + $0xe8] sm:$0xff]   ;;  %s1247_s22 = smul.u32 20, %s1563_s23  ;;  %s1032_s26 = sshll.u32 %s1563_s23, 2 }
   0xe   : > { %v1274_v2 = vld [vmem:[%s1555_s1 + $0x38] sm:$0xff]   ;;  %1175 = vmatprep.subr.bf16.mxu1 %v1273_v1  ;;  %v1278_v6 = vld [vmem:[%s1555_s1 + $0x30] sm:$0xff]   ;;  %v1282_v10 = vld [vmem:[%s1555_s1 + $0x28] sm:$0xff]   ;;  %s226_s29 = scalar_lea.vmem %s1557_s3, %s1032_s26 }
   0xf   : > { %v1275_v3 = vld [vmem:[%s1555_s1 + $0xb8] sm:$0xff]   ;;  %1136 = vmatpush3.bf16.msra.mxu0 %v1274_v2  ;;  %v1279_v7 = vld [vmem:[%s1555_s1 + $0xb0] sm:$0xff]   ;;  %v1283_v11 = vld [vmem:[%s1555_s1 + $0xa8] sm:$0xff]   ;;  %s1497_s6 = scalar_lea.vmem %s1554_s0, %s1247_s22 }
  0x10   : > { %1176 = vmatpush3.bf16.msra.mxu1 %v1275_v3  ;;  %1137 = vmatprep.subr.bf16.mxu0 %v1276_v4  ;;  %v1284_v12 = vld [vmem:[%s1555_s1 + $0x60] sm:$0xff]   ;;  %v1288_v16 = vld [vmem:[%s1555_s1 + $0x58] sm:$0xff]   ;;  %v1292_v20 = vld [vmem:[%s1555_s1 + $0x50] sm:$0xff]  }
  0x11   : > { %1177 = vmatprep.subr.bf16.mxu1 %v1277_v5  ;;  %v1285_v13 = vld [vmem:[%s1555_s1 + $0xe0] sm:$0xff]   ;;  %v1289_v17 = vld [vmem:[%s1555_s1 + $0xd8] sm:$0xff]   ;;  %v1293_v21 = vld [vmem:[%s1555_s1 + $0xd0] sm:$0xff]  }
  0x12   : > { %v1286_v14 = vld [vmem:[%s1555_s1 + $0x20] sm:$0xff]   ;;  %v1290_v18 = vld [vmem:[%s1555_s1 + $0x18] sm:$0xff]   ;;  %v1294_v22 = vld [vmem:[%s1555_s1 + $0x10] sm:$0xff]  }
  0x13   : > { %1138 = vmatpush3.bf16.msra.mxu0 %v1278_v6  ;;  %v1287_v15 = vld [vmem:[%s1555_s1 + $0xa0] sm:$0xff]   ;;  %v1291_v19 = vld [vmem:[%s1555_s1 + $0x98] sm:$0xff]   ;;  %v1295_v23 = vld [vmem:[%s1555_s1 + $0x90] sm:$0xff]  }
  0x14   : > { %1178 = vmatpush3.bf16.msra.mxu1 %v1279_v7  ;;  %1139 = vmatprep.subr.bf16.mxu0 %v1280_v8  ;;  %v1296_v24 = vld [vmem:[%s1555_s1 + $0x48] sm:$0xff]   ;;  %v1300_v28 = vld [vmem:[%s1555_s1 + $0x40] sm:$0xff]   ;;  %v1310_v36 = vld [vmem:[%s1555_s1 + $0x118] sm:$0xff]  }
  0x15   : > { %1179 = vmatprep.subr.bf16.mxu1 %v1281_v9  ;;  %v1297_v25 = vld [vmem:[%s1555_s1 + $0xc8] sm:$0xff]   ;;  %v1301_v29 = vld [vmem:[%s1555_s1 + $0xc0] sm:$0xff]   ;;  %v1317_v39 = vld [vmem:[%s1555_s1 + $0x110] sm:$0xff]  }
  0x16   : > { %v1298_v26 = vld [vmem:[%s1555_s1 + $0x8] sm:$0xff]   ;;  %v1302_v30 = vld [vmem:[%s1555_s1] sm:$0xff]   ;;  %v1320_v43 = vld [vmem:[%s1497_s6 + $0x5c] ss:$20 sps:$4 sm:$0xff]  }
  0x17   : > { %1140 = vmatpush3.bf16.msra.mxu0 %v1282_v10  ;;  %v1299_v27 = vld [vmem:[%s1555_s1 + $0x88] sm:$0xff]   ;;  %v1303_v31 = vld [vmem:[%s1555_s1 + $0x80] sm:$0xff]   ;;  %v1325_v48 = vld [vmem:[%s1497_s6 + $0x7c] ss:$20 sps:$4 sm:$0xff]  }
  0x18   : > { %1180 = vmatpush3.bf16.msra.mxu1 %v1283_v11  ;;  %1141 = vmatprep.subr.bf16.mxu0 %v1284_v12  ;;  %v1304_v32 = vld [vmem:[%s1497_s6] ss:$20 sps:$4 sm:$0xff]   ;;  %v1306_v33 = vld [vmem:[%s1497_s6 + $0x4] ss:$20 sps:$4 sm:$0xff]   ;;  %v1307_v34 = vld [vmem:[%s1497_s6 + $0x8] ss:$20 sps:$4 sm:$0xff]  }
  0x19   : > { %1181 = vmatprep.subr.bf16.mxu1 %v1285_v13  ;;  %v1309_v35 = vld [vmem:[%s1497_s6 + $0xc] ss:$20 sps:$4 sm:$0xff]   ;;  %693 = vmatprep.mubr.bf16.mxu0 %v1306_v33  ;;  %v1313_v38 = vld [vmem:[%s1497_s6 + $0x34] ss:$20 sps:$4 sm:$0xff]   ;;  %v1316_v41 = vld [vmem:[%s1497_s6 + $0x30] ss:$20 sps:$4 sm:$0xff]  }
  0x1a   : > { %758 = vmatprep.mubr.bf16.mxu1 %v1309_v35  ;;  %v1311_v37 = vld [vmem:[%s1497_s6 + $0x2c] ss:$20 sps:$4 sm:$0xff]   ;;  %v1315_v40 = vld [vmem:[%s1497_s6 + $0x28] ss:$20 sps:$4 sm:$0xff]   ;;  %v1322_v46 = vld [vmem:[%s1497_s6 + $0x50] ss:$20 sps:$4 sm:$0xff]  }
  0x1b   : > { %1142 = vmatpush3.bf16.msra.mxu0 %v1286_v14  ;;  %v1318_v42 = vld [vmem:[%s1497_s6 + $0x54] ss:$20 sps:$4 sm:$0xff]   ;;  %v1331_v45 = vld [vmem:[%s1555_s1 + $0x100] sm:$0xff]   ;;  %v1323_v47 = vld [vmem:[%s1497_s6 + $0x58] ss:$20 sps:$4 sm:$0xff]  }
  0x1c   : > { %1182 = vmatpush3.bf16.msra.mxu1 %v1287_v15  ;;  %1143 = vmatprep.subr.bf16.mxu0 %v1288_v16  ;;  %v1324_v44 = vld [vmem:[%s1555_s1 + $0x108] sm:$0xff]   ;;  %v1327_v49 = vld [vmem:[%s1497_s6 + $0x84] ss:$20 sps:$4 sm:$0xff]   ;;  %v1330_v51 = vld [vmem:[%s1497_s6 + $0x80] ss:$20 sps:$4 sm:$0xff]  }
  0x1d   : > { %1183 = vmatprep.subr.bf16.mxu1 %v1289_v17  ;;  %v1329_v50 = vld [vmem:[%s1497_s6 + $0x78] ss:$20 sps:$4 sm:$0xff]   ;;  %v1332_v52 = vld [vmem:[%s1497_s6 + $0x10] ss:$20 sps:$4 sm:$0xff]   ;;  %v1333_v53 = vld [vmem:[%s1497_s6 + $0x60] ss:$20 sps:$4 sm:$0xff]  }
  0x1e   : > { %v1334_v54 = vld [vmem:[%s1497_s6 + $0x38] ss:$20 sps:$4 sm:$0xff]   ;;  %v1335_v55 = vld [vmem:[%s1497_s6 + $0x88] ss:$20 sps:$4 sm:$0xff]  }
  0x1f   : > { %1144 = vmatpush3.bf16.msra.mxu0 %v1290_v18  ;;  %v1033_v18 = vld [vmem:[%s1556_s2] ss:$0 sm:$0xff] }
  0x20   : > { %1184 = vmatpush3.bf16.msra.mxu1 %v1291_v19  ;;  %1145 = vmatprep.subr.bf16.mxu0 %v1292_v20 }
  0x21   : > { %1185 = vmatprep.subr.bf16.mxu1 %v1293_v21 }
  0x23   : > { %1146 = vmatpush3.bf16.msra.mxu0 %v1294_v22 }
  0x24   : > { %1186 = vmatpush3.bf16.msra.mxu1 %v1295_v23  ;;  %1147 = vmatprep.subr.bf16.mxu0 %v1296_v24 }
  0x25   : > { %1187 = vmatprep.subr.bf16.mxu1 %v1297_v25 }
  0x27   : > { %1148 = vmatpush3.bf16.msra.mxu0 %v1298_v26 }
  0x28   : > { %1188 = vmatpush3.bf16.msra.mxu1 %v1299_v27  ;;  %1149 = vmatprep.subr.bf16.mxu0 %v1300_v28 }
  0x29   : > { %1189 = vmatprep.subr.bf16.mxu1 %v1301_v29 }
  0x2b   : > { %1150 = vmatpush3.bf16.msra.mxu0 %v1302_v30 }
  0x2c   : > { %1190 = vmatpush3.bf16.msra.mxu1 %v1303_v31  ;;  %1223 = vmatprep.subr.bf16.mxu0 %v1310_v36 }
  0x2d   : > { %1239 = vmatprep.subr.bf16.mxu1 %v1310_v36 }
  0x2e   : > { %694 = vmatmul.mubr.bf16.vlgmr.msra.gmra.mxu0 %v1304_v32 }
  0x2f   : > { %759 = vmatmul.mubr.bf16.vlgmr.msra.gmra.mxu1 %v1307_v34  ;;  %1224 = vmatpush3.bf16.msra.mxu0 %v1310_v36 }
  0x30   : > { %1243 = vmatpush3.bf16.msra.mxu1 %v1310_v36  ;;  %701 = vmatprep.mubr.bf16.mxu0 %v1311_v37 }
  0x31   : > { %766 = vmatprep.mubr.bf16.mxu1 %v1313_v38  ;;  %1225 = vmatprep.subr.bf16.mxu0 %v1317_v39 }
  0x32   : > { %1240 = vmatprep.subr.bf16.mxu1 %v1317_v39 }
  0x33   : > { %1226 = vmatpush3.bf16.msra.mxu0 %v1317_v39 }
  0x34   : > { %1244 = vmatpush3.bf16.msra.mxu1 %v1317_v39  ;;  %1227 = vmatprep.subr.bf16.mxu0 %v1324_v44 }
  0x35   : > { %1241 = vmatprep.subr.bf16.mxu1 %v1324_v44 }
  0x36   : > { %702 = vmatmul.mubr.bf16.gmra.mxu0 %v1315_v40 }
  0x37   : > { %767 = vmatmul.mubr.bf16.gmra.mxu1 %v1316_v41  ;;  %709 = vmatprep.mubr.bf16.mxu0 %v1318_v42 }
  0x38   : > { %774 = vmatprep.mubr.bf16.mxu1 %v1320_v43  ;;  %1228 = vmatpush3.bf16.msra.mxu0 %v1324_v44 }
  0x39   : > { %1245 = vmatpush3.bf16.msra.mxu1 %v1324_v44  ;;  %1229 = vmatprep.subr.bf16.mxu0 %v1331_v45 }
  0x3a   : > { %1242 = vmatprep.subr.bf16.mxu1 %v1331_v45 }
  0x3c   : > { %1230 = vmatpush3.bf16.msra.mxu0 %v1331_v45 }
  0x3d   : > { %1246 = vmatpush3.bf16.msra.mxu1 %v1331_v45 }
  0x3e   : > { %710 = vmatmul.mubr.bf16.gmra.mxu0 %v1322_v46 }
  0x3f   : > { %775 = vmatmul.mubr.bf16.gmra.mxu1 %v1323_v47  ;;  %717 = vmatprep.mubr.bf16.mxu0 %v1325_v48 }
  0x40   : > { %782 = vmatprep.mubr.bf16.mxu1 %v1327_v49 }
  0x46   : > { %718 = vmatmul.mubr.bf16.gmra.mxu0 %v1329_v50 }
  0x47   : > { %783 = vmatmul.mubr.bf16.gmra.mxu1 %v1330_v51  ;;  %1231 = vmatprep.mubr.msk.bf16.mxu0 %vm648_vm0, %v1332_v52 }
  0x48   : > { %1235 = vmatprep.mubr.msk.bf16.mxu1 %vm648_vm0, %v1333_v53 }
  0x4e   : > { %1232 = vmatmul.mubr.msk.bf16.vlgmr.msra.gmra.mxu0 %vm648_vm0, %v1334_v54 }
  0x4f   : > { %1236 = vmatmul.mubr.msk.bf16.vlgmr.msra.gmra.mxu1 %vm648_vm0, %v1335_v55 }
  0xee   : > { %v1151_v56 = vpop.f32.mrf.mxu0 }
  0xef   : > { %v1191_v57 = vpop.f32.mrf.mxu1 }
  0xf0   : > { %v1152_v58 = vpop.f32.mrf.mxu0 }
  0xf1   : > { %v1192_v59 = vpop.f32.mrf.mxu1  ;;  %v1153_v15 = vadd.f32 %v1152_v58, %v1151_v56 }
  0xf2   : > { %v1154_v60 = vpop.f32.mrf.mxu0  ;;  %v1193_v28 = vadd.f32 %v1192_v59, %v1191_v57 }
  0xf3   : > { %v1194_v61 = vpop.f32.mrf.mxu1  ;;  %v696_v24 = vadd.f32 %v1153_v15, %v1033_v18 }
  0xf4   : > { %v1155_v62 = vpop.f32.mrf.mxu0 }
  0xf5   : > { %v1195_v63 = vpop.f32.mrf.mxu1  ;;  %v1156_v29 = vadd.f32 %v1155_v62, %v1154_v60  ;;  %v761_v43 = vadd.f32 %v1193_v28, %v696_v24 }
  0xf6   : > { %v1157_v0 = vpop.f32.mrf.mxu0  ;;  %v1196_v45 = vadd.f32 %v1195_v63, %v1194_v61 }
  0xf7   : > { %v1197_v1 = vpop.f32.mrf.mxu1  ;;  %v699_v44 = vadd.f32 %v1156_v29, %v1033_v18 }
  0xf8   : > { %v1158_v2 = vpop.f32.mrf.mxu0 }
  0xf9   : > { %v1198_v3 = vpop.f32.mrf.mxu1  ;;  %v1159_v16 = vadd.f32 %v1158_v2, %v1157_v0 }
  0xfa   : > { %v1160_v4 = vpop.f32.mrf.mxu0  ;;  %v1199_v31 = vadd.f32 %v1198_v3, %v1197_v1 }
  0xfb   : > { %v1200_v5 = vpop.f32.mrf.mxu1  ;;  %v704_v25 = vadd.f32 %v1159_v16, %v1033_v18 }
  0xfc   : > { %v1161_v6 = vpop.f32.mrf.mxu0 }
  0xfd   : > { %v1201_v7 = vpop.f32.mrf.mxu1  ;;  %v1162_v21 = vadd.f32 %v1161_v6, %v1160_v4  ;;  %v769_v41 = vadd.f32 %v1199_v31, %v704_v25  ;;  %v764_v4 = vadd.f32 %v1196_v45, %v699_v44 }
  0xfe   : > { %v1163_v8 = vpop.f32.mrf.mxu0  ;;  %v1202_v46 = vadd.f32 %v1201_v7, %v1200_v5 }
  0xff   : > { %v1203_v9 = vpop.f32.mrf.mxu1  ;;  %v707_v36 = vadd.f32 %v1162_v21, %v1033_v18 }
 0x100   : > { %v1164_v10 = vpop.f32.mrf.mxu0 }
 0x101   : > { %v1204_v11 = vpop.f32.mrf.mxu1  ;;  %v1165_v22 = vadd.f32 %v1164_v10, %v1163_v8  ;;  %v772_v58 = vadd.f32 %v1202_v46, %v707_v36 }
 0x102   : > { %v1166_v12 = vpop.f32.mrf.mxu0  ;;  %v1205_v47 = vadd.f32 %v1204_v11, %v1203_v9 }
 0x103   : > { %v1206_v13 = vpop.f32.mrf.mxu1  ;;  %v712_v37 = vadd.f32 %v1165_v22, %v1033_v18 }
 0x104   : > { %v1167_v14 = vpop.f32.mrf.mxu0 }
 0x105   : > { %v1207_v17 = vpop.f32.mrf.mxu1  ;;  %v1168_v32 = vadd.f32 %v1167_v14, %v1166_v12  ;;  %v777_v57 = vadd.f32 %v1205_v47, %v712_v37 }
 0x106   : > { %v1169_v19 = vpop.f32.mrf.mxu0  ;;  %v1208_v54 = vadd.f32 %v1207_v17, %v1206_v13 }
 0x107   : > { %v1209_v20 = vpop.f32.mrf.mxu1  ;;  %v715_v49 = vadd.f32 %v1168_v32, %v1033_v18 }
 0x108   : > { %v1170_v23 = vpop.f32.mrf.mxu0 }
 0x109   : > { %v1171_v26 = vadd.f32 %v1170_v23, %v1169_v19  ;;  %v1210_v27 = vpop.f32.mrf.mxu1  ;;  %v780_v5 = vadd.f32 %v1208_v54, %v715_v49 }
 0x10a   : > { %v1172_v30 = vpop.f32.mrf.mxu0  ;;  %v1211_v34 = vadd.f32 %v1210_v27, %v1209_v20 }
 0x10b   : > { %v720_v33 = vadd.f32 %v1171_v26, %v1033_v18  ;;  %v1212_v35 = vpop.f32.mrf.mxu1 }
 0x10c   : > { %v1173_v38 = vpop.f32.mrf.mxu0 }
 0x10d   : > { %v1174_v39 = vadd.f32 %v1173_v38, %v1172_v30  ;;  %v1213_v40 = vpop.f32.mrf.mxu1  ;;  %v785_v42 = vadd.f32 %v1211_v34, %v720_v33 }
 0x10e   : > { %v1233_v48 = vpop.f32.mrf.mxu0  ;;  %v1214_v51 = vadd.f32 %v1213_v40, %v1212_v35 }
 0x10f   : > { %v723_v50 = vadd.f32 %v1174_v39, %v1033_v18  ;;  %v834_v52 = vadd.f32 %v1233_v48, %v769_v41  ;;  %v1237_v53 = vpop.f32.mrf.mxu1 }
 0x110   : > { %v850_v55 = vadd.f32 %v1237_v53, %v785_v42  ;;  %v825_v56 = vpop.f32.mrf.mxu0 }
 0x111   : > { %vm858_vm1 = vcmp.gt.f32.partialorder %v834_v52, 0.0  ;;  %v866_v59 = vmul.f32 0.01, %v834_v52  ;;  %v826_v60 = vadd.f32 %v825_v56, %v761_v43  ;;  %v841_v62 = vpop.f32.mrf.mxu1  ;;  %v788_v0 = vadd.f32 %v1214_v51, %v723_v50 }
 0x112   : > { %vm862_vm2 = vcmp.gt.f32.partialorder %v850_v55, 0.0  ;;  %v870_v61 = vmul.f32 0.01, %v850_v55  ;;  %v842_v63 = vadd.f32 %v841_v62, %v777_v57  ;;  %v1234_v1 = vpop.f32.mrf.mxu0 }
 0x113   : > { %v837_v2 = vadd.f32 %v1234_v1, %v772_v58  ;;  %v1238_v3 = vpop.f32.mrf.mxu1  ;;  %v874_v6 = vsel %vm858_vm1, %v834_v52, %v866_v59  ;;  %vm856_vm3 = vcmp.gt.f32.partialorder %v826_v60, 0.0  ;;  %v864_v7 = vmul.f32 0.01, %v826_v60 }
 0x114   : > { %v853_v8 = vadd.f32 %v1238_v3, %v788_v0  ;;  %v828_v9 = vpop.f32.mrf.mxu0  ;;  %v878_v10 = vsel %vm862_vm2, %v850_v55, %v870_v61  ;;  %v868_v14 = vmul.f32 0.01, %v842_v63  ;;  %vm860_vm6 = vcmp.gt.f32.partialorder %v842_v63, 0.0 }
 0x115   : > { %vm859_vm4 = vcmp.gt.f32.partialorder %v837_v2, 0.0  ;;  %v867_v11 = vmul.f32 0.01, %v837_v2  ;;  %v829_v12 = vadd.f32 %v828_v9, %v764_v4  ;;  %v844_v13 = vpop.f32.mrf.mxu1  ;;  %v872_v22 = vsel %vm856_vm3, %v826_v60, %v864_v7 }
 0x116   : > { %vm863_vm5 = vcmp.gt.f32.partialorder %v853_v8, 0.0  ;;  %v871_v15 = vmul.f32 0.01, %v853_v8  ;;  %v845_v16 = vadd.f32 %v844_v13, %v780_v5  ;;  %v876_v25 = vsel %vm860_vm6, %v842_v63, %v868_v14 }
 0x117   : > { %v875_v17 = vsel %vm859_vm4, %v837_v2, %v867_v11  ;;  %vm857_vm7 = vcmp.gt.f32.partialorder %v829_v12, 0.0  ;;  %v865_v18 = vmul.f32 0.01, %v829_v12 }
 0x118   : > { %v1120_v19 = vpack.c.bf16 %v875_v17, %v874_v6  ;;  %v879_v20 = vsel %vm863_vm5, %v853_v8, %v871_v15  ;;  %vm861_vm8 = vcmp.gt.f32.partialorder %v845_v16, 0.0  ;;  %v869_v21 = vmul.f32 0.01, %v845_v16 }
 0x119   : > { %v1130_v23 = vpack.c.bf16 %v879_v20, %v878_v10  ;;  %v873_v24 = vsel %vm857_vm7, %v829_v12, %v865_v18 }
 0x11a   : > { %1132 = vst [vmem:[%s226_s29 + $0x8] sm:$0xff] %v1120_v19   ;;  %v1115_v26 = vpack.c.bf16 %v873_v24, %v872_v22  ;;  %v877_v27 = vsel %vm861_vm8, %v845_v16, %v869_v21 }
 0x11b   : > { %1134 = vst [vmem:[%s226_s29 + $0x18] sm:$0xff] %v1130_v23   ;;  %v1125_v28 = vpack.c.bf16 %v877_v27, %v876_v25 }
 0x11c   : > { %1116 = vst [vmem:[%s226_s29] sm:$0xff] %v1115_v26  }
 0x11d   : > { %1133 = vst [vmem:[%s226_s29 + $0x10] sm:$0xff] %v1125_v28  }
 0x11e PF: > { %s13_s14 = sadd.s32 1, %s1358_s14   ;;  %s1558_s12 = smov %s1354_s13 }
 0x11f   : > { %p10_p5 = scmp.ge.s32.totalorder %s13_s14, 4   ;;  %s1559_s13 = smov %s1561_s15 }
 0x121   :  { %12 = sbr.rel (!%p10_p5) target bundleno = 2 (0x2), region = 68 }

// kernel: _unoranic_core.16
= control target key start
LH: loop header
LB: loop body
LE: loop exit
PB: predicated region body
PF: predicated region fallthrough
CT: control target
= control target key end

     0   :  { %s1938_s12 = smov 0   ;;  %s1940_s13 = smov 0   ;;  %s2217_s0 = inlined_call_operand.vmem [shape: bf16[512,288], index: 0, kind: input, shape index: {}]   ;;  %s2218_s1 = inlined_call_operand.vmem [shape: bf16[288,128], index: 1, kind: input, shape index: {}]   ;;  %s2219_s2 = inlined_call_operand.vmem [shape: f32[1,128], index: 2, kind: input, shape index: {}]   ;;  %s2220_s3 = inlined_call_operand.vmem [shape: f32[512,128], index: 3, kind: output, shape index: {}]  }
   0x1   :  { %s1942_s14 = smov 0  }
   0x2 LB: > { %s25_s15 = sadd.s32 1, %s1912_s13  ;;  %p1387_p0 = scmp.ge.s32.totalorder %s1916_s14, 1  ;;  %s1916_s14 = sphi %s1942_s14, %s13_s14   ;;  %s1912_s13 = sphi %s1940_s13, %s2222_s13   ;;  %s1908_s12 = sphi %s1938_s12, %s2221_s12  }
   0x3   : > { %p27_p1 = scmp.ge.s32.totalorder %s25_s15, 2  ;;  %p170_p2 = scmp.lt.s32.totalorder %s1916_s14, 3 }
   0x5   : > { %s2224_s15 = smov (%p27_p1, %s25_s15), 0  ;;  %p171_p3 = pnand %p1387_p0, %p170_p2 }
   0x6   : > { %s1388_s18 = sshll.u32 (!%p171_p3), %s1908_s12, 5 }
   0x7   : > { %174 = sbr.rel (%p171_p3) target bundleno = 377 (0x179), region = 32  ;;  %p206_p4 = scmp.lt.s32.totalorder (!%p171_p3), %s1388_s18, 63 }
   0xc   : > { %v1684_v0 = vld [vmem:[%s2218_s1 + $0x78] sm:$0xff]   ;;  %v1686_v2 = vld [vmem:[%s2218_s1 + $0x70] sm:$0xff]   ;;  %v1688_v4 = vld [vmem:[%s2218_s1 + $0x68] sm:$0xff]   ;;  %s2226_s18 = smov (!%p206_p4, %s1388_s18), 63  ;;  %vm684_vm0 = vcmask 261120  }
   0xd   : > { %v1685_v1 = vld [vmem:[%s2218_s1 + $0x38] sm:$0xff]   ;;  %1477 = vmatprep.subr.bf16.mxu0 %v1684_v0  ;;  %1643 = vmatprep.subr.bf16.mxu1 %v1684_v0  ;;  %v1687_v3 = vld [vmem:[%s2218_s1 + $0x30] sm:$0xff]   ;;  %v1689_v5 = vld [vmem:[%s2218_s1 + $0x28] sm:$0xff]   ;;  %s1659_s4 = smul.u32 12, %s2226_s18  ;;  %s1391_s9 = sshll.u32 %s2226_s18, 3 }
   0xe   : > { %1478 = vmatpush3.bf16.msra.mxu0 %v1685_v1  ;;  %1651 = vmatpush3.bf16.msra.mxu1 %v1685_v1  ;;  %v1690_v6 = vld [vmem:[%s2218_s1 + $0x60] sm:$0xff]   ;;  %v1692_v8 = vld [vmem:[%s2218_s1 + $0x58] sm:$0xff]   ;;  %v1694_v10 = vld [vmem:[%s2218_s1 + $0x50] sm:$0xff]   ;;  %s2128_s12 = scalar_lea.vmem %s2220_s3, %s1391_s9 }
   0xf   : > { %1479 = vmatprep.subr.bf16.mxu0 %v1686_v2  ;;  %1644 = vmatprep.subr.bf16.mxu1 %v1686_v2  ;;  %v1691_v7 = vld [vmem:[%s2218_s1 + $0x20] sm:$0xff]   ;;  %s1989_s11 = scalar_lea.vmem %s2217_s0, %s1659_s4  ;;  %v1693_v9 = vld [vmem:[%s2218_s1 + $0x18] sm:$0xff]   ;;  %v1695_v13 = vld [vmem:[%s2218_s1 + $0x10] sm:$0xff]  }
  0x10   : > { %v1702_v11 = vld [vmem:[%s1989_s11 + $0x4] ss:$12 sps:$4 sm:$0xff]   ;;  %v1696_v14 = vld [vmem:[%s2218_s1 + $0x48] sm:$0xff]   ;;  %v1713_v26 = vld [vmem:[%s1989_s11 + $0x34] ss:$12 sps:$4 sm:$0xff]  }
  0x11   : > { %v1705_v12 = vld [vmem:[%s1989_s11 + $0x124] ss:$12 sps:$4 sm:$0xff]   ;;  %765 = vmatprep.mubr.bf16.mxu0 %v1702_v11  ;;  %v1697_v15 = vld [vmem:[%s2218_s1 + $0x8] sm:$0xff]   ;;  %v1715_v27 = vld [vmem:[%s1989_s11 + $0x154] ss:$12 sps:$4 sm:$0xff]  }
  0x12   : > { %1480 = vmatpush3.bf16.msra.mxu0 %v1687_v3  ;;  %1652 = vmatpush3.bf16.msra.mxu1 %v1687_v3  ;;  %v1698_v16 = vld [vmem:[%s2218_s1 + $0x40] sm:$0xff]   ;;  %v1706_v18 = vld [vmem:[%s2218_s1 + $0x88] sm:$0xff]   ;;  %v1717_v28 = vld [vmem:[%s1989_s11 + $0x30] ss:$12 sps:$4 sm:$0xff]  }
  0x13   : > { %1481 = vmatprep.subr.bf16.mxu0 %v1688_v4  ;;  %1645 = vmatprep.subr.bf16.mxu1 %v1688_v4  ;;  %v1699_v17 = vld [vmem:[%s2218_s1] sm:$0xff]   ;;  %v1707_v21 = vld [vmem:[%s1989_s11 + $0x1c] ss:$12 sps:$4 sm:$0xff]   ;;  %v1720_v30 = vld [vmem:[%s1989_s11 + $0x4c] ss:$12 sps:$4 sm:$0xff]  }
  0x14   : > { %861 = vmatprep.mubr.bf16.mxu1 %v1705_v12  ;;  %v1700_v19 = vld [vmem:[%s1989_s11] ss:$12 sps:$4 sm:$0xff]   ;;  %v1709_v22 = vld [vmem:[%s1989_s11 + $0x13c] ss:$12 sps:$4 sm:$0xff]   ;;  %v1711_v24 = vld [vmem:[%s1989_s11 + $0x18] ss:$12 sps:$4 sm:$0xff]  }
  0x15   : > { %v1703_v20 = vld [vmem:[%s1989_s11 + $0x120] ss:$12 sps:$4 sm:$0xff]   ;;  %v1712_v25 = vld [vmem:[%s1989_s11 + $0x138] ss:$12 sps:$4 sm:$0xff]   ;;  %v1718_v29 = vld [vmem:[%s1989_s11 + $0x150] ss:$12 sps:$4 sm:$0xff]  }
  0x16   : > { %1482 = vmatpush3.bf16.msra.mxu0 %v1689_v5  ;;  %1653 = vmatpush3.bf16.msra.mxu1 %v1689_v5  ;;  %v1719_v23 = vld [vmem:[%s2218_s1 + $0x80] sm:$0xff]   ;;  %v1722_v31 = vld [vmem:[%s1989_s11 + $0x16c] ss:$12 sps:$4 sm:$0xff]   ;;  %v1724_v32 = vld [vmem:[%s1989_s11 + $0x48] ss:$12 sps:$4 sm:$0xff]  }
  0x17   : > { %1483 = vmatprep.subr.bf16.mxu0 %v1690_v6  ;;  %1646 = vmatprep.subr.bf16.mxu1 %v1690_v6  ;;  %v1725_v33 = vld [vmem:[%s1989_s11 + $0x168] ss:$12 sps:$4 sm:$0xff]   ;;  %v1726_v34 = vld [vmem:[%s1989_s11 + $0x64] ss:$12 sps:$4 sm:$0xff]   ;;  %v1729_v36 = vld [vmem:[%s1989_s11 + $0x60] ss:$12 sps:$4 sm:$0xff]  }
  0x18   : > { %v1728_v35 = vld [vmem:[%s1989_s11 + $0x8] ss:$12 sps:$4 sm:$0xff]   ;;  %v1730_v37 = vld [vmem:[%s1989_s11 + $0x20] ss:$12 sps:$4 sm:$0xff]   ;;  %v1733_v39 = vld [vmem:[%s1989_s11 + $0x38] ss:$12 sps:$4 sm:$0xff]  }
  0x19   : > { %v1731_v38 = vld [vmem:[%s1989_s11 + $0x7c] ss:$12 sps:$4 sm:$0xff]   ;;  %v1734_v40 = vld [vmem:[%s1989_s11 + $0x78] ss:$12 sps:$4 sm:$0xff]   ;;  %v1736_v42 = vld [vmem:[%s1989_s11 + $0x94] ss:$12 sps:$4 sm:$0xff]  }
  0x1a   : > { %1484 = vmatpush3.bf16.msra.mxu0 %v1691_v7  ;;  %1654 = vmatpush3.bf16.msra.mxu1 %v1691_v7  ;;  %v1735_v41 = vld [vmem:[%s1989_s11 + $0x50] ss:$12 sps:$4 sm:$0xff]   ;;  %v1738_v43 = vld [vmem:[%s1989_s11 + $0x68] ss:$12 sps:$4 sm:$0xff]   ;;  %v1740_v45 = vld [vmem:[%s1989_s11 + $0x80] ss:$12 sps:$4 sm:$0xff]  }
  0x1b   : > { %1485 = vmatprep.subr.bf16.mxu0 %v1692_v8  ;;  %1647 = vmatprep.subr.bf16.mxu1 %v1692_v8  ;;  %v1739_v44 = vld [vmem:[%s1989_s11 + $0x90] ss:$12 sps:$4 sm:$0xff]   ;;  %v1741_v46 = vld [vmem:[%s1989_s11 + $0xac] ss:$12 sps:$4 sm:$0xff]   ;;  %v1744_v48 = vld [vmem:[%s1989_s11 + $0xa8] ss:$12 sps:$4 sm:$0xff]  }
  0x1c   : > { %v1743_v47 = vld [vmem:[%s1989_s11 + $0x98] ss:$12 sps:$4 sm:$0xff]   ;;  %v1745_v49 = vld [vmem:[%s1989_s11 + $0xb0] ss:$12 sps:$4 sm:$0xff]   ;;  %v1748_v51 = vld [vmem:[%s1989_s11 + $0xc8] ss:$12 sps:$4 sm:$0xff]  }
  0x1d   : > { %v1746_v50 = vld [vmem:[%s1989_s11 + $0xc4] ss:$12 sps:$4 sm:$0xff]   ;;  %v1749_v52 = vld [vmem:[%s1989_s11 + $0xc0] ss:$12 sps:$4 sm:$0xff]   ;;  %v1751_v54 = vld [vmem:[%s1989_s11 + $0xdc] ss:$12 sps:$4 sm:$0xff]  }
  0x1e   : > { %1486 = vmatpush3.bf16.msra.mxu0 %v1693_v9  ;;  %1655 = vmatpush3.bf16.msra.mxu1 %v1693_v9  ;;  %v1750_v53 = vld [vmem:[%s1989_s11 + $0xe0] ss:$12 sps:$4 sm:$0xff]   ;;  %v1753_v55 = vld [vmem:[%s1989_s11 + $0xf8] ss:$12 sps:$4 sm:$0xff]   ;;  %v1755_v57 = vld [vmem:[%s1989_s11 + $0x110] ss:$12 sps:$4 sm:$0xff]  }
  0x1f   : > { %1487 = vmatprep.subr.bf16.mxu0 %v1694_v10  ;;  %1648 = vmatprep.subr.bf16.mxu1 %v1694_v10  ;;  %v1754_v56 = vld [vmem:[%s1989_s11 + $0xd8] ss:$12 sps:$4 sm:$0xff]   ;;  %v1756_v58 = vld [vmem:[%s1989_s11 + $0xf4] ss:$12 sps:$4 sm:$0xff]   ;;  %v1759_v60 = vld [vmem:[%s1989_s11 + $0xf0] ss:$12 sps:$4 sm:$0xff]  }
  0x20   : > { %v1758_v59 = vld [vmem:[%s1989_s11 + $0x128] ss:$12 sps:$4 sm:$0xff]   ;;  %v1760_v61 = vld [vmem:[%s1989_s11 + $0x140] ss:$12 sps:$4 sm:$0xff]   ;;  %v1763_v63 = vld [vmem:[%s1989_s11 + $0x158] ss:$12 sps:$4 sm:$0xff]  }
  0x21   : > { %v1761_v62 = vld [vmem:[%s1989_s11 + $0x10c] ss:$12 sps:$4 sm:$0xff]   ;;  %v1764_v0 = vld [vmem:[%s1989_s11 + $0x108] ss:$12 sps:$4 sm:$0xff]   ;;  %v1765_v1 = vld [vmem:[%s1989_s11 + $0x170] ss:$12 sps:$4 sm:$0xff]  }
  0x22   : > { %1488 = vmatpush3.bf16.msra.mxu0 %v1695_v13  ;;  %1656 = vmatpush3.bf16.msra.mxu1 %v1695_v13 }
  0x23   : > { %1489 = vmatprep.subr.bf16.mxu0 %v1696_v14  ;;  %1649 = vmatprep.subr.bf16.mxu1 %v1696_v14 }
  0x26   : > { %1490 = vmatpush3.bf16.msra.mxu0 %v1697_v15  ;;  %1657 = vmatpush3.bf16.msra.mxu1 %v1697_v15 }
  0x27   : > { %1491 = vmatprep.subr.bf16.mxu0 %v1698_v16  ;;  %1650 = vmatprep.subr.bf16.mxu1 %v1698_v16 }
  0x2a   : > { %1492 = vmatpush3.bf16.msra.mxu0 %v1699_v17  ;;  %1658 = vmatpush3.bf16.msra.mxu1 %v1699_v17 }
  0x2b   : > { %1607 = vmatprep.subr.bf16.mxu1 %v1706_v18 }
  0x2d   : > { %766 = vmatmul.mubr.bf16.vlgmr.msra.gmra.mxu0 %v1700_v19  ;;  %862 = vmatmul.mubr.bf16.vlgmr.msra.gmra.mxu1 %v1703_v20 }
  0x2e   : > { %1608 = vmatpush3.bf16.msra.mxu1 %v1706_v18  ;;  %773 = vmatprep.mubr.bf16.mxu0 %v1707_v21 }
  0x2f   : > { %869 = vmatprep.mubr.bf16.mxu1 %v1709_v22  ;;  %1609 = vmatprep.subr.bf16.mxu1 %v1719_v23 }
  0x32   : > { %1610 = vmatpush3.bf16.msra.mxu1 %v1719_v23 }
  0x35   : > { %774 = vmatmul.mubr.bf16.gmra.mxu0 %v1711_v24  ;;  %870 = vmatmul.mubr.bf16.gmra.mxu1 %v1712_v25 }
  0x36   : > { %781 = vmatprep.mubr.bf16.mxu0 %v1713_v26  ;;  %877 = vmatprep.mubr.bf16.mxu1 %v1715_v27 }
  0x3d   : > { %782 = vmatmul.mubr.bf16.gmra.mxu0 %v1717_v28  ;;  %878 = vmatmul.mubr.bf16.gmra.mxu1 %v1718_v29 }
  0x3e   : > { %789 = vmatprep.mubr.bf16.mxu0 %v1720_v30  ;;  %885 = vmatprep.mubr.bf16.mxu1 %v1722_v31 }
  0x45   : > { %790 = vmatmul.mubr.bf16.gmra.mxu0 %v1724_v32  ;;  %886 = vmatmul.mubr.bf16.gmra.mxu1 %v1725_v33 }
  0x46   : > { %797 = vmatprep.mubr.bf16.mxu0 %v1726_v34  ;;  %1611 = vmatprep.mubr.msk.bf16.mxu1 %vm684_vm0, %v1728_v35 }
  0x4d   : > { %798 = vmatmul.mubr.bf16.gmra.mxu0 %v1729_v36  ;;  %1612 = vmatmul.mubr.msk.bf16.vlgmr.msra.gmra.mxu1 %vm684_vm0, %v1730_v37 }
  0x4e   : > { %805 = vmatprep.mubr.bf16.mxu0 %v1731_v38  ;;  %1615 = vmatprep.mubr.msk.bf16.mxu1 %vm684_vm0, %v1733_v39 }
  0x55   : > { %806 = vmatmul.mubr.bf16.gmra.mxu0 %v1734_v40  ;;  %1616 = vmatmul.mubr.msk.bf16.gmra.mxu1 %vm684_vm0, %v1735_v41 }
  0x56   : > { %813 = vmatprep.mubr.bf16.mxu0 %v1736_v42  ;;  %1619 = vmatprep.mubr.msk.bf16.mxu1 %vm684_vm0, %v1738_v43  ;;  %v2105_v42 = vld [vmem:[%s2219_s2] ss:$0 sm:$0xff] }
  0x5d   : > { %814 = vmatmul.mubr.bf16.gmra.mxu0 %v1739_v44  ;;  %1620 = vmatmul.mubr.msk.bf16.gmra.mxu1 %vm684_vm0, %v1740_v45 }
  0x5e   : > { %821 = vmatprep.mubr.bf16.mxu0 %v1741_v46  ;;  %1623 = vmatprep.mubr.msk.bf16.mxu1 %vm684_vm0, %v1743_v47 }
  0x65   : > { %822 = vmatmul.mubr.bf16.gmra.mxu0 %v1744_v48  ;;  %1624 = vmatmul.mubr.msk.bf16.gmra.mxu1 %vm684_vm0, %v1745_v49 }
  0x66   : > { %829 = vmatprep.mubr.bf16.mxu0 %v1746_v50  ;;  %1627 = vmatprep.mubr.msk.bf16.mxu1 %vm684_vm0, %v1748_v51 }
  0x6d   : > { %830 = vmatmul.mubr.bf16.gmra.mxu0 %v1749_v52  ;;  %1628 = vmatmul.mubr.msk.bf16.gmra.mxu1 %vm684_vm0, %v1750_v53 }
  0x6e   : > { %837 = vmatprep.mubr.bf16.mxu0 %v1751_v54  ;;  %1631 = vmatprep.mubr.msk.bf16.mxu1 %vm684_vm0, %v1753_v55 }
  0x75   : > { %838 = vmatmul.mubr.bf16.gmra.mxu0 %v1754_v56  ;;  %1632 = vmatmul.mubr.msk.bf16.gmra.mxu1 %vm684_vm0, %v1755_v57 }
  0x76   : > { %845 = vmatprep.mubr.bf16.mxu0 %v1756_v58  ;;  %1635 = vmatprep.mubr.msk.bf16.mxu1 %vm684_vm0, %v1758_v59 }
  0x7d   : > { %846 = vmatmul.mubr.bf16.gmra.mxu0 %v1759_v60  ;;  %1636 = vmatmul.mubr.msk.bf16.gmra.mxu1 %vm684_vm0, %v1760_v61 }
  0x7e   : > { %853 = vmatprep.mubr.bf16.mxu0 %v1761_v62  ;;  %1639 = vmatprep.mubr.msk.bf16.mxu1 %vm684_vm0, %v1763_v63 }
  0x85   : > { %854 = vmatmul.mubr.bf16.gmra.mxu0 %v1764_v0  ;;  %1640 = vmatmul.mubr.msk.bf16.gmra.mxu1 %vm684_vm0, %v1765_v1 }
  0xed   : > { %v1493_v2 = vpop.f32.mrf.mxu0  ;;  %v1565_v3 = vpop.f32.mrf.mxu1 }
  0xef   : > { %v1494_v4 = vpop.f32.mrf.mxu0  ;;  %v1566_v5 = vpop.f32.mrf.mxu1 }
  0xf0   : > { %v2082_v6 = vadd.f32 %v1566_v5, %v1565_v3  ;;  %v1495_v39 = vadd.f32 %v1494_v4, %v1493_v2 }
  0xf1   : > { %v1496_v7 = vpop.f32.mrf.mxu0  ;;  %v1568_v8 = vpop.f32.mrf.mxu1 }
  0xf2   : > { %v768_v48 = vadd.f32 %v1495_v39, %v2105_v42 }
  0xf3   : > { %v1497_v9 = vpop.f32.mrf.mxu0  ;;  %v1569_v10 = vpop.f32.mrf.mxu1 }
  0xf4   : > { %v2084_v11 = vadd.f32 %v1569_v10, %v1568_v8  ;;  %v1498_v49 = vadd.f32 %v1497_v9, %v1496_v7 }
  0xf5   : > { %v1499_v12 = vpop.f32.mrf.mxu0  ;;  %v1571_v13 = vpop.f32.mrf.mxu1 }
  0xf6   : > { %v771_v0 = vadd.f32 %v1498_v49, %v2105_v42 }
  0xf7   : > { %v1500_v14 = vpop.f32.mrf.mxu0  ;;  %v1572_v15 = vpop.f32.mrf.mxu1 }
  0xf8   : > { %v2086_v16 = vadd.f32 %v1572_v15, %v1571_v13  ;;  %v1501_v36 = vadd.f32 %v1500_v14, %v1499_v12 }
  0xf9   : > { %v1502_v17 = vpop.f32.mrf.mxu0  ;;  %v1574_v18 = vpop.f32.mrf.mxu1 }
  0xfa   : > { %v776_v44 = vadd.f32 %v1501_v36, %v2105_v42 }
  0xfb   : > { %v1503_v19 = vpop.f32.mrf.mxu0  ;;  %v1575_v20 = vpop.f32.mrf.mxu1 }
  0xfc   : > { %v2088_v21 = vadd.f32 %v1575_v20, %v1574_v18  ;;  %v1504_v43 = vadd.f32 %v1503_v19, %v1502_v17 }
  0xfd   : > { %v1505_v22 = vpop.f32.mrf.mxu0  ;;  %v1577_v23 = vpop.f32.mrf.mxu1 }
  0xfe   : > { %v779_v55 = vadd.f32 %v1504_v43, %v2105_v42 }
  0xff   : > { %v1506_v24 = vpop.f32.mrf.mxu0  ;;  %v1578_v25 = vpop.f32.mrf.mxu1 }
 0x100   : > { %v2090_v26 = vadd.f32 %v1578_v25, %v1577_v23  ;;  %v1507_v58 = vadd.f32 %v1506_v24, %v1505_v22 }
 0x101   : > { %v1508_v27 = vpop.f32.mrf.mxu0  ;;  %v1580_v28 = vpop.f32.mrf.mxu1 }
 0x102   : > { %v784_v12 = vadd.f32 %v1507_v58, %v2105_v42 }
 0x103   : > { %v1509_v29 = vpop.f32.mrf.mxu0  ;;  %v1581_v30 = vpop.f32.mrf.mxu1 }
 0x104   : > { %v2092_v31 = vadd.f32 %v1581_v30, %v1580_v28  ;;  %v1510_v13 = vadd.f32 %v1509_v29, %v1508_v27 }
 0x105   : > { %v1511_v32 = vpop.f32.mrf.mxu0  ;;  %v2094_v33 = vpop.f32.mrf.mxu1 }
 0x106   : > { %v787_v27 = vadd.f32 %v1510_v13, %v2105_v42 }
 0x107   : > { %v1512_v34 = vpop.f32.mrf.mxu0  ;;  %v2096_v35 = vpop.f32.mrf.mxu1 }
 0x108   : > { %v1513_v52 = vadd.f32 %v1512_v34, %v1511_v32 }
 0x109   : > { %v1514_v37 = vpop.f32.mrf.mxu0  ;;  %v2098_v38 = vpop.f32.mrf.mxu1 }
 0x10a   : > { %v792_v4 = vadd.f32 %v1513_v52, %v2105_v42 }
 0x10b   : > { %v1515_v40 = vpop.f32.mrf.mxu0  ;;  %v2100_v41 = vpop.f32.mrf.mxu1 }
 0x10c   : > { %v1516_v62 = vadd.f32 %v1515_v40, %v1514_v37 }
 0x10d   : > { %v1517_v45 = vpop.f32.mrf.mxu0  ;;  %v1613_v46 = vpop.f32.mrf.mxu1 }
 0x10e   : > { %v937_v47 = vadd.f32 %v1613_v46, %v776_v44  ;;  %v795_v18 = vadd.f32 %v1516_v62, %v2105_v42 }
 0x10f   : > { %v1518_v50 = vpop.f32.mrf.mxu0  ;;  %v928_v51 = vpop.f32.mrf.mxu1 }
 0x110   : > { %v1057_v53 = vsub.f32 0.0, %v937_v47  ;;  %v929_v54 = vadd.f32 %v928_v51, %v768_v48  ;;  %v1519_v28 = vadd.f32 %v1518_v50, %v1517_v45 }
 0x111   : > { %v1520_v56 = vpop.f32.mrf.mxu0  ;;  %v1614_v57 = vpop.f32.mrf.mxu1 }
 0x112   : > { %v1091_v59 = vmul.f32 1.442695, %v1057_v53  ;;  %v1055_v60 = vsub.f32 0.0, %v929_v54  ;;  %v940_v61 = vadd.f32 %v1614_v57, %v779_v55  ;;  %v800_v49 = vadd.f32 %v1519_v28, %v2105_v42 }
 0x113   : > { %v1521_v63 = vpop.f32.mrf.mxu0  ;;  %v931_v1 = vpop.f32.mrf.mxu1 }
 0x114   : > { %1766 = vpow2.f32 %v1091_v59  ;;  %v1087_v2 = vmul.f32 1.442695, %v1055_v60  ;;  %v1058_v3 = vsub.f32 0.0, %v940_v61  ;;  %v932_v5 = vadd.f32 %v931_v1, %v771_v0 }
 0x115   : > { %v1523_v7 = vpop.f32.mrf.mxu0  ;;  %v1617_v8 = vpop.f32.mrf.mxu1  ;;  %v1522_v50 = vadd.f32 %v1521_v63, %v1520_v56 }
 0x116   : > { %1768 = vpow2.f32 %v1087_v2  ;;  %v1093_v9 = vmul.f32 1.442695, %v1058_v3  ;;  %v953_v10 = vadd.f32 %v1617_v8, %v792_v4  ;;  %v1056_v14 = vsub.f32 0.0, %v932_v5 }
 0x117   : > { %v1524_v15 = vpop.f32.mrf.mxu0  ;;  %v944_v17 = vpop.f32.mrf.mxu1  ;;  %v803_v63 = vadd.f32 %v1522_v50, %v2105_v42 }
 0x118   : > { %1770 = vpow2.f32 %v1093_v9  ;;  %v1061_v19 = vsub.f32 0.0, %v953_v10  ;;  %v1525_v20 = vadd.f32 %v1524_v15, %v1523_v7  ;;  %v945_v22 = vadd.f32 %v944_v17, %v784_v12 }
 0x119   : > { %v1089_v23 = vmul.f32 1.442695, %v1056_v14  ;;  %v1526_v24 = vpop.f32.mrf.mxu0  ;;  %v1618_v25 = vpop.f32.mrf.mxu1 }
 0x11a   : > { %v1099_v30 = vmul.f32 1.442695, %v1061_v19  ;;  %v1059_v32 = vsub.f32 0.0, %v945_v22  ;;  %v956_v34 = vadd.f32 %v1618_v25, %v795_v18  ;;  %v808_v37 = vadd.f32 %v1525_v20, %v2105_v42 }
 0x11b   : > { %1772 = vpow2.f32 %v1089_v23  ;;  %v1527_v36 = vpop.f32.mrf.mxu0  ;;  %v947_v29 = vpop.f32.mrf.mxu1 }
 0x11c   : > { %1774 = vpow2.f32 %v1099_v30  ;;  %v1095_v39 = vmul.f32 1.442695, %v1059_v32  ;;  %v1062_v40 = vsub.f32 0.0, %v956_v34  ;;  %v1528_v43 = vadd.f32 %v1527_v36, %v1526_v24 }
 0x11d   : > { %v948_v44 = vadd.f32 %v947_v29, %v787_v27  ;;  %v1529_v46 = vpop.f32.mrf.mxu0  ;;  %v1621_v47 = vpop.f32.mrf.mxu1 }
 0x11e   : > { %1776 = vpow2.f32 %v1095_v39  ;;  %v1101_v48 = vmul.f32 1.442695, %v1062_v40  ;;  %v969_v45 = vadd.f32 %v1621_v47, %v808_v37  ;;  %v811_v57 = vadd.f32 %v1528_v43, %v2105_v42 }
 0x11f   : > { %v1060_v51 = vsub.f32 0.0, %v948_v44  ;;  %v1530_v52 = vpop.f32.mrf.mxu0  ;;  %v960_v53 = vpop.f32.mrf.mxu1 }
 0x120   : > { %1778 = vpow2.f32 %v1101_v48  ;;  %v1065_v54 = vsub.f32 0.0, %v969_v45  ;;  %v961_v55 = vadd.f32 %v960_v53, %v800_v49  ;;  %v1531_v60 = vadd.f32 %v1530_v52, %v1529_v46 }
 0x121   : > { %v1767_v58 = vpop.eup %1766  ;;  %v1097_v59 = vmul.f32 1.442695, %v1060_v51  ;;  %v1532_v61 = vpop.f32.mrf.mxu0 }
 0x122   : > { %v1622_v62 = vpop.f32.mrf.mxu1  ;;  %v1153_v0 = vadd.f32 1.0, %v1767_v58  ;;  %v1107_v1 = vmul.f32 1.442695, %v1065_v54  ;;  %v1063_v2 = vsub.f32 0.0, %v961_v55  ;;  %v816_v18 = vadd.f32 %v1531_v60, %v2105_v42 }
 0x123   : > { %v972_v3 = vadd.f32 %v1622_v62, %v811_v57  ;;  %v1769_v4 = vpop.eup %1768  ;;  %1780 = vpow2.f32 %v1097_v59  ;;  %v1533_v56 = vpop.f32.mrf.mxu0 }
 0x124   : > { %v963_v5 = vpop.f32.mrf.mxu1  ;;  %1782 = vrcp.f32 %v1153_v0  ;;  %v1151_v7 = vadd.f32 1.0, %v1769_v4  ;;  %v1103_v8 = vmul.f32 1.442695, %v1063_v2  ;;  %v1534_v19 = vadd.f32 %v1533_v56, %v1532_v61 }
 0x125   : > { %v1066_v9 = vsub.f32 0.0, %v972_v3  ;;  %v1771_v10 = vpop.eup %1770  ;;  %1784 = vpow2.f32 %v1107_v1  ;;  %v964_v12 = vadd.f32 %v963_v5, %v803_v63  ;;  %v1535_v13 = vpop.f32.mrf.mxu0 }
 0x126   : > { %v1625_v14 = vpop.f32.mrf.mxu1  ;;  %1786 = vrcp.f32 %v1151_v7  ;;  %v1154_v15 = vadd.f32 1.0, %v1771_v10  ;;  %v819_v44 = vadd.f32 %v1534_v19, %v2105_v42 }
 0x127   : > { %v1109_v17 = vmul.f32 1.442695, %v1066_v9  ;;  %1788 = vpow2.f32 %v1103_v8  ;;  %v1064_v20 = vsub.f32 0.0, %v964_v12  ;;  %v1536_v22 = vpop.f32.mrf.mxu0 }
 0x128   : > { %v976_v23 = vpop.f32.mrf.mxu1  ;;  %v1773_v24 = vpop.eup %1772  ;;  %1790 = vrcp.f32 %v1154_v15  ;;  %v1537_v25 = vadd.f32 %v1536_v22, %v1535_v13 }
 0x129   : > { %v977_v28 = vadd.f32 %v976_v23, %v816_v18  ;;  %v1775_v30 = vpop.eup %1774  ;;  %v1152_v32 = vadd.f32 1.0, %v1773_v24  ;;  %1792 = vpow2.f32 %v1109_v17  ;;  %v1105_v34 = vmul.f32 1.442695, %v1064_v20  ;;  %v1538_v36 = vpop.f32.mrf.mxu0 }
 0x12a   : > { %v1626_v27 = vpop.f32.mrf.mxu1  ;;  %v1157_v29 = vadd.f32 1.0, %v1775_v30  ;;  %v824_v37 = vadd.f32 %v1537_v25, %v2105_v42 }
 0x12b   : > { %v1067_v39 = vsub.f32 0.0, %v977_v28  ;;  %v1777_v40 = vpop.eup %1776  ;;  %1794 = vrcp.f32 %v1152_v32  ;;  %v1539_v43 = vpop.f32.mrf.mxu0 }
 0x12c   : > { %v979_v46 = vpop.f32.mrf.mxu1  ;;  %1796 = vrcp.f32 %v1157_v29  ;;  %v1155_v47 = vadd.f32 1.0, %v1777_v40  ;;  %v985_v48 = vadd.f32 %v1625_v14, %v824_v37  ;;  %v1540_v50 = vadd.f32 %v1539_v43, %v1538_v36 }
 0x12d   : > { %v1111_v45 = vmul.f32 1.442695, %v1067_v39  ;;  %v1779_v49 = vpop.eup %1778  ;;  %1798 = vpow2.f32 %v1105_v34  ;;  %v980_v51 = vadd.f32 %v979_v46, %v819_v44  ;;  %v1541_v52 = vpop.f32.mrf.mxu0 }
 0x12e   : > { %v2123_v53 = vpop.f32.mrf.mxu1  ;;  %1800 = vrcp.f32 %v1155_v47  ;;  %v1158_v54 = vadd.f32 1.0, %v1779_v49  ;;  %v1069_v55 = vsub.f32 0.0, %v985_v48  ;;  %v827_v57 = vadd.f32 %v1540_v50, %v2105_v42 }
 0x12f   : > { %1802 = vpow2.f32 %v1111_v45  ;;  %v1068_v58 = vsub.f32 0.0, %v980_v51  ;;  %v1542_v59 = vpop.f32.mrf.mxu0  ;;  %v864_v51 = vadd.f32 %v2082_v6, %v2105_v42 }
 0x130   : > { %v992_v60 = vpop.f32.mrf.mxu1  ;;  %v1781_v61 = vpop.eup %1780  ;;  %1804 = vrcp.f32 %v1158_v54  ;;  %v1115_v62 = vmul.f32 1.442695, %v1069_v55  ;;  %v1543_v0 = vadd.f32 %v1542_v59, %v1541_v52  ;;  %v988_v3 = vadd.f32 %v1626_v27, %v827_v57 }
 0x131   : > { %v1783_v1 = vpop.eup %1782  ;;  %v1156_v2 = vadd.f32 1.0, %v1781_v61  ;;  %v1113_v4 = vmul.f32 1.442695, %v1068_v58  ;;  %v1544_v56 = vpop.f32.mrf.mxu0  ;;  %v872_v58 = vadd.f32 %v2086_v16, %v2105_v42  ;;  %v1588_v61 = vadd.f32 %v2100_v41, %v2098_v38 }
 0x132   : > { %v2131_v63 = vpop.f32.mrf.mxu1  ;;  %v1785_v5 = vpop.eup %1784  ;;  %1249 = vst [vmem:[%s2128_s12 + $0x10] sm:$0xff] %v1783_v1  ;;  %1806 = vpow2.f32 %v1115_v62  ;;  %v832_v7 = vadd.f32 %v1543_v0, %v2105_v42  ;;  %v1070_v10 = vsub.f32 0.0, %v988_v3  ;;  %v2167_v38 = vadd.f32 %v2090_v26, %v2105_v42 }
 0x133   : > { %v1787_v8 = vpop.eup %1786  ;;  %1808 = vrcp.f32 %v1156_v2  ;;  %v1161_v9 = vadd.f32 1.0, %v1785_v5  ;;  %v1545_v12 = vpop.f32.mrf.mxu0 }
 0x134   : > { %v995_v13 = vpop.f32.mrf.mxu1  ;;  %v1789_v14 = vpop.eup %1788  ;;  %1247 = vst [vmem:[%s2128_s12] sm:$0xff] %v1787_v8  ;;  %1810 = vpow2.f32 %v1113_v4  ;;  %v993_v15 = vadd.f32 %v992_v60, %v832_v7  ;;  %v1546_v17 = vadd.f32 %v1545_v12, %v1544_v56  ;;  %v1117_v20 = vmul.f32 1.442695, %v1070_v10 }
 0x135   : > { %v1791_v18 = vpop.eup %1790  ;;  %1812 = vrcp.f32 %v1161_v9  ;;  %v1159_v19 = vadd.f32 1.0, %v1789_v14  ;;  %v1547_v22 = vpop.f32.mrf.mxu0  ;;  %v1585_v60 = vadd.f32 %v2096_v35, %v2094_v33  ;;  %v875_v33 = vadd.f32 %v2088_v21, %v2105_v42 }
 0x136   : > { %v2136_v23 = vpop.f32.mrf.mxu1  ;;  %v1793_v24 = vpop.eup %1792  ;;  %1250 = vst [vmem:[%s2128_s12 + $0x18] sm:$0xff] %v1791_v18  ;;  %v1071_v25 = vsub.f32 0.0, %v993_v15  ;;  %v835_v28 = vadd.f32 %v1546_v17, %v2105_v42  ;;  %v867_v35 = vadd.f32 %v2084_v11, %v2105_v42  ;;  %v891_v11 = vadd.f32 %v1588_v61, %v2105_v42 }
 0x137   : > { %1814 = vrcp.f32 %v1159_v19  ;;  %v1162_v30 = vadd.f32 1.0, %v1793_v24  ;;  %v1548_v32 = vpop.f32.mrf.mxu0  ;;  %v888_v14 = vadd.f32 %v1585_v60, %v2105_v42 }
 0x138   : > { %v2140_v34 = vpop.f32.mrf.mxu1  ;;  %v1795_v36 = vpop.eup %1794  ;;  %1816 = vpow2.f32 %v1117_v20  ;;  %v1119_v27 = vmul.f32 1.442695, %v1071_v25  ;;  %v996_v29 = vadd.f32 %v995_v13, %v835_v28  ;;  %v1549_v37 = vadd.f32 %v1548_v32, %v1547_v22 }
 0x139   : > { %v1797_v39 = vpop.eup %1796  ;;  %1248 = vst [vmem:[%s2128_s12 + $0x8] sm:$0xff] %v1795_v36  ;;  %1818 = vrcp.f32 %v1162_v30  ;;  %v1550_v40 = vpop.f32.mrf.mxu0 }
 0x13a   : > { %v2143_v43 = vpop.f32.mrf.mxu1  ;;  %v1799_v44 = vpop.eup %1798  ;;  %1253 = vst [vmem:[%s2128_s12 + $0x30] sm:$0xff] %v1797_v39  ;;  %1820 = vpow2.f32 %v1119_v27  ;;  %v1072_v46 = vsub.f32 0.0, %v996_v29  ;;  %v840_v47 = vadd.f32 %v1549_v37, %v2105_v42 }
 0x13b   : > { %v1801_v48 = vpop.eup %1800  ;;  %v1160_v45 = vadd.f32 1.0, %v1799_v44  ;;  %v1551_v49 = vpop.f32.mrf.mxu0 }
 0x13c   : > { %v2147_v50 = vpop.f32.mrf.mxu1  ;;  %v1803_v52 = vpop.eup %1802  ;;  %1251 = vst [vmem:[%s2128_s12 + $0x20] sm:$0xff] %v1801_v48  ;;  %v1121_v54 = vmul.f32 1.442695, %v1072_v46  ;;  %v1001_v55 = vadd.f32 %v2123_v53, %v840_v47  ;;  %v1552_v57 = vadd.f32 %v1551_v49, %v1550_v40 }
 0x13d   : > { %v1805_v59 = vpop.eup %1804  ;;  %1822 = vrcp.f32 %v1160_v45  ;;  %v1163_v62 = vadd.f32 1.0, %v1803_v52  ;;  %v1553_v0 = vpop.f32.mrf.mxu0 }
 0x13e   : > { %v1637_v6 = vpop.f32.mrf.mxu1  ;;  %1254 = vst [vmem:[%s2128_s12 + $0x38] sm:$0xff] %v1805_v59  ;;  %1824 = vpow2.f32 %v1121_v54  ;;  %v1073_v1 = vsub.f32 0.0, %v1001_v55  ;;  %v843_v53 = vadd.f32 %v1552_v57, %v2105_v42 }
 0x13f   : > { %v1033_v2 = vadd.f32 %v1637_v6, %v872_v58  ;;  %v1807_v3 = vpop.eup %1806  ;;  %1826 = vrcp.f32 %v1163_v62  ;;  %v1554_v16 = vpop.f32.mrf.mxu0 }
 0x140   : > { %v1024_v4 = vpop.f32.mrf.mxu1  ;;  %v1809_v41 = vpop.eup %1808  ;;  %v1165_v56 = vadd.f32 1.0, %v1807_v3  ;;  %v1123_v5 = vmul.f32 1.442695, %v1073_v1  ;;  %v1004_v7 = vadd.f32 %v2131_v63, %v843_v53  ;;  %v1555_v10 = vadd.f32 %v1554_v16, %v1553_v0 }
 0x141   : > { %v1081_v8 = vsub.f32 0.0, %v1033_v2  ;;  %v1811_v9 = vpop.eup %1810  ;;  %1252 = vst [vmem:[%s2128_s12 + $0x28] sm:$0xff] %v1809_v41  ;;  %v1025_v12 = vadd.f32 %v1024_v4, %v864_v51  ;;  %v1556_v13 = vpop.f32.mrf.mxu0 }
 0x142   : > { %v1638_v21 = vpop.f32.mrf.mxu1  ;;  %v1813_v15 = vpop.eup %1812  ;;  %1828 = vrcp.f32 %v1165_v56  ;;  %v1164_v26 = vadd.f32 1.0, %v1811_v9  ;;  %v1074_v17 = vsub.f32 0.0, %v1004_v7  ;;  %v848_v63 = vadd.f32 %v1555_v10, %v2105_v42 }
 0x143   : > { %v1139_v18 = vmul.f32 1.442695, %v1081_v8  ;;  %1257 = vst [vmem:[%s2128_s12 + $0x50] sm:$0xff] %v1813_v15  ;;  %1830 = vpow2.f32 %v1123_v5  ;;  %v1079_v19 = vsub.f32 0.0, %v1025_v12  ;;  %v1036_v20 = vadd.f32 %v1638_v21, %v875_v33  ;;  %v1557_v22 = vpop.f32.mrf.mxu0 }
 0x144   : > { %v1027_v24 = vpop.f32.mrf.mxu1  ;;  %v1815_v25 = vpop.eup %1814  ;;  %1832 = vrcp.f32 %v1164_v26  ;;  %v1125_v28 = vmul.f32 1.442695, %v1074_v17  ;;  %v1558_v30 = vadd.f32 %v1557_v22, %v1556_v13  ;;  %v1009_v27 = vadd.f32 %v2140_v34, %v848_v63 }
 0x145   : > { %v1028_v32 = vadd.f32 %v1027_v24, %v867_v35  ;;  %v1817_v36 = vpop.eup %1816  ;;  %1255 = vst [vmem:[%s2128_s12 + $0x40] sm:$0xff] %v1815_v25  ;;  %1834 = vpow2.f32 %v1139_v18  ;;  %v1135_v29 = vmul.f32 1.442695, %v1079_v19  ;;  %v1082_v37 = vsub.f32 0.0, %v1036_v20  ;;  %v1559_v39 = vpop.f32.mrf.mxu0 }
 0x146   : > { %v1641_v40 = vpop.f32.mrf.mxu1  ;;  %v1819_v44 = vpop.eup %1818  ;;  %v1166_v46 = vadd.f32 1.0, %v1817_v36  ;;  %1836 = vpow2.f32 %v1125_v28  ;;  %v851_v47 = vadd.f32 %v1558_v30, %v2105_v42  ;;  %v1075_v49 = vsub.f32 0.0, %v1009_v27 }
 0x147   : > { %v1080_v48 = vsub.f32 0.0, %v1028_v32  ;;  %v1821_v45 = vpop.eup %1820  ;;  %1258 = vst [vmem:[%s2128_s12 + $0x58] sm:$0xff] %v1819_v44  ;;  %1838 = vpow2.f32 %v1135_v29  ;;  %v1141_v51 = vmul.f32 1.442695, %v1082_v37  ;;  %v1049_v52 = vadd.f32 %v1641_v40, %v888_v14  ;;  %v1560_v54 = vpop.f32.mrf.mxu0 }
 0x148   : > { %v1040_v55 = vpop.f32.mrf.mxu1  ;;  %1840 = vrcp.f32 %v1166_v46  ;;  %v1167_v34 = vadd.f32 1.0, %v1821_v45  ;;  %v1012_v57 = vadd.f32 %v2147_v50, %v851_v47  ;;  %v1127_v59 = vmul.f32 1.442695, %v1075_v49 }
 0x149   : > { %v1137_v58 = vmul.f32 1.442695, %v1080_v48  ;;  %1842 = vpow2.f32 %v1141_v51  ;;  %v1085_v60 = vsub.f32 0.0, %v1049_v52  ;;  %v1561_v61 = vadd.f32 %v1560_v54, %v1559_v39  ;;  %v1562_v62 = vpop.f32.mrf.mxu0 }
 0x14a   : > { %v1642_v0 = vpop.f32.mrf.mxu1  ;;  %v1823_v6 = vpop.eup %1822  ;;  %1844 = vrcp.f32 %v1167_v34  ;;  %v1076_v1 = vsub.f32 0.0, %v1012_v57  ;;  %v1041_v53 = vadd.f32 %v1040_v55, %v2167_v38  ;;  %v883_v33 = vadd.f32 %v2092_v31, %v2105_v42 }
 0x14b   : > { %v1052_v2 = vadd.f32 %v1642_v0, %v891_v11  ;;  %v1825_v3 = vpop.eup %1824  ;;  %1256 = vst [vmem:[%s2128_s12 + $0x48] sm:$0xff] %v1823_v6  ;;  %1846 = vpow2.f32 %v1127_v59  ;;  %v1147_v16 = vmul.f32 1.442695, %v1085_v60  ;;  %v856_v50 = vadd.f32 %v1561_v61, %v2105_v42  ;;  %v1563_v4 = vpop.f32.mrf.mxu0 }
 0x14c   : > { %v1043_v35 = vpop.f32.mrf.mxu1  ;;  %v1827_v41 = vpop.eup %1826  ;;  %v1168_v56 = vadd.f32 1.0, %v1825_v3  ;;  %v1129_v5 = vmul.f32 1.442695, %v1076_v1  ;;  %1848 = vpow2.f32 %v1137_v58  ;;  %v1083_v7 = vsub.f32 0.0, %v1041_v53 }
 0x14d   : > { %1259 = vst [vmem:[%s2128_s12 + $0x60] sm:$0xff] %v1827_v41  ;;  %1850 = vpow2.f32 %v1147_v16  ;;  %v1017_v38 = vadd.f32 %v2136_v23, %v856_v50  ;;  %v1086_v8 = vsub.f32 0.0, %v1052_v2  ;;  %v1564_v9 = vadd.f32 %v1563_v4, %v1562_v62 }
 0x14e   : > { %1852 = vrcp.f32 %v1168_v56  ;;  %v1143_v10 = vmul.f32 1.442695, %v1083_v7  ;;  %v1044_v12 = vadd.f32 %v1043_v35, %v883_v33 }
 0x14f   : > { %v1829_v13 = vpop.eup %1828  ;;  %1854 = vpow2.f32 %v1129_v5  ;;  %v1077_v31 = vsub.f32 0.0, %v1017_v38  ;;  %v1149_v21 = vmul.f32 1.442695, %v1086_v8  ;;  %v859_v14 = vadd.f32 %v1564_v9, %v2105_v42 }
 0x150   : > { %v1831_v11 = vpop.eup %1830  ;;  %1261 = vst [vmem:[%s2128_s12 + $0x70] sm:$0xff] %v1829_v13  ;;  %1856 = vpow2.f32 %v1143_v10  ;;  %v1084_v63 = vsub.f32 0.0, %v1044_v12 }
 0x151   : > { %v1833_v15 = vpop.eup %1832  ;;  %v1169_v26 = vadd.f32 1.0, %v1831_v11  ;;  %v1131_v17 = vmul.f32 1.442695, %v1077_v31  ;;  %1858 = vpow2.f32 %v1149_v21  ;;  %v1020_v23 = vadd.f32 %v2143_v43, %v859_v14 }
 0x152   : > { %v1835_v18 = vpop.eup %1834  ;;  %1260 = vst [vmem:[%s2128_s12 + $0x68] sm:$0xff] %v1833_v15  ;;  %v1145_v43 = vmul.f32 1.442695, %v1084_v63 }
 0x153   : > { %v1837_v19 = vpop.eup %1836  ;;  %1860 = vrcp.f32 %v1169_v26  ;;  %v1177_v20 = vadd.f32 1.0, %v1835_v18  ;;  %v1078_v22 = vsub.f32 0.0, %v1020_v23 }
 0x154   : > { %v1839_v24 = vpop.eup %1838  ;;  %v1170_v42 = vadd.f32 1.0, %v1837_v19  ;;  %1862 = vpow2.f32 %v1131_v17 }
 0x155   : > { %v1841_v25 = vpop.eup %1840  ;;  %1864 = vrcp.f32 %v1177_v20  ;;  %v1175_v28 = vadd.f32 1.0, %v1839_v24  ;;  %v1133_v30 = vmul.f32 1.442695, %v1078_v22 }
 0x156   : > { %v1843_v32 = vpop.eup %1842  ;;  %1262 = vst [vmem:[%s2128_s12 + $0x78] sm:$0xff] %v1841_v25  ;;  %1866 = vrcp.f32 %v1170_v42 }
 0x157   : > { %v1845_v36 = vpop.eup %1844  ;;  %1868 = vrcp.f32 %v1175_v28  ;;  %v1178_v27 = vadd.f32 1.0, %v1843_v32 }
 0x158   : > { %v1847_v29 = vpop.eup %1846  ;;  %1263 = vst [vmem:[%s2128_s12 + $0x80] sm:$0xff] %v1845_v36  ;;  %1870 = vpow2.f32 %v1133_v30 }
 0x159   : > { %v1849_v37 = vpop.eup %1848  ;;  %v1171_v39 = vadd.f32 1.0, %v1847_v29  ;;  %1872 = vrcp.f32 %v1178_v27 }
 0x15a   : > { %v1851_v40 = vpop.eup %1850  ;;  %v1176_v44 = vadd.f32 1.0, %v1849_v37  ;;  %1874 = vpow2.f32 %v1145_v43 }
 0x15b   : > { %v1853_v46 = vpop.eup %1852  ;;  %1876 = vrcp.f32 %v1171_v39  ;;  %v1181_v47 = vadd.f32 1.0, %v1851_v40 }
 0x15c   : > { %v1855_v48 = vpop.eup %1854  ;;  %1264 = vst [vmem:[%s2128_s12 + $0x88] sm:$0xff] %v1853_v46  ;;  %1878 = vrcp.f32 %v1176_v44 }
 0x15d   : > { %v1857_v45 = vpop.eup %1856  ;;  %v1172_v49 = vadd.f32 1.0, %v1855_v48  ;;  %1880 = vrcp.f32 %v1181_v47 }
 0x15e   : > { %v1859_v51 = vpop.eup %1858  ;;  %v1179_v52 = vadd.f32 1.0, %v1857_v45 }
 0x15f   : > { %1882 = vrcp.f32 %v1172_v49  ;;  %v1182_v54 = vadd.f32 1.0, %v1859_v51 }
 0x160   : > { %v1861_v55 = vpop.eup %1860  ;;  %1884 = vrcp.f32 %v1179_v52 }
 0x161   : > { %v1863_v34 = vpop.eup %1862  ;;  %1265 = vst [vmem:[%s2128_s12 + $0x90] sm:$0xff] %v1861_v55  ;;  %1886 = vrcp.f32 %v1182_v54 }
 0x162   : > { %v1865_v57 = vpop.eup %1864  ;;  %v1173_v58 = vadd.f32 1.0, %v1863_v34 }
 0x163   : > { %v1867_v59 = vpop.eup %1866  ;;  %1273 = vst [vmem:[%s2128_s12 + $0xd0] sm:$0xff] %v1865_v57 }
 0x164   : > { %v1869_v60 = vpop.eup %1868  ;;  %1266 = vst [vmem:[%s2128_s12 + $0x98] sm:$0xff] %v1867_v59  ;;  %1888 = vrcp.f32 %v1173_v58 }
 0x165   : > { %v1871_v61 = vpop.eup %1870  ;;  %1271 = vst [vmem:[%s2128_s12 + $0xc0] sm:$0xff] %v1869_v60 }
 0x166   : > { %v1873_v62 = vpop.eup %1872  ;;  %v1174_v0 = vadd.f32 1.0, %v1871_v61 }
 0x167   : > { %v1875_v6 = vpop.eup %1874  ;;  %1274 = vst [vmem:[%s2128_s12 + $0xd8] sm:$0xff] %v1873_v62 }
 0x168   : > { %v1877_v1 = vpop.eup %1876  ;;  %1890 = vrcp.f32 %v1174_v0  ;;  %v1180_v53 = vadd.f32 1.0, %v1875_v6 }
 0x169   : > { %v1879_v2 = vpop.eup %1878  ;;  %1267 = vst [vmem:[%s2128_s12 + $0xa0] sm:$0xff] %v1877_v1 }
 0x16a   : > { %v1881_v3 = vpop.eup %1880  ;;  %1272 = vst [vmem:[%s2128_s12 + $0xc8] sm:$0xff] %v1879_v2  ;;  %1892 = vrcp.f32 %v1180_v53 }
 0x16b   : > { %1277 = vst [vmem:[%s2128_s12 + $0xf0] sm:$0xff] %v1881_v3 }
 0x16c   : > { %v1883_v16 = vpop.eup %1882 }
 0x16d   : > { %v1885_v50 = vpop.eup %1884  ;;  %1268 = vst [vmem:[%s2128_s12 + $0xa8] sm:$0xff] %v1883_v16 }
 0x16e   : > { %v1887_v4 = vpop.eup %1886  ;;  %1275 = vst [vmem:[%s2128_s12 + $0xe0] sm:$0xff] %v1885_v50 }
 0x16f   : > { %1278 = vst [vmem:[%s2128_s12 + $0xf8] sm:$0xff] %v1887_v4 }
 0x171   : > { %v1889_v33 = vpop.eup %1888 }
 0x172   : > { %1269 = vst [vmem:[%s2128_s12 + $0xb0] sm:$0xff] %v1889_v33 }
 0x175   : > { %v1891_v35 = vpop.eup %1890 }
 0x176   : > { %1270 = vst [vmem:[%s2128_s12 + $0xb8] sm:$0xff] %v1891_v35 }
 0x177   : > { %v1893_v41 = vpop.eup %1892 }
 0x178   : > { %1276 = vst [vmem:[%s2128_s12 + $0xe8] sm:$0xff] %v1893_v41 }
 0x179 PF: > { %s13_s14 = sadd.s32 1, %s1916_s14   ;;  %s2221_s12 = smov %s1912_s13 }
 0x17a   : > { %p10_p5 = scmp.ge.s32.totalorder %s13_s14, 4   ;;  %s2222_s13 = smov %s2224_s15 }
 0x17c   :  { %12 = sbr.rel (!%p10_p5) target bundleno = 2 (0x2), region = 68 }

// kernel: _unoranic_core.17
= control target key start
LH: loop header
LB: loop body
LE: loop exit
PB: predicated region body
PF: predicated region fallthrough
CT: control target
= control target key end

     0   :  { %s1128_s0 = inlined_call_operand.vmem [shape: f32[16,128], index: 0, kind: input, shape index: {}]   ;;  %s1129_s1 = inlined_call_operand.vmem [shape: f32[16,128], index: 1, kind: input, shape index: {}]   ;;  %s1130_s2 = inlined_call_operand.vmem [shape: f32[16,128], index: 2, kind: input, shape index: {}]   ;;  %s1131_s3 = inlined_call_operand.vmem [shape: f32[16,128], index: 3, kind: input, shape index: {}]   ;;  %s1132_s4 = inlined_call_operand.hbm [shape: f32[9], index: 4, kind: output, shape index: {}]  }
   0x1   :  { %1139 = sst [smem:[#allocation8_spill]] %s1132_s4 }
   0x2   :  { %v964_v0 = vld [vmem:[%s1128_s0] sm:$0xff] }
   0x3   :  { %v969_v1 = vld [vmem:[%s1130_s2] sm:$0xff]  ;;  %199 = vadd.xlane.f32.xlu0 %v964_v0  ;;  %v80_v2 = vmul.f32 %v964_v0, %v964_v0 }
   0x4   :  { %9 = vsyncpa [#allocation4], 0  ;;  %v89_v3 = vmul.f32 %v969_v1, %v969_v1  ;;  %v98_v4 = vmul.f32 %v969_v1, %v964_v0  ;;  %v982_v5 = vld [vmem:[%s1128_s0 + $0x8] sm:$0xff]  ;;  %v1000_v10 = vld [vmem:[%s1129_s1] sm:$0xff] }
   0x5   :  { %217 = vadd.xlane.f32.xlu1 %v80_v2  ;;  %v987_v6 = vld [vmem:[%s1130_s2 + $0x8] sm:$0xff]  ;;  %v81_v7 = vmul.f32 %v982_v5, %v982_v5  ;;  %v1005_v11 = vld [vmem:[%s1131_s3] sm:$0xff]  ;;  %v121_v12 = vmul.f32 %v1000_v10, %v1000_v10 }
   0x6   :  { %v90_v8 = vmul.f32 %v987_v6, %v987_v6  ;;  %v99_v9 = vmul.f32 %v987_v6, %v982_v5  ;;  %v130_v13 = vmul.f32 %v1005_v11, %v1005_v11  ;;  %v139_v14 = vmul.f32 %v1005_v11, %v1000_v10  ;;  %v1018_v50 = vld [vmem:[%s1129_s1 + $0x8] sm:$0xff] }
   0x7   :  { %208 = vadd.xlane.f32.xlu0 %v969_v1  ;;  %v1024_v51 = vld [vmem:[%s1131_s3 + $0x8] sm:$0xff]  ;;  %v122_v52 = vmul.f32 %v1018_v50, %v1018_v50 }
   0x8   :  { %v131_v53 = vmul.f32 %v1024_v51, %v1024_v51  ;;  %v140_v54 = vmul.f32 %v1024_v51, %v1018_v50 }
   0x9   :  { %226 = vadd.xlane.f32.xlu1 %v89_v3 }
   0xb   :  { %235 = vadd.xlane.f32.xlu0 %v98_v4 }
   0xd   :  { %285 = vadd.xlane.f32.xlu1 %v982_v5 }
   0xf   :  { %294 = vadd.xlane.f32.xlu0 %v987_v6 }
  0x11   :  { %303 = vadd.xlane.f32.xlu1 %v81_v7 }
  0x13   :  { %312 = vadd.xlane.f32.xlu0 %v90_v8 }
  0x15   :  { %321 = vadd.xlane.f32.xlu1 %v99_v9 }
  0x17   :  { %403 = vadd.xlane.f32.xlu0 %v1000_v10 }
  0x19   :  { %412 = vadd.xlane.f32.xlu1 %v1005_v11 }
  0x1b   :  { %421 = vadd.xlane.f32.xlu0 %v121_v12 }
  0x1d   :  { %430 = vadd.xlane.f32.xlu1 %v130_v13 }
  0x1f   :  { %439 = vadd.xlane.f32.xlu0 %v139_v14 }
  0x21   :  { %489 = vadd.xlane.f32.xlu1 %v1018_v50 }
  0x23   :  { %498 = vadd.xlane.f32.xlu0 %v1024_v51 }
  0x25   :  { %507 = vadd.xlane.f32.xlu1 %v122_v52 }
  0x27   :  { %516 = vadd.xlane.f32.xlu0 %v131_v53 }
  0x29   :  { %525 = vadd.xlane.f32.xlu1 %v140_v54 }
  0x8c   :  { %v200_v15 = vpop.xlane.xlu0 %199 }
  0x8d   :  { %v201_v16 = vrot.slane %v200_v15, 4 }
  0x8e   :  { %v218_v17 = vpop.xlane.xlu1 %217 }
  0x8f   :  { %v202_v18 = vadd.f32 %v201_v16, %v200_v15  ;;  %v219_v19 = vrot.slane %v218_v17, 4 }
  0x90   :  { %v209_v20 = vpop.xlane.xlu0 %208 }
  0x91   :  { %v203_v21 = vrot.slane %v202_v18, 2  ;;  %v220_v22 = vadd.f32 %v219_v19, %v218_v17  ;;  %v210_v23 = vrot.slane %v209_v20, 4 }
  0x92   :  { %v227_v24 = vpop.xlane.xlu1 %226 }
  0x93   :  { %v221_v25 = vrot.slane %v220_v22, 2  ;;  %v211_v26 = vadd.f32 %v210_v23, %v209_v20  ;;  %v228_v27 = vrot.slane %v227_v24, 4  ;;  %v204_v28 = vadd.f32 %v203_v21, %v202_v18 }
  0x94   :  { %v236_v29 = vpop.xlane.xlu0 %235 }
  0x95   :  { %v212_v30 = vrot.slane %v211_v26, 2  ;;  %v229_v31 = vadd.f32 %v228_v27, %v227_v24  ;;  %v237_v32 = vrot.slane %v236_v29, 4  ;;  %v205_v33 = vrot.slane %v204_v28, 1 }
  0x96   :  { %v222_v34 = vadd.f32 %v221_v25, %v220_v22  ;;  %v286_v55 = vpop.xlane.xlu1 %285 }
  0x97   :  { %v230_v35 = vrot.slane %v229_v31, 2  ;;  %v238_v36 = vadd.f32 %v237_v32, %v236_v29  ;;  %v206_v37 = vadd.f32 %v205_v33, %v204_v28  ;;  %v213_v38 = vadd.f32 %v212_v30, %v211_v26 }
  0x98   :  { %v223_v39 = vrot.slane %v222_v34, 1  ;;  %v295_v56 = vpop.xlane.xlu0 %294  ;;  %v287_v58 = vrot.slane %v286_v55, 4 }
  0x99   :  { %v239_v40 = vrot.slane %v238_v36, 2  ;;  %814 = vpush %v206_v37  ;;  %v214_v41 = vrot.slane %v213_v38, 1  ;;  %v231_v42 = vadd.f32 %v230_v35, %v229_v31  ;;  %v296_v60 = vrot.slane %v295_v56, 4 }
  0x9a   :  { %v224_v46 = vadd.f32 %v223_v39, %v222_v34  ;;  %v304_v57 = vpop.xlane.xlu1 %303  ;;  %v288_v2 = vadd.f32 %v287_v58, %v286_v55  ;;  %v60_v39 = vsub.f32 %v964_v0, %v1000_v10 }
  0x9b   :  { %v215_v43 = vadd.f32 %v214_v41, %v213_v38  ;;  %v232_v44 = vrot.slane %v231_v42, 1  ;;  %v240_v45 = vadd.f32 %v239_v40, %v238_v36  ;;  %v305_v62 = vrot.slane %v304_v57, 4 }
  0x9c   :  { %v313_v59 = vpop.xlane.xlu0 %312  ;;  %v297_v4 = vadd.f32 %v296_v60, %v295_v56  ;;  %v289_v12 = vrot.slane %v288_v2, 2  ;;  %v62_v38 = vsub.f32 %v969_v1, %v1005_v11  ;;  %607 = vadd.xlane.f32.xlu0 %v60_v39  ;;  %v162_v41 = vmul.f32 %v60_v39, %v60_v39 }
  0x9d   :  { %816 = vpush %v215_v43  ;;  %v233_v47 = vadd.f32 %v232_v44, %v231_v42  ;;  %v241_v48 = vrot.slane %v240_v45, 1  ;;  %v314_v63 = vrot.slane %v313_v59, 4  ;;  %v306_v8 = vadd.f32 %v305_v62, %v304_v57 }
  0x9e   :  { %818 = vpush %v224_v46  ;;  %v322_v61 = vpop.xlane.xlu1 %321  ;;  %v298_v14 = vrot.slane %v297_v4, 2  ;;  %v290_v18 = vadd.f32 %v289_v12, %v288_v2  ;;  %616 = vadd.xlane.f32.xlu1 %v62_v38  ;;  %v171_v40 = vmul.f32 %v62_v38, %v62_v38  ;;  %v180_v42 = vmul.f32 %v62_v38, %v60_v39 }
  0x9f   :  { %820 = vpush %v233_v47  ;;  %v242_v49 = vadd.f32 %v241_v48, %v240_v45  ;;  %v323_v3 = vrot.slane %v322_v61, 4  ;;  %v315_v9 = vadd.f32 %v314_v63, %v313_v59  ;;  %v307_v15 = vrot.slane %v306_v8, 2 }
  0xa0   :  { %v299_v19 = vadd.f32 %v298_v14, %v297_v4  ;;  %v291_v22 = vrot.slane %v290_v18, 1  ;;  %625 = vadd.xlane.f32.xlu0 %v162_v41  ;;  %v404_v43 = vpop.xlane.xlu0 %403 }
  0xa1   :  { %822 = vpush %v242_v49  ;;  %v324_v13 = vadd.f32 %v323_v3, %v322_v61  ;;  %v316_v16 = vrot.slane %v315_v9, 2  ;;  %v308_v20 = vadd.f32 %v307_v15, %v306_v8  ;;  %v405_v47 = vrot.slane %v404_v43, 4 }
  0xa2   :  { %v300_v24 = vrot.slane %v299_v19, 1  ;;  %v292_v28 = vadd.f32 %v291_v22, %v290_v18  ;;  %634 = vadd.xlane.f32.xlu1 %v171_v40  ;;  %v413_v45 = vpop.xlane.xlu1 %412 }
  0xa3   :  { %v325_v17 = vrot.slane %v324_v13, 2  ;;  %v317_v21 = vadd.f32 %v316_v16, %v315_v9  ;;  %v309_v25 = vrot.slane %v308_v20, 1  ;;  %v414_v11 = vrot.slane %v413_v45, 4 }
  0xa4   :  { %v301_v30 = vadd.f32 %v300_v24, %v299_v19  ;;  %643 = vadd.xlane.f32.xlu0 %v180_v42  ;;  %v422_v44 = vpop.xlane.xlu0 %421  ;;  %v406_v49 = vadd.f32 %v405_v47, %v404_v43 }
  0xa5   :  { %v326_v23 = vadd.f32 %v325_v17, %v324_v13  ;;  %v318_v26 = vrot.slane %v317_v21, 1  ;;  %v310_v31 = vadd.f32 %v309_v25, %v308_v20  ;;  %v423_v0 = vrot.slane %v422_v44, 4 }
  0xa6   :  { %v431_v1 = vpop.xlane.xlu1 %430  ;;  %v415_v53 = vadd.f32 %v414_v11, %v413_v45  ;;  %v407_v57 = vrot.slane %v406_v49, 2 }
  0xa7   :  { %v327_v29 = vrot.slane %v326_v23, 1  ;;  %v319_v32 = vadd.f32 %v318_v26, %v317_v21  ;;  %v432_v48 = vrot.slane %v431_v1, 4  ;;  %v424_v54 = vadd.f32 %v423_v0, %v422_v44 }
  0xa8   :  { %v440_v46 = vpop.xlane.xlu0 %439  ;;  %v416_v58 = vrot.slane %v415_v53, 2  ;;  %v408_v62 = vadd.f32 %v407_v57, %v406_v49  ;;  %v61_v21 = vsub.f32 %v982_v5, %v1018_v50 }
  0xa9   :  { %v328_v33 = vadd.f32 %v327_v29, %v326_v23  ;;  %v441_v10 = vrot.slane %v440_v46, 4  ;;  %v433_v56 = vadd.f32 %v432_v48, %v431_v1  ;;  %v425_v59 = vrot.slane %v424_v54, 2 }
  0xaa   :  { %v417_v63 = vadd.f32 %v416_v58, %v415_v53  ;;  %693 = vadd.xlane.f32.xlu1 %v61_v21  ;;  %v163_v22 = vmul.f32 %v61_v21, %v61_v21  ;;  %v63_v23 = vsub.f32 %v987_v6, %v1024_v51  ;;  %v490_v5 = vpop.xlane.xlu1 %489 }
  0xab   :  { %v442_v55 = vadd.f32 %v441_v10, %v440_v46  ;;  %v434_v61 = vrot.slane %v433_v56, 2  ;;  %v426_v2 = vadd.f32 %v425_v59, %v424_v54  ;;  %v491_v51 = vrot.slane %v490_v5, 4 }
  0xac   :  { %v418_v8 = vrot.slane %v417_v63, 1  ;;  %702 = vadd.xlane.f32.xlu0 %v63_v23  ;;  %v172_v24 = vmul.f32 %v63_v23, %v63_v23  ;;  %v181_v25 = vmul.f32 %v63_v23, %v61_v21  ;;  %v499_v6 = vpop.xlane.xlu0 %498 }
  0xad   :  { %v443_v60 = vrot.slane %v442_v55, 2  ;;  %v435_v4 = vadd.f32 %v434_v61, %v433_v56  ;;  %v427_v12 = vrot.slane %v426_v2, 1 }
  0xae   :  { %v419_v17 = vadd.f32 %v418_v8, %v417_v63  ;;  %711 = vadd.xlane.f32.xlu1 %v163_v22  ;;  %v508_v50 = vpop.xlane.xlu1 %507 }
  0xaf   :  { %v444_v3 = vadd.f32 %v443_v60, %v442_v55  ;;  %v436_v15 = vrot.slane %v435_v4, 1  ;;  %v428_v18 = vadd.f32 %v427_v12, %v426_v2  ;;  %v509_v29 = vrot.slane %v508_v50, 4 }
  0xb0   :  { %720 = vadd.xlane.f32.xlu0 %v172_v24  ;;  %v517_v26 = vpop.xlane.xlu0 %516 }
  0xb1   :  { %v445_v13 = vrot.slane %v444_v3, 1  ;;  %v437_v20 = vadd.f32 %v436_v15, %v435_v4 }
  0xb2   :  { %729 = vadd.xlane.f32.xlu1 %v181_v25 }
  0xb3   :  { %v446_v19 = vadd.f32 %v445_v13, %v444_v3 }
  0xca   :  { %s815_s1 = spop %814 }
  0xcb   :  { %s1033_s29 = smul.f32 0.0009765625, %s815_s1 }
  0xcd   :  { %s257_s3 = smul.f32 %s1033_s29, %s1033_s29 }
  0xce   :  { %s269_s30 = smul.f32 2.0, %s1033_s29  ;;  %s817_s5 = spop %816 }
  0xcf   :  { %s253_s6 = smul.f32 0.0009765625, %s817_s5  ;;  %s819_s7 = spop %818 }
  0xd0   :  { %s256_s8 = smul.f32 0.0009765625, %s819_s7  ;;  %s1038_s9 = spop %820 }
  0xd1   :  { %s262_s10 = smul.f32 %s253_s6, %s253_s6 }
  0xd2   :  { %s267_s11 = smul.f32 %s253_s6, %s1033_s29  ;;  %s258_s12 = ssub.f32 %s256_s8, %s257_s3 }
  0xd3   :  { %s275_s13 = sadd.f32 %s262_s10, %s257_s3  ;;  %s261_s14 = smul.f32 0.0009765625, %s1038_s9 }
  0xd4   :  { %s823_s15 = spop %822  ;;  %s1042_s16 = smul.f32 %s269_s30, %s253_s6 }
  0xd5   :  { %s276_s17 = sadd.f32 0.0001, %s275_s13  ;;  %s244_s18 = smul.f32 2.0, %s823_s15 }
  0xd6   :  { %s263_s19 = ssub.f32 %s261_s14, %s262_s10  ;;  %s266_s21 = smul.f32 0.0009765625, %s823_s15 }
  0xd7   :  { %s1044_s20 = ssub.f32 %s819_s7, %s244_s18 }
  0xd8   :  { %s277_s22 = sadd.f32 %s263_s19, %s258_s12 }
  0xd9   :  { %s246_s0 = sadd.f32 %s1038_s9, %s1044_s20 }
  0xda   :  { %s278_s23 = sadd.f32 0.0009, %s277_s22 }
  0xdb   :  { %s268_s2 = ssub.f32 %s266_s21, %s267_s11 }
  0xdc   :  { %s279_s24 = smul.f32 %s278_s23, %s276_s17  ;;  %s271_s26 = sadd.f32 0.0001, %s1042_s16 }
  0xdd   :  { %s272_s25 = smul.f32 2.0, %s268_s2 }
  0xde   :  { %v280_v7 = vstv %s279_s24 }
  0xdf   :  { %900 = vrcp.f32 %v280_v7  ;;  %s273_s27 = sadd.f32 0.0009, %s272_s25  ;;  %v409_v7 = vrot.slane %v408_v62, 1 }
  0xe1   :  { %s1049_s28 = smul.f32 %s273_s27, %s271_s26  ;;  %v410_v16 = vadd.f32 %v409_v7, %v408_v62 }
  0xe3   :  { %1140 = sst [smem:[#allocation6_spill]] %s1049_s28 }
  0xe4   :  { %s1143_s9 = sld [smem:[#allocation6_spill]] }
  0xec   :  { %v901_v27 = vpop.eup %900 }
  0xed   :  { %824 = vpush %v901_v27  ;;  %v500_v27 = vrot.slane %v499_v6, 4 }
  0xee   :  { %826 = vpush %v292_v28  ;;  %v526_v28 = vpop.xlane.xlu1 %525 }
  0xef   :  { %828 = vpush %v301_v30  ;;  %v518_v30 = vrot.slane %v517_v26, 4 }
  0xf0   :  { %830 = vpush %v310_v31  ;;  %v492_v31 = vadd.f32 %v491_v51, %v490_v5 }
  0xf1   :  { %832 = vpush %v319_v32  ;;  %v527_v32 = vrot.slane %v526_v28, 4 }
  0xf2   :  { %834 = vpush %v328_v33  ;;  %v501_v33 = vadd.f32 %v500_v27, %v499_v6 }
  0xf3   :  { %v528_v38 = vadd.f32 %v527_v32, %v526_v28 }
  0xf4   :  { %v502_v39 = vrot.slane %v501_v33, 2 }
  0xf5   :  { %v529_v42 = vrot.slane %v528_v38, 2 }
  0xf6   :  { %v503_v44 = vadd.f32 %v502_v39, %v501_v33 }
  0xf7   :  { %v530_v1 = vadd.f32 %v529_v42, %v528_v38 }
  0xf8   :  { %v504_v11 = vrot.slane %v503_v44, 1 }
  0xfa   :  { %v505_v53 = vadd.f32 %v504_v11, %v503_v44 }
 0x11e   :  { %s1051_s1 = spop %824 }
 0x11f   :  { %1141 = sst [smem:[#allocation7_spill]] %s1051_s1  ;;  %s827_s3 = spop %826 }
 0x120   :  { %s336_s30 = smul.f32 0.0009765625, %s827_s3  ;;  %s829_s5 = spop %828 }
 0x121   :  { %s339_s6 = smul.f32 0.0009765625, %s829_s5  ;;  %s831_s7 = spop %830 }
 0x122   :  { %s343_s8 = smul.f32 %s336_s30, %s336_s30  ;;  %s833_s11 = spop %832 }
 0x123   :  { %s355_s10 = smul.f32 2.0, %s336_s30  ;;  %s835_s14 = spop %834 }
 0x124   :  { %s348_s12 = smul.f32 %s339_s6, %s339_s6  ;;  %s1135_s1 = smov 1e-12  }
 0x125   :  { %s353_s13 = smul.f32 %s339_s6, %s336_s30  ;;  %v608_v61 = vpop.xlane.xlu0 %607 }
 0x126   :  { %s361_s15 = sadd.f32 %s348_s12, %s343_s8  ;;  %s342_s16 = smul.f32 0.0009765625, %s831_s7  ;;  %v609_v3 = vrot.slane %v608_v61, 4 }
 0x127   :  { %s347_s17 = smul.f32 0.0009765625, %s833_s11  ;;  %v617_v63 = vpop.xlane.xlu1 %616 }
 0x128   :  { %s362_s18 = sadd.f32 0.0001, %s361_s15  ;;  %s330_s19 = smul.f32 2.0, %s835_s14  ;;  %v618_v7 = vrot.slane %v617_v63, 4  ;;  %v610_v13 = vadd.f32 %v609_v3, %v608_v61 }
 0x129   :  { %s344_s21 = ssub.f32 %s342_s16, %s343_s8  ;;  %s356_s23 = smul.f32 %s355_s10, %s339_s6  ;;  %v626_v62 = vpop.xlane.xlu0 %625 }
 0x12a   :  { %s349_s22 = ssub.f32 %s347_s17, %s348_s12  ;;  %s352_s27 = smul.f32 0.0009765625, %s835_s14  ;;  %v627_v8 = vrot.slane %v626_v62, 4  ;;  %v619_v15 = vadd.f32 %v618_v7, %v617_v63 }
 0x12b   :  { %s331_s2 = ssub.f32 %s831_s7, %s330_s19  ;;  %v635_v4 = vpop.xlane.xlu1 %634 }
 0x12c   :  { %s363_s24 = sadd.f32 %s349_s22, %s344_s21  ;;  %v636_v12 = vrot.slane %v635_v4, 4 }
 0x12d   :  { %s332_s25 = sadd.f32 %s833_s11, %s331_s2  ;;  %v644_v2 = vpop.xlane.xlu0 %643 }
 0x12e   :  { %s364_s26 = sadd.f32 0.0009, %s363_s24 }
 0x12f   :  { %s333_s3 = sadd.f32 %s332_s25, %s246_s0 }
 0x130   :  { %s365_s5 = smul.f32 %s364_s26, %s362_s18  ;;  %s354_s29 = ssub.f32 %s352_s27, %s353_s13 }
 0x131   :  { %s373_s4 = smul.f32 0.00048828125, %s333_s3  ;;  %s357_s28 = sadd.f32 0.0001, %s356_s23 }
 0x132   :  { %v366_v34 = vstv %s365_s5  ;;  %s358_s30 = smul.f32 2.0, %s354_s29 }
 0x133   :  { %902 = vrcp.f32 %v366_v34  ;;  %s374_s15 = smax.f32 %s1135_s1, %s373_s4  ;;  %385 = sst [smem:[#allocation3]] %s373_s4 }
 0x134   :  { %v375_v35 = vstv %s374_s15  ;;  %s359_s6 = sadd.f32 0.0009, %s358_s30 }
 0x135   :  { %904 = vrcp.f32 %v375_v35  ;;  %s1142_s4 = sld [smem:[#allocation7_spill]]  ;;  %v510_v35 = vadd.f32 %v509_v29, %v508_v50  ;;  %v703_v38 = vpop.xlane.xlu0 %702 }
 0x136   :  { %s1059_s7 = smul.f32 %s359_s6, %s357_s28  ;;  %v704_v42 = vrot.slane %v703_v38, 4 }
 0x137   :  { %v511_v40 = vrot.slane %v510_v35, 2 }
 0x139   :  { %v512_v45 = vadd.f32 %v511_v40, %v510_v35 }
 0x13b   :  { %s1144_s29 = smul.f32 %s1142_s4, %s1143_s9  ;;  %v513_v0 = vrot.slane %v512_v45, 1 }
 0x13d   :  { %v514_v54 = vadd.f32 %v513_v0, %v512_v45 }
 0x140   :  { %v903_v36 = vpop.eup %902 }
 0x141   :  { %836 = vpush %v903_v36  ;;  %v519_v36 = vadd.f32 %v518_v30, %v517_v26 }
 0x142   :  { %v905_v37 = vpop.eup %904 }
 0x143   :  { %838 = vpush %v905_v37  ;;  %v493_v37 = vrot.slane %v492_v31, 2  ;;  %v520_v41 = vrot.slane %v519_v36, 2 }
 0x145   :  { %v494_v43 = vadd.f32 %v493_v37, %v492_v31  ;;  %v521_v46 = vadd.f32 %v520_v41, %v519_v36  ;;  %v694_v37 = vpop.xlane.xlu1 %693  ;;  %v721_v41 = vpop.xlane.xlu0 %720 }
 0x146   :  { %v695_v40 = vrot.slane %v694_v37, 4  ;;  %v722_v45 = vrot.slane %v721_v41, 4 }
 0x147   :  { %v495_v47 = vrot.slane %v494_v43, 1  ;;  %v522_v10 = vrot.slane %v521_v46, 1 }
 0x149   :  { %v496_v49 = vadd.f32 %v495_v47, %v494_v43  ;;  %v523_v55 = vadd.f32 %v522_v10, %v521_v46  ;;  %v712_v39 = vpop.xlane.xlu1 %711  ;;  %v696_v46 = vadd.f32 %v695_v40, %v694_v37  ;;  %v723_v10 = vadd.f32 %v722_v45, %v721_v41 }
 0x14a   :  { %v713_v44 = vrot.slane %v712_v39, 4 }
 0x14c   :  { %v714_v0 = vadd.f32 %v713_v44, %v712_v39 }
 0x14d   :  { %v730_v43 = vpop.xlane.xlu1 %729 }
 0x14e   :  { %v731_v47 = vrot.slane %v730_v43, 4 }
 0x172   :  { %s837_s20 = spop %836 }
 0x173   :  { %s369_s0 = smul.f32 %s837_s20, %s1059_s7 }
 0x174   :  { %s839_s28 = spop %838 }
 0x175   :  { %s370_s8 = sadd.f32 %s369_s0, %s1144_s29  ;;  %v378_v52 = vstv %s839_s28 }
 0x176   :  { %906 = vlog2.f32 %v378_v52  ;;  %v531_v52 = vrot.slane %v530_v1, 1 }
 0x177   :  { %s388_s10 = smul.f32 0.5, %s370_s8 }
 0x178   :  { %v532_v56 = vadd.f32 %v531_v52, %v530_v1  ;;  %v705_v1 = vadd.f32 %v704_v42, %v703_v38 }
 0x179   :  { %390 = sst [smem:[#allocation3 + $0x1]] %s388_s10 }
 0x17a   :  { %v706_v52 = vrot.slane %v705_v1, 2 }
 0x183   :  { %v907_v9 = vpop.eup %906 }
 0x184   :  { %v380_v14 = vmul.f32 0.6931472, %v907_v9  ;;  %v645_v9 = vrot.slane %v644_v2, 4 }
 0x186   :  { %840 = vpush %v380_v14 }
 0x187   :  { %842 = vpush %v410_v16  ;;  %v628_v16 = vadd.f32 %v627_v8, %v626_v62 }
 0x188   :  { %844 = vpush %v419_v17  ;;  %v646_v17 = vadd.f32 %v645_v9, %v644_v2 }
 0x189   :  { %846 = vpush %v428_v18  ;;  %v637_v18 = vadd.f32 %v636_v12, %v635_v4  ;;  %v629_v21 = vrot.slane %v628_v16, 2 }
 0x18a   :  { %848 = vpush %v437_v20  ;;  %v620_v20 = vrot.slane %v619_v15, 2  ;;  %v647_v22 = vrot.slane %v646_v17, 2 }
 0x18b   :  { %850 = vpush %v446_v19  ;;  %v611_v19 = vrot.slane %v610_v13, 2  ;;  %v638_v23 = vrot.slane %v637_v18, 2  ;;  %v630_v5 = vadd.f32 %v629_v21, %v628_v16 }
 0x18c   :  { %v621_v25 = vadd.f32 %v620_v20, %v619_v15  ;;  %v648_v6 = vadd.f32 %v647_v22, %v646_v17 }
 0x18d   :  { %v612_v24 = vadd.f32 %v611_v19, %v610_v13  ;;  %v639_v50 = vadd.f32 %v638_v23, %v637_v18  ;;  %v631_v28 = vrot.slane %v630_v5, 1 }
 0x18e   :  { %v622_v26 = vrot.slane %v621_v25, 1  ;;  %v649_v29 = vrot.slane %v648_v6, 1 }
 0x18f   :  { %v613_v51 = vrot.slane %v612_v24, 1  ;;  %v640_v31 = vrot.slane %v639_v50, 1 }
 0x190   :  { %v623_v33 = vadd.f32 %v622_v26, %v621_v25  ;;  %v650_v35 = vadd.f32 %v649_v29, %v648_v6 }
 0x191   :  { %v614_v32 = vadd.f32 %v613_v51, %v612_v24  ;;  %v641_v36 = vadd.f32 %v640_v31, %v639_v50 }
 0x1b7   :  { %s841_s11 = spop %840 }
 0x1b8   :  { %s382_s12 = smul.f32 0.4342945, %s841_s11  ;;  %s843_s13 = spop %842 }
 0x1b9   :  { %s1073_s14 = smul.f32 0.0009765625, %s843_s13  ;;  %s845_s16 = spop %844 }
 0x1ba   :  { %s383_s17 = smul.f32 10.0, %s382_s12  ;;  %s847_s19 = spop %846 }
 0x1bb   :  { %s461_s18 = smul.f32 %s1073_s14, %s1073_s14  ;;  %s1078_s23 = spop %848 }
 0x1bc   :  { %392 = sst [smem:[#allocation3 + $0x2]] %s383_s17  ;;  %s473_s21 = smul.f32 2.0, %s1073_s14 }
 0x1bd   :  { %s457_s22 = smul.f32 0.0009765625, %s845_s16  ;;  %s851_s25 = spop %850 }
 0x1be   :  { %s460_s2 = smul.f32 0.0009765625, %s847_s19 }
 0x1bf   :  { %s466_s24 = smul.f32 %s457_s22, %s457_s22 }
 0x1c0   :  { %s471_s26 = smul.f32 %s457_s22, %s1073_s14  ;;  %s462_s5 = ssub.f32 %s460_s2, %s461_s18 }
 0x1c1   :  { %s479_s27 = sadd.f32 %s466_s24, %s461_s18  ;;  %s465_s3 = smul.f32 0.0009765625, %s1078_s23 }
 0x1c2   :  { %s448_s30 = smul.f32 2.0, %s851_s25 }
 0x1c3   :  { %s480_s15 = sadd.f32 0.0001, %s479_s27  ;;  %s474_s7 = smul.f32 %s473_s21, %s457_s22 }
 0x1c4   :  { %s467_s6 = ssub.f32 %s465_s3, %s466_s24  ;;  %s470_s9 = smul.f32 0.0009765625, %s851_s25 }
 0x1c5   :  { %s1082_s4 = ssub.f32 %s847_s19, %s448_s30 }
 0x1c6   :  { %s481_s20 = sadd.f32 %s467_s6, %s462_s5 }
 0x1c7   :  { %s450_s0 = sadd.f32 %s1078_s23, %s1082_s4 }
 0x1c8   :  { %s482_s28 = sadd.f32 0.0009, %s481_s20 }
 0x1c9   :  { %s472_s29 = ssub.f32 %s470_s9, %s471_s26 }
 0x1ca   :  { %s483_s8 = smul.f32 %s482_s28, %s480_s15  ;;  %s475_s11 = sadd.f32 0.0001, %s474_s7 }
 0x1cb   :  { %s476_s10 = smul.f32 2.0, %s472_s29 }
 0x1cc   :  { %v484_v34 = vstv %s483_s8 }
 0x1cd   :  { %908 = vrcp.f32 %v484_v34  ;;  %s477_s12 = sadd.f32 0.0009, %s476_s10  ;;  %v632_v34 = vadd.f32 %v631_v28, %v630_v5 }
 0x1cf   :  { %s1086_s13 = smul.f32 %s477_s12, %s475_s11 }
 0x1d1   :  { %1145 = sst [smem:[#allocation7_spill]] %s1086_s13 }
 0x1d2   :  { %s1149_s23 = sld [smem:[#allocation7_spill]] }
 0x1da   :  { %v909_v48 = vpop.eup %908 }
 0x1db   :  { %852 = vpush %v909_v48  ;;  %v697_v48 = vrot.slane %v696_v46, 2 }
 0x1dc   :  { %854 = vpush %v496_v49  ;;  %v732_v49 = vadd.f32 %v731_v47, %v730_v43 }
 0x1dd   :  { %856 = vpush %v505_v53  ;;  %v715_v53 = vrot.slane %v714_v0, 2 }
 0x1de   :  { %858 = vpush %v514_v54  ;;  %v724_v54 = vrot.slane %v723_v10, 2 }
 0x1df   :  { %860 = vpush %v523_v55  ;;  %v733_v55 = vrot.slane %v732_v49, 2 }
 0x1e0   :  { %862 = vpush %v532_v56  ;;  %v698_v56 = vadd.f32 %v697_v48, %v696_v46 }
 0x1e2   :  { %v699_v61 = vrot.slane %v698_v56, 1 }
 0x1e4   :  { %v700_v4 = vadd.f32 %v699_v61, %v698_v56 }
 0x20c   :  { %s1088_s14 = spop %852 }
 0x20d   :  { %1146 = sst [smem:[#allocation6_spill]] %s1088_s14  ;;  %s855_s17 = spop %854 }
 0x20e   :  { %s540_s18 = smul.f32 0.0009765625, %s855_s17  ;;  %s857_s19 = spop %856 }
 0x20f   :  { %s543_s21 = smul.f32 0.0009765625, %s857_s19  ;;  %s859_s22 = spop %858 }
 0x210   :  { %s547_s2 = smul.f32 %s540_s18, %s540_s18  ;;  %s861_s25 = spop %860 }
 0x211   :  { %s559_s24 = smul.f32 2.0, %s540_s18  ;;  %s863_s3 = spop %862 }
 0x212   :  { %s552_s26 = smul.f32 %s543_s21, %s543_s21  ;;  %s1147_s14 = smov 1e-12  }
 0x213   :  { %s557_s27 = smul.f32 %s543_s21, %s540_s18 }
 0x214   :  { %s565_s5 = sadd.f32 %s552_s26, %s547_s2  ;;  %s546_s30 = smul.f32 0.0009765625, %s859_s22 }
 0x215   :  { %s551_s15 = smul.f32 0.0009765625, %s861_s25 }
 0x216   :  { %s566_s6 = sadd.f32 0.0001, %s565_s5  ;;  %s534_s7 = smul.f32 2.0, %s863_s3 }
 0x217   :  { %s548_s9 = ssub.f32 %s546_s30, %s547_s2  ;;  %s560_s28 = smul.f32 %s559_s24, %s543_s21 }
 0x218   :  { %s553_s20 = ssub.f32 %s551_s15, %s552_s26  ;;  %s556_s12 = smul.f32 0.0009765625, %s863_s3 }
 0x219   :  { %s535_s29 = ssub.f32 %s859_s22, %s534_s7 }
 0x21a   :  { %s567_s8 = sadd.f32 %s553_s20, %s548_s9 }
 0x21b   :  { %s536_s10 = sadd.f32 %s861_s25, %s535_s29 }
 0x21c   :  { %s568_s11 = sadd.f32 0.0009, %s567_s8 }
 0x21d   :  { %s537_s17 = sadd.f32 %s536_s10, %s450_s0 }
 0x21e   :  { %s569_s19 = smul.f32 %s568_s11, %s566_s6  ;;  %s558_s16 = ssub.f32 %s556_s12, %s557_s27 }
 0x21f   :  { %s577_s1 = smul.f32 0.00048828125, %s537_s17  ;;  %s561_s13 = sadd.f32 0.0001, %s560_s28 }
 0x220   :  { %v570_v57 = vstv %s569_s19  ;;  %s562_s18 = smul.f32 2.0, %s558_s16  ;;  %s1148_s22 = sld [smem:[#allocation6_spill]] }
 0x221   :  { %910 = vrcp.f32 %v570_v57  ;;  %s578_s5 = smax.f32 %s1147_s14, %s577_s1  ;;  %589 = sst [smem:[#allocation3 + $0x3]] %s577_s1  ;;  %v707_v57 = vadd.f32 %v706_v52, %v705_v1 }
 0x222   :  { %v579_v58 = vstv %s578_s5  ;;  %s563_s2 = sadd.f32 0.0009, %s562_s18 }
 0x223   :  { %912 = vrcp.f32 %v579_v58  ;;  %v716_v58 = vadd.f32 %v715_v53, %v714_v0  ;;  %v708_v62 = vrot.slane %v707_v57, 1 }
 0x224   :  { %s564_s21 = smul.f32 %s563_s2, %s561_s13 }
 0x225   :  { %v717_v63 = vrot.slane %v716_v58, 1  ;;  %v709_v8 = vadd.f32 %v708_v62, %v707_v57 }
 0x226   :  { %s1150_s13 = smul.f32 %s1148_s22, %s1149_s23 }
 0x227   :  { %v718_v9 = vadd.f32 %v717_v63, %v716_v58 }
 0x22e   :  { %v911_v59 = vpop.eup %910 }
 0x22f   :  { %864 = vpush %v911_v59  ;;  %v725_v59 = vadd.f32 %v724_v54, %v723_v10 }
 0x230   :  { %v913_v60 = vpop.eup %912 }
 0x231   :  { %866 = vpush %v913_v60  ;;  %v734_v60 = vadd.f32 %v733_v55, %v732_v49  ;;  %v726_v2 = vrot.slane %v725_v59, 1 }
 0x233   :  { %v735_v7 = vrot.slane %v734_v60, 1  ;;  %v727_v12 = vadd.f32 %v726_v2, %v725_v59 }
 0x235   :  { %v736_v13 = vadd.f32 %v735_v7, %v734_v60 }
 0x260   :  { %s865_s4 = spop %864 }
 0x261   :  { %s573_s0 = smul.f32 %s865_s4, %s564_s21 }
 0x262   :  { %s867_s1 = spop %866 }
 0x263   :  { %s574_s16 = sadd.f32 %s573_s0, %s1150_s13  ;;  %v582_v14 = vstv %s867_s1 }
 0x264   :  { %914 = vlog2.f32 %v582_v14 }
 0x265   :  { %s592_s24 = smul.f32 0.5, %s574_s16 }
 0x267   :  { %594 = sst [smem:[#allocation3 + $0x4]] %s592_s24 }
 0x271   :  { %v915_v27 = vpop.eup %914 }
 0x272   :  { %v584_v30 = vmul.f32 0.6931472, %v915_v27 }
 0x274   :  { %868 = vpush %v584_v30 }
 0x275   :  { %870 = vpush %v614_v32 }
 0x276   :  { %872 = vpush %v623_v33 }
 0x277   :  { %874 = vpush %v632_v34 }
 0x278   :  { %876 = vpush %v641_v36 }
 0x279   :  { %878 = vpush %v650_v35 }
 0x2a5   :  { %s869_s25 = spop %868 }
 0x2a6   :  { %s586_s26 = smul.f32 0.4342945, %s869_s25  ;;  %s871_s27 = spop %870 }
 0x2a7   :  { %s1099_s3 = smul.f32 0.0009765625, %s871_s27  ;;  %s873_s30 = spop %872 }
 0x2a8   :  { %s587_s15 = smul.f32 10.0, %s586_s26  ;;  %s875_s7 = spop %874 }
 0x2a9   :  { %s665_s6 = smul.f32 %s1099_s3, %s1099_s3  ;;  %s1104_s28 = spop %876 }
 0x2aa   :  { %596 = sst [smem:[#allocation3 + $0x5]] %s587_s15  ;;  %s677_s9 = smul.f32 2.0, %s1099_s3 }
 0x2ab   :  { %s661_s20 = smul.f32 0.0009765625, %s873_s30  ;;  %s879_s10 = spop %878 }
 0x2ac   :  { %s664_s29 = smul.f32 0.0009765625, %s875_s7 }
 0x2ad   :  { %s670_s8 = smul.f32 %s661_s20, %s661_s20 }
 0x2ae   :  { %s675_s11 = smul.f32 %s661_s20, %s1099_s3  ;;  %s666_s19 = ssub.f32 %s664_s29, %s665_s6 }
 0x2af   :  { %s683_s12 = sadd.f32 %s670_s8, %s665_s6  ;;  %s669_s17 = smul.f32 0.0009765625, %s1104_s28 }
 0x2b0   :  { %s652_s18 = smul.f32 2.0, %s879_s10 }
 0x2b1   :  { %s684_s5 = sadd.f32 0.0001, %s683_s12  ;;  %s678_s21 = smul.f32 %s677_s9, %s661_s20 }
 0x2b2   :  { %s671_s2 = ssub.f32 %s669_s17, %s670_s8  ;;  %s674_s23 = smul.f32 0.0009765625, %s879_s10 }
 0x2b3   :  { %s1108_s22 = ssub.f32 %s875_s7, %s652_s18 }
 0x2b4   :  { %s685_s4 = sadd.f32 %s671_s2, %s666_s19 }
 0x2b5   :  { %s654_s0 = sadd.f32 %s1104_s28, %s1108_s22 }
 0x2b6   :  { %s686_s1 = sadd.f32 0.0009, %s685_s4 }
 0x2b7   :  { %s676_s13 = ssub.f32 %s674_s23, %s675_s11 }
 0x2b8   :  { %s687_s16 = smul.f32 %s686_s1, %s684_s5  ;;  %s679_s25 = sadd.f32 0.0001, %s678_s21 }
 0x2b9   :  { %s680_s24 = smul.f32 2.0, %s676_s13 }
 0x2ba   :  { %v688_v11 = vstv %s687_s16 }
 0x2bb   :  { %916 = vrcp.f32 %v688_v11  ;;  %s681_s26 = sadd.f32 0.0009, %s680_s24 }
 0x2bd   :  { %s1112_s27 = smul.f32 %s681_s26, %s679_s25 }
 0x2c8   :  { %v917_v3 = vpop.eup %916 }
 0x2c9   :  { %880 = vpush %v917_v3 }
 0x2ca   :  { %882 = vpush %v700_v4 }
 0x2cb   :  { %884 = vpush %v709_v8 }
 0x2cc   :  { %886 = vpush %v718_v9 }
 0x2cd   :  { %888 = vpush %v727_v12 }
 0x2ce   :  { %890 = vpush %v736_v13 }
 0x2fa   :  { %s1114_s3 = spop %880 }
 0x2fb   :  { %s883_s15 = spop %882 }
 0x2fc   :  { %s744_s6 = smul.f32 0.0009765625, %s883_s15  ;;  %s885_s7 = spop %884 }
 0x2fd   :  { %s747_s9 = smul.f32 0.0009765625, %s885_s7  ;;  %s887_s20 = spop %886 }
 0x2fe   :  { %s751_s29 = smul.f32 %s744_s6, %s744_s6  ;;  %s889_s10 = spop %888 }
 0x2ff   :  { %s763_s8 = smul.f32 2.0, %s744_s6  ;;  %s891_s17 = spop %890 }
 0x300   :  { %s756_s11 = smul.f32 %s747_s9, %s747_s9 }
 0x301   :  { %s761_s12 = smul.f32 %s747_s9, %s744_s6 }
 0x302   :  { %s769_s19 = sadd.f32 %s756_s11, %s751_s29  ;;  %s750_s18 = smul.f32 0.0009765625, %s887_s20 }
 0x303   :  { %s755_s5 = smul.f32 0.0009765625, %s889_s10 }
 0x304   :  { %s770_s2 = sadd.f32 0.0001, %s769_s19  ;;  %s738_s21 = smul.f32 2.0, %s891_s17 }
 0x305   :  { %s752_s23 = ssub.f32 %s750_s18, %s751_s29  ;;  %s764_s1 = smul.f32 %s763_s8, %s747_s9 }
 0x306   :  { %s757_s4 = ssub.f32 %s755_s5, %s756_s11  ;;  %s760_s26 = smul.f32 0.0009765625, %s891_s17 }
 0x307   :  { %s739_s13 = ssub.f32 %s887_s20, %s738_s21  ;;  %s1151_s18 = smov 1e-12  }
 0x308   :  { %s771_s16 = sadd.f32 %s757_s4, %s752_s23  ;;  %s1152_s8 = smul.f32 %s1114_s3, %s1112_s27 }
 0x309   :  { %s740_s24 = sadd.f32 %s889_s10, %s739_s13  ;;  %s935_s17 = smov [#allocation3]  }
 0x30a   :  { %s772_s25 = sadd.f32 0.0009, %s771_s16 }
 0x30b   :  { %s741_s15 = sadd.f32 %s740_s24, %s654_s0 }
 0x30c   :  { %s773_s7 = smul.f32 %s772_s25, %s770_s2  ;;  %s762_s30 = ssub.f32 %s760_s26, %s761_s12 }
 0x30d   :  { %s781_s14 = smul.f32 0.00048828125, %s741_s15  ;;  %s765_s19 = sadd.f32 0.0001, %s764_s1 }
 0x30e   :  { %v774_v14 = vstv %s773_s7  ;;  %s766_s6 = smul.f32 2.0, %s762_s30  ;;  %s1153_s21 = sld [smem:[#allocation8_spill]] }
 0x30f   :  { %918 = vrcp.f32 %v774_v14  ;;  %s782_s29 = smax.f32 %s1151_s18, %s781_s14  ;;  %793 = sst [smem:[#allocation3 + $0x6]] %s781_s14 }
 0x310   :  { %v783_v15 = vstv %s782_s29  ;;  %s767_s9 = sadd.f32 0.0009, %s766_s6 }
 0x311   :  { %920 = vrcp.f32 %v783_v15 }
 0x312   :  { %s768_s20 = smul.f32 %s767_s9, %s765_s19 }
 0x31c   :  { %v919_v16 = vpop.eup %918 }
 0x31d   :  { %892 = vpush %v919_v16 }
 0x31e   :  { %v921_v17 = vpop.eup %920 }
 0x31f   :  { %894 = vpush %v921_v17 }
 0x34e   :  { %s893_s28 = spop %892 }
 0x34f   :  { %s777_s22 = smul.f32 %s893_s28, %s768_s20 }
 0x350   :  { %s895_s0 = spop %894 }
 0x351   :  { %s778_s30 = sadd.f32 %s777_s22, %s1152_s8  ;;  %v786_v18 = vstv %s895_s0 }
 0x352   :  { %922 = vlog2.f32 %v786_v18 }
 0x353   :  { %s796_s10 = smul.f32 0.5, %s778_s30 }
 0x355   :  { %798 = sst [smem:[#allocation3 + $0x7]] %s796_s10 }
 0x35f   :  { %v923_v19 = vpop.eup %922 }
 0x360   :  { %v788_v20 = vmul.f32 0.6931472, %v923_v19 }
 0x362   :  { %896 = vpush %v788_v20 }
 0x393   :  { %s897_s14 = spop %896 }
 0x394   :  { %s790_s11 = smul.f32 0.4342945, %s897_s14 }
 0x396   :  { %s791_s12 = smul.f32 10.0, %s790_s11 }
 0x398   :  { %800 = sst [smem:[#allocation3 + $0x8]] %s791_s12 }
 0x399   :  { %808 = dma.smem_to_hbm %s935_s17, 16, %s1153_s21, [#allocation4]  }
 0x39a   :  { %932 = dma.done.wait [#allocation4], 16  }
 0x39b   :  { %933 = vsyncadd [#allocation4], 4294967280 }
 0x39c   :  { %812 = sfence }
 0x39d   :  { %813 = vsyncpa [#allocation4], 1 }

</bundles_post_ra>
